<compile_context>
chip_gen: v5e
topology: v5e:2x2
jax: 0.10.0
libtpu: 0.0.40
codegen_flags: <defaults>
</compile_context>

<pallas_src>
import functools
import numpy as np
import jax
import jax.numpy as jnp
from jax.experimental import pallas as pl
from jax.experimental.pallas import tpu as pltpu

C_IN = 4                      # observation channels
IMG = 16                      # spatial H = W
FEAT = 32                     # conv feature channels
HID = 32                      # LSTM hidden size
ACT = 8                       # number of discrete actions
KSIZE = 3                     # conv kernel size

HW = IMG * IMG                # 256 (lane-dense spatial axis)
CKK = C_IN * KSIZE * KSIZE    # 36
CKK1 = CKK + 1                # +1 ones row -> conv bias folded into matmul
CKK_PAD = 40                  # contraction dim padded to a multiple of 8
G4H = 4 * HID                 # 128 = gate width = one full lane tile
T_CHUNK = 8                   # timesteps per conv grid step (sublane-aligned)

# Row layout of the packed weight slab (single resident VMEM operand).
R_WL = 0                      # rows [0,64)   : [wih; whh]  (FEAT+HID, 4*HID)
R_WH = 64                     # rows [64,96)  : whead padded to 128 cols
R_BL = 96                     # row 96        : LSTM bias (1, 128)
R_BH = 104                    # row 104       : head bias padded to 128 cols
WPACK_ROWS = 112

# TODO(synk): the external `agent` (ResNet+LSTM backbone) is not defined in the
# source file; a compact synthetic conv+LSTM agent stands in for it here.


def _sigmoid(x):
    # tanh-based sigmoid: transcendental stays on the EUP, no f32 divide.
    return 0.5 * (jnp.tanh(0.5 * x) + 1.0)


# ------------------------- Kernel A: conv + ReLU + pool ------------------------

def _conv_pool_kernel(patches_ref, wc_ref, poolt_ref, pooled_ref):
    # bf16 x bf16 -> f32 on the MXU; N = T_CHUNK*HW = 2048 columns per weight load.
    feat = jnp.dot(wc_ref[...], patches_ref[...],
                   preferred_element_type=jnp.float32)        # (FEAT, T_CHUNK*HW)
    feat = jnp.maximum(feat, 0.0)
    # Per-timestep average pool: block-ones (T_CHUNK, T_CHUNK*HW) against feat^T
    # (contract last dims of both -> A @ B^T).  1/HW already folded into wc.
    pooled = jax.lax.dot_general(
        poolt_ref[...], feat, (((1,), (1,)), ((), ())),
        preferred_element_type=jnp.float32)                   # (T_CHUNK, FEAT)
    pooled_ref[...] = pooled


# --------------------- Kernel B: LSTM + head + sample (loop) -------------------

def _recurrent_kernel(t_steps, pooled_ref, gumbel_ref, wpack_ref, hc0_ref,
                      out_ref, hc_out_ref):
    # Resident packed weights, loaded once and hoisted out of the loop.
    w_xh = wpack_ref[R_WL:R_WL + FEAT + HID, :]               # (64, 128) [wih; whh]
    w_hd = wpack_ref[R_WH:R_WH + HID, :]                      # (32, 128)
    b_l = wpack_ref[R_BL:R_BL + 1, :]                         # (1, 128)
    b_hd = wpack_ref[R_BH:R_BH + 1, :]                        # (1, 128)

    lane = jax.lax.broadcasted_iota(jnp.int32, (1, G4H), 1)
    valid = lane < ACT
    neg = jnp.float32(-1e30)

    # Zero the (possibly padded) staged output block; rows [0, t_steps) are
    # overwritten below, the whole block is written back with one DMA.
    out_ref[...] = jnp.zeros_like(out_ref)

    def step(t, carry):
        h, c = carry
        pooled_row = pooled_ref[pl.ds(t, 1), :]               # (1, FEAT)

        # Fused gate matmul: [pooled | h] @ [wih; whh]  -> one MXU push per step.
        xh = jnp.concatenate([pooled_row, h], axis=-1)        # (1, 64)
        gates = jnp.dot(xh, w_xh,
                        preferred_element_type=jnp.float32) + b_l   # (1, 128)
        i_g = _sigmoid(gates[:, 0 * HID:1 * HID])
        f_g = _sigmoid(gates[:, 1 * HID:2 * HID])
        g_g = jnp.tanh(gates[:, 2 * HID:3 * HID])
        o_g = _sigmoid(gates[:, 3 * HID:4 * HID])
        c_new = f_g * c + i_g * g_g
        h_new = o_g * jnp.tanh(c_new)

        # Action head, padded to a full 128-lane row.
        scores = jnp.dot(h_new, w_hd,
                         preferred_element_type=jnp.float32) + b_hd  # (1, 128)
        scores_m = jnp.where(valid, scores, neg)

        # Softmax: EUP exp + approx reciprocal (+1 Newton step) — no VPU divide.
        m = jnp.max(scores_m, axis=-1, keepdims=True)
        e = jnp.exp(scores_m - m)
        z = jnp.sum(e, axis=-1, keepdims=True)
        r = pl.reciprocal(z, approx=True)
        r = r * (2.0 - z * r)
        probs = e * r                                         # zeros beyond ACT
        log_probs = jnp.where(valid, scores - m - jnp.log(z), 0.0)

        # Categorical(probs).sample() via Gumbel-max.
        g_row = gumbel_ref[pl.ds(t, 1), :]
        y = jnp.where(valid, log_probs + g_row, neg)
        y_max = jnp.max(y, axis=-1, keepdims=True)
        action = jnp.min(jnp.where(y >= y_max, lane, G4H),
                         axis=-1, keepdims=True)              # (1,1) int32
        logp = jnp.sum(jnp.where(lane == action, log_probs, 0.0),
                       axis=-1, keepdims=True)                # (1,1)

        # Single lane-dense staged row: [probs(8) | log_prob | action | 0...]
        row = (probs
               + jnp.where(lane == ACT, logp, 0.0)
               + jnp.where(lane == ACT + 1, action.astype(jnp.float32), 0.0))
        out_ref[pl.ds(t, 1), :] = row
        return h_new, c_new

    h_fin, c_fin = jax.lax.fori_loop(
        0, t_steps, step, (hc0_ref[0:1, :], hc0_ref[1:2, :]),
        unroll=min(t_steps, 8))

    hc_out_ref[...] = jnp.concatenate([h_fin, c_fin], axis=0)


# ----------------------------- host-side helpers -----------------------------

def _im2col_aug(obs_seq):
    """(T, C, H, W) -> (T, CKK1, H*W); last row = ones (conv-bias fold)."""
    t_steps = obs_seq.shape[0]
    xp = jnp.pad(obs_seq, ((0, 0), (0, 0), (1, 1), (1, 1)))
    cols = []
    for c in range(C_IN):
        for dy in range(KSIZE):
            for dx in range(KSIZE):
                cols.append(
                    xp[:, c, dy:dy + IMG, dx:dx + IMG].reshape(t_steps, HW))
    cols.append(jnp.ones((t_steps, HW), jnp.float32))
    return jnp.stack(cols, axis=1)                            # (T, CKK1, HW)


def _flatten_patches(patches, t_pad):
    """(T, CKK1, HW) -> bf16 (CKK_PAD, t_pad*HW): zero-pad rows + time, flatten N."""
    t_steps = patches.shape[0]
    p = jnp.pad(patches, ((0, t_pad - t_steps), (0, CKK_PAD - CKK1), (0, 0)))
    p = jnp.transpose(p, (1, 0, 2)).reshape(CKK_PAD, t_pad * HW)
    return p.astype(jnp.bfloat16)


def _gumbel(key, t_steps):
    u = jax.random.uniform(key, (t_steps, ACT), jnp.float32,
                           minval=1e-6, maxval=1.0 - 1e-6)
    return -jnp.log(-jnp.log(u))


def _pack_params(p):
    """Fold conv bias + 1/HW into wc; pack LSTM/head weights+biases into one slab."""
    wc_aug = jnp.concatenate([p["wc"], p["bc"]], axis=0)            # (37, 32)
    wc_aug = jnp.pad(wc_aug, ((0, CKK_PAD - CKK1), (0, 0)))         # (40, 32)
    wc_scaled = (wc_aug.T * (1.0 / HW)).astype(jnp.bfloat16)        # (32, 40)

    whead_pad = jnp.zeros((HID, G4H), jnp.float32).at[:, :ACT].set(p["whead"])
    bhead_pad = jnp.zeros((1, G4H), jnp.float32).at[:, :ACT].set(p["bhead"])
    wpack = jnp.zeros((WPACK_ROWS, G4H), jnp.float32)
    wpack = wpack.at[R_WL:R_WL + FEAT, :].set(p["wih"])
    wpack = wpack.at[R_WL + FEAT:R_WL + FEAT + HID, :].set(p["whh"])
    wpack = wpack.at[R_WH:R_WH + HID, :].set(whead_pad)
    wpack = wpack.at[R_BL:R_BL + 1, :].set(p["blstm"])
    wpack = wpack.at[R_BH:R_BH + 1, :].set(bhead_pad)
    return wc_scaled, wpack


def init_params(key):
    """Deterministic synthetic weights for the ResNet-LSTM agent stand-in."""
    ks = jax.random.split(key, 7)
    return {
        "wc": 0.1 * jax.random.normal(ks[0], (CKK, FEAT), jnp.float32),
        "bc": 0.1 * jax.random.normal(ks[1], (1, FEAT), jnp.float32),
        "wih": 0.1 * jax.random.normal(ks[2], (FEAT, G4H), jnp.float32),
        "whh": 0.1 * jax.random.normal(ks[3], (HID, G4H), jnp.float32),
        "blstm": 0.1 * jax.random.normal(ks[4], (1, G4H), jnp.float32),
        "whead": 0.5 * jax.random.normal(ks[5], (HID, ACT), jnp.float32),
        "bhead": 0.1 * jax.random.normal(ks[6], (1, ACT), jnp.float32),
    }


@jax.jit
def _rollout(obs_seq, key, wc_scaled, wpack, hc0):
    t_steps = obs_seq.shape[0]
    t_pad = ((t_steps + T_CHUNK - 1) // T_CHUNK) * T_CHUNK
    n_chunks = t_pad // T_CHUNK

    patches_flat = _flatten_patches(_im2col_aug(obs_seq), t_pad)   # (40, t_pad*HW) bf16
    g = _gumbel(key, t_steps)
    gumbel_pad = jnp.zeros((t_pad, G4H), jnp.float32).at[:t_steps, :ACT].set(g)

    # Per-timestep block-ones pooling matrix (constant-folded under jit).
    col = jnp.arange(T_CHUNK * HW, dtype=jnp.int32)
    pool_t = (col[None, :] // HW ==
              jnp.arange(T_CHUNK, dtype=jnp.int32)[:, None]).astype(jnp.float32)

    # -------- Kernel A: batched conv / ReLU / pool, parallel over chunks -------
    conv_grid = pltpu.PrefetchScalarGridSpec(
        num_scalar_prefetch=0,
        grid=(n_chunks,),
        in_specs=[
            pl.BlockSpec((CKK_PAD, T_CHUNK * HW), lambda c: (0, c)),  # patches chunk
            pl.BlockSpec((FEAT, CKK_PAD), lambda c: (0, 0)),          # conv weights (resident)
            pl.BlockSpec((T_CHUNK, T_CHUNK * HW), lambda c: (0, 0)),  # pooling ones (resident)
        ],
        out_specs=pl.BlockSpec((T_CHUNK, FEAT), lambda c: (c, 0)),
    )
    pooled = pl.pallas_call(
        _conv_pool_kernel,
        out_shape=jax.ShapeDtypeStruct((t_pad, FEAT), jnp.float32),
        grid_spec=conv_grid,
        compiler_params=pltpu.CompilerParams(
            dimension_semantics=("parallel",)),                       # no t-dependence
    )(patches_flat, wc_scaled, pool_t)

    # -------- Kernel B: one invocation, in-kernel fori_loop over timesteps -----
    rec_grid = pltpu.PrefetchScalarGridSpec(
        num_scalar_prefetch=0,
        grid=(1,),
        in_specs=[
            pl.BlockSpec((t_pad, FEAT), lambda i: (0, 0)),            # pooled features
            pl.BlockSpec((t_pad, G4H), lambda i: (0, 0)),             # gumbel noise
            pl.BlockSpec((WPACK_ROWS, G4H), lambda i: (0, 0)),        # packed weights
            pl.BlockSpec((2, HID), lambda i: (0, 0)),                 # initial h/c
        ],
        out_specs=(
            pl.BlockSpec((t_pad, G4H), lambda i: (0, 0)),             # packed per-step outputs
            pl.BlockSpec((2, HID), lambda i: (0, 0)),                 # final h/c
        ),
    )
    out, hc = pl.pallas_call(
        functools.partial(_recurrent_kernel, t_steps),
        out_shape=(jax.ShapeDtypeStruct((t_pad, G4H), jnp.float32),
                   jax.ShapeDtypeStruct((2, HID), jnp.float32)),
        grid_spec=rec_grid,
        compiler_params=pltpu.CompilerParams(
            dimension_semantics=("arbitrary",)),                      # true recurrence
    )(pooled, gumbel_pad, wpack, hc0)

    out = out[:t_steps]
    probs = out[:, :ACT]
    log_probs = out[:, ACT]
    actions = out[:, ACT + 1].astype(jnp.int32)
    return actions, log_probs, probs, hc


class Policy:
    """JAX/Pallas analogue of the PyTorch Policy module (recurrent across steps)."""

    def __init__(self, params):
        assert G4H == 128, "packing assumes 4*HID == 128 lanes"
        self.wc_scaled, self.wpack = _pack_params(params)
        self.h = jnp.zeros((1, HID), jnp.float32)
        self.c = jnp.zeros((1, HID), jnp.float32)
        self.saved_log_probs = []
        self.rewards = []

    def forward_rollout(self, observations, key):
        """Process T observations with two pallas_calls (conv batch + recurrence)."""
        obs = jnp.asarray(observations, jnp.float32)
        hc0 = jnp.concatenate([self.h, self.c], axis=0)
        actions, log_probs, probs, hc = _rollout(
            obs, key, self.wc_scaled, self.wpack, hc0)
        self.h = hc[0:1, :]
        self.c = hc[1:2, :]
        for t in range(obs.shape[0]):
            self.saved_log_probs.append(log_probs[t])
        return actions, probs

    def forward(self, observation, key):
        """Original per-step API: returns action.item(); hidden state carries."""
        actions, probs = self.forward_rollout(
            jnp.asarray(observation, jnp.float32)[None], key)
        return int(actions[0]), probs[0]


# ------------------------- pure-JAX reference (check) -------------------------

def _reference_rollout(obs_seq, gumbel, params, h0, c0):
    hi = jax.lax.Precision.HIGHEST
    patches = _im2col_aug(jnp.asarray(obs_seq, jnp.float32))
    wc_aug = jnp.concatenate([params["wc"], params["bc"]], axis=0).T
    h, c = h0, c0
    acts, lp_rows, probs_all = [], [], []
    for t in range(patches.shape[0]):
        feat = jnp.maximum(jnp.dot(wc_aug, patches[t], precision=hi), 0.0)
        pooled = jnp.mean(feat, axis=1, keepdims=True).T
        gates = (jnp.dot(pooled, params["wih"], precision=hi)
                 + jnp.dot(h, params["whh"], precision=hi) + params["blstm"])
        i = jax.nn.sigmoid(gates[:, 0 * HID:1 * HID])
        f = jax.nn.sigmoid(gates[:, 1 * HID:2 * HID])
        g = jnp.tanh(gates[:, 2 * HID:3 * HID])
        o = jax.nn.sigmoid(gates[:, 3 * HID:4 * HID])
        c = f * c + i * g
        h = o * jnp.tanh(c)
        scores = jnp.dot(h, params["whead"], precision=hi) + params["bhead"]
        pr = jax.nn.softmax(scores, axis=-1)
        lp = jnp.log(pr)
        a = jnp.argmax(lp + gumbel[t][None, :], axis=-1)[0]
        acts.append(a)
        lp_rows.append(lp[0])
        probs_all.append(pr[0])
    return (jnp.stack(acts), jnp.stack(lp_rows), jnp.stack(probs_all), h, c)


if __name__ == "__main__":
    root = jax.random.PRNGKey(0)
    pkey, okey, skey = jax.random.split(root, 3)

    params = init_params(pkey)
    T = 8
    obs_seq = jax.random.normal(okey, (T, C_IN, IMG, IMG), jnp.float32)

    policy = Policy(params)
    actions, probs = policy.forward_rollout(obs_seq, skey)
    actions = jax.block_until_ready(actions)

    acts_np = np.asarray(actions)
    probs_np = np.asarray(probs)
    logps_np = np.asarray(jnp.stack(policy.saved_log_probs))

    # Reference with the identical Gumbel noise stream (f32 throughout; the
    # kernel uses bf16 conv inputs, so tolerances are widened accordingly).
    g = _gumbel(skey, T)
    ref_a, ref_lp_rows, ref_probs, ref_h, ref_c = _reference_rollout(
        obs_seq, g, params,
        jnp.zeros((1, HID), jnp.float32), jnp.zeros((1, HID), jnp.float32))
    ref_probs = np.asarray(ref_probs)
    ref_lp_rows = np.asarray(ref_lp_rows)

    assert acts_np.shape == (T,)
    assert np.all((acts_np >= 0) & (acts_np < ACT))
    assert np.max(np.abs(probs_np.sum(axis=1) - 1.0)) < 1e-3
    assert np.allclose(probs_np, ref_probs, atol=5e-3)
    # log_prob of the kernel's sampled action matches the reference evaluated
    # at the same action (avoids measure-zero tie-break sensitivity).
    ref_lp_at_actions = ref_lp_rows[np.arange(T), acts_np]
    assert np.allclose(logps_np, ref_lp_at_actions, atol=2e-2)
    # Recurrent state carried correctly across all T steps.
    assert np.allclose(np.asarray(policy.h), np.asarray(ref_h), atol=1e-2)
    assert np.allclose(np.asarray(policy.c), np.asarray(ref_c), atol=1e-2)
    assert len(policy.saved_log_probs) == T
    print("KERNEL_OK")
</pallas_src>

<mosaic_0001>
module attributes {stable_mosaic.version = 11 : i64} {
  func.func @_conv_pool_kernel(%arg0: i32, %arg1: memref<40x2048xbf16, #tpu.memory_space<vmem>>, %arg2: memref<32x40xbf16, #tpu.memory_space<vmem>>, %arg3: memref<8x2048xf32, #tpu.memory_space<vmem>>, %arg4: memref<8x32xf32, #tpu.memory_space<vmem>>) attributes {dimension_semantics = [#tpu.dimension_semantics<parallel>], iteration_bounds = array<i64: 1>, scalar_prefetch = 0 : i64, scratch_operands = 0 : i64, tpu.core_type = #tpu.core_type<tc>, window_params = [{transform_indices = @transform_0, window_bounds = array<i64: 40, 2048>}, {pipeline_mode = #tpu.pipeline_mode<synchronous>, transform_indices = @transform_1, window_bounds = array<i64: 32, 40>}, {pipeline_mode = #tpu.pipeline_mode<synchronous>, transform_indices = @transform_2, window_bounds = array<i64: 8, 2048>}, {transform_indices = @transform_3, window_bounds = array<i64: 8, 32>}]} {
    %c0 = arith.constant 0 : index
    %c0_0 = arith.constant 0 : index
    %0 = vector.load %arg2[%c0, %c0_0] : memref<32x40xbf16, #tpu.memory_space<vmem>>, vector<32x40xbf16>
    %c0_1 = arith.constant 0 : index
    %c0_2 = arith.constant 0 : index
    %1 = vector.load %arg1[%c0_1, %c0_2] : memref<40x2048xbf16, #tpu.memory_space<vmem>>, vector<40x2048xbf16>
    %cst = arith.constant dense<0.000000e+00> : vector<32x2048xf32>
    %2 = tpu.matmul %0, %1, %cst {dimension_numbers = #tpu.dot_dimension_numbers<[1], [0], [0], [1], [0, 0, 1, 1], [], []>} : vector<32x40xbf16>, vector<40x2048xbf16>, vector<32x2048xf32> -> vector<32x2048xf32>
    %cst_3 = arith.constant 0.000000e+00 : f32
    %3 = vector.broadcast %cst_3 : f32 to vector<32x2048xf32>
    %4 = arith.maximumf %2, %3 : vector<32x2048xf32>
    %c0_4 = arith.constant 0 : index
    %c0_5 = arith.constant 0 : index
    %5 = vector.load %arg3[%c0_4, %c0_5] : memref<8x2048xf32, #tpu.memory_space<vmem>>, vector<8x2048xf32>
    %cst_6 = arith.constant dense<0.000000e+00> : vector<8x32xf32>
    %6 = tpu.matmul %5, %4, %cst_6 {dimension_numbers = #tpu.dot_dimension_numbers<[1], [1], [0], [0], [0, 0, 1, 0], [], []>} : vector<8x2048xf32>, vector<32x2048xf32>, vector<8x32xf32> -> vector<8x32xf32>
    %c0_7 = arith.constant 0 : index
    %c0_8 = arith.constant 0 : index
    %7 = vector.load %arg4[%c0_7, %c0_8] : memref<8x32xf32, #tpu.memory_space<vmem>>, vector<8x32xf32>
    tpu.vector_store %arg4[%c0_7, %c0_8], %6 {strides = array<i32>} : memref<8x32xf32, #tpu.memory_space<vmem>>, vector<8x32xf32>,
    return
  }
  func.func @transform_0(%arg0: i32) -> (i32, i32) {
    %c0_i32 = arith.constant 0 : i32
    %c0_i32_0 = arith.constant 0 : i32
    return %c0_i32, %arg0 : i32, i32
  }
  func.func @transform_1(%arg0: i32) -> (i32, i32) {
    %c0_i32 = arith.constant 0 : i32
    %c0_i32_0 = arith.constant 0 : i32
    %c0_i32_1 = arith.constant 0 : i32
    return %c0_i32, %c0_i32_0 : i32, i32
  }
  func.func @transform_2(%arg0: i32) -> (i32, i32) {
    %c0_i32 = arith.constant 0 : i32
    %c0_i32_0 = arith.constant 0 : i32
    %c0_i32_1 = arith.constant 0 : i32
    return %c0_i32, %c0_i32_0 : i32, i32
  }
  func.func @transform_3(%arg0: i32) -> (i32, i32) {
    %c0_i32 = arith.constant 0 : i32
    %c0_i32_0 = arith.constant 0 : i32
    return %arg0, %c0_i32 : i32, i32
  }
}

module attributes {stable_mosaic.version = 11 : i64} {
  func.func @_recurrent_kernel(%arg0: i32, %arg1: memref<8x32xf32, #tpu.memory_space<vmem>>, %arg2: memref<8x128xf32, #tpu.memory_space<vmem>>, %arg3: memref<112x128xf32, #tpu.memory_space<vmem>>, %arg4: memref<2x32xf32, #tpu.memory_space<vmem>>, %arg5: memref<8x128xf32, #tpu.memory_space<vmem>>, %arg6: memref<2x32xf32, #tpu.memory_space<vmem>>) attributes {dimension_semantics = [#tpu.dimension_semantics<arbitrary>], iteration_bounds = array<i64: 1>, scalar_prefetch = 0 : i64, scratch_operands = 0 : i64, tpu.core_type = #tpu.core_type<tc>, window_params = [{pipeline_mode = #tpu.pipeline_mode<synchronous>, transform_indices = @transform_0, window_bounds = array<i64: 8, 32>}, {pipeline_mode = #tpu.pipeline_mode<synchronous>, transform_indices = @transform_1, window_bounds = array<i64: 8, 128>}, {pipeline_mode = #tpu.pipeline_mode<synchronous>, transform_indices = @transform_2, window_bounds = array<i64: 112, 128>}, {pipeline_mode = #tpu.pipeline_mode<synchronous>, transform_indices = @transform_3, window_bounds = array<i64: 2, 32>}, {pipeline_mode = #tpu.pipeline_mode<synchronous>, transform_indices = @transform_4, window_bounds = array<i64: 8, 128>}, {pipeline_mode = #tpu.pipeline_mode<synchronous>, transform_indices = @transform_5, window_bounds = array<i64: 2, 32>}]} {
    %c0 = arith.constant 0 : index
    %c0_0 = arith.constant 0 : index
    %0 = vector.load %arg3[%c0, %c0_0] : memref<112x128xf32, #tpu.memory_space<vmem>>, vector<64x128xf32>
    %c64 = arith.constant 64 : index
    %c0_1 = arith.constant 0 : index
    %1 = vector.load %arg3[%c64, %c0_1] : memref<112x128xf32, #tpu.memory_space<vmem>>, vector<32x128xf32>
    %c96 = arith.constant 96 : index
    %c0_2 = arith.constant 0 : index
    %2 = vector.load %arg3[%c96, %c0_2] : memref<112x128xf32, #tpu.memory_space<vmem>>, vector<1x128xf32>
    %c104 = arith.constant 104 : index
    %c0_3 = arith.constant 0 : index
    %3 = vector.load %arg3[%c104, %c0_3] : memref<112x128xf32, #tpu.memory_space<vmem>>, vector<1x128xf32>
    %4 = tpu.iota {dimensions = array<i32: 1>} : vector<1x128xi32>
    %c8_i32 = arith.constant 8 : i32
    %5 = vector.broadcast %c8_i32 : i32 to vector<1x128xi32>
    %6 = arith.cmpi slt, %4, %5 : vector<1x128xi32>
    %cst = arith.constant 0.000000e+00 : f32
    %7 = vector.broadcast %cst : f32 to vector<8x128xf32>
    %c0_4 = arith.constant 0 : index
    %c0_5 = arith.constant 0 : index
    %8 = vector.load %arg5[%c0_4, %c0_5] : memref<8x128xf32, #tpu.memory_space<vmem>>, vector<8x128xf32>
    tpu.vector_store %arg5[%c0_4, %c0_5], %7 {strides = array<i32>} : memref<8x128xf32, #tpu.memory_space<vmem>>, vector<8x128xf32>,
    %c0_6 = arith.constant 0 : index
    %c0_7 = arith.constant 0 : index
    %9 = vector.load %arg4[%c0_6, %c0_7] : memref<2x32xf32, #tpu.memory_space<vmem>>, vector<1x32xf32>
    %c1 = arith.constant 1 : index
    %c0_8 = arith.constant 0 : index
    %10 = vector.load %arg4[%c1, %c0_8] : memref<2x32xf32, #tpu.memory_space<vmem>>, vector<1x32xf32>
    %cst_9 = arith.constant -1.000000e+30 : f32
    %c0_i32 = arith.constant 0 : i32
    %11 = arith.index_cast %c0_i32 : i32 to index
    %c0_10 = arith.constant 0 : index
    %12 = vector.load %arg1[%11, %c0_10] : memref<8x32xf32, #tpu.memory_space<vmem>>, vector<1x32xf32>
    %13 = tpu.concatenate %12, %9 in 1 : vector<1x32xf32>, vector<1x32xf32> -> vector<1x64xf32>
    %cst_11 = arith.constant dense<0.000000e+00> : vector<1x128xf32>
    %14 = tpu.matmul %13, %0, %cst_11 {dimension_numbers = #tpu.dot_dimension_numbers<[1], [0], [0], [1], [0, 0, 1, 1], [], []>} : vector<1x64xf32>, vector<64x128xf32>, vector<1x128xf32> -> vector<1x128xf32>
    %15 = arith.addf %14, %2 : vector<1x128xf32>
    %16 = vector.extract_strided_slice %15 {offsets = [0, 0], sizes = [1, 32], strides = [1, 1]} : vector<1x128xf32> to vector<1x32xf32>
    %cst_12 = arith.constant 5.000000e-01 : f32
    %17 = vector.broadcast %cst_12 : f32 to vector<1x32xf32>
    %18 = arith.mulf %17, %16 : vector<1x32xf32>
    %19 = math.tanh %18 : vector<1x32xf32>
    %cst_13 = arith.constant 1.000000e+00 : f32
    %20 = vector.broadcast %cst_13 : f32 to vector<1x32xf32>
    %21 = arith.addf %19, %20 : vector<1x32xf32>
    %cst_14 = arith.constant 5.000000e-01 : f32
    %22 = vector.broadcast %cst_14 : f32 to vector<1x32xf32>
    %23 = arith.mulf %22, %21 : vector<1x32xf32>
    %24 = vector.extract_strided_slice %15 {offsets = [0, 32], sizes = [1, 32], strides = [1, 1]} : vector<1x128xf32> to vector<1x32xf32>
    %cst_15 = arith.constant 5.000000e-01 : f32
    %25 = vector.broadcast %cst_15 : f32 to vector<1x32xf32>
    %26 = arith.mulf %25, %24 : vector<1x32xf32>
    %27 = math.tanh %26 : vector<1x32xf32>
    %cst_16 = arith.constant 1.000000e+00 : f32
    %28 = vector.broadcast %cst_16 : f32 to vector<1x32xf32>
    %29 = arith.addf %27, %28 : vector<1x32xf32>
    %cst_17 = arith.constant 5.000000e-01 : f32
    %30 = vector.broadcast %cst_17 : f32 to vector<1x32xf32>
    %31 = arith.mulf %30, %29 : vector<1x32xf32>
    %32 = vector.extract_strided_slice %15 {offsets = [0, 64], sizes = [1, 32], strides = [1, 1]} : vector<1x128xf32> to vector<1x32xf32>
    %33 = math.tanh %32 : vector<1x32xf32>
    %34 = vector.extract_strided_slice %15 {offsets = [0, 96], sizes = [1, 32], strides = [1, 1]} : vector<1x128xf32> to vector<1x32xf32>
    %cst_18 = arith.constant 5.000000e-01 : f32
    %35 = vector.broadcast %cst_18 : f32 to vector<1x32xf32>
    %36 = arith.mulf %35, %34 : vector<1x32xf32>
    %37 = math.tanh %36 : vector<1x32xf32>
    %cst_19 = arith.constant 1.000000e+00 : f32
    %38 = vector.broadcast %cst_19 : f32 to vector<1x32xf32>
    %39 = arith.addf %37, %38 : vector<1x32xf32>
    %cst_20 = arith.constant 5.000000e-01 : f32
    %40 = vector.broadcast %cst_20 : f32 to vector<1x32xf32>
    %41 = arith.mulf %40, %39 : vector<1x32xf32>
    %42 = arith.mulf %31, %10 : vector<1x32xf32>
    %43 = arith.mulf %23, %33 : vector<1x32xf32>
    %44 = arith.addf %42, %43 : vector<1x32xf32>
    %45 = math.tanh %44 : vector<1x32xf32>
    %46 = arith.mulf %41, %45 : vector<1x32xf32>
    %cst_21 = arith.constant dense<0.000000e+00> : vector<1x128xf32>
    %47 = tpu.matmul %46, %1, %cst_21 {dimension_numbers = #tpu.dot_dimension_numbers<[1], [0], [0], [1], [0, 0, 1, 1], [], []>} : vector<1x32xf32>, vector<32x128xf32>, vector<1x128xf32> -> vector<1x128xf32>
    %48 = arith.addf %47, %3 : vector<1x128xf32>
    %49 = vector.broadcast %cst_9 : f32 to vector<1x128xf32>
    %50 = arith.select %6, %48, %49 : vector<1x128xi1>, vector<1x128xf32>
    %cst_22 = arith.constant dense<0xFF800000> : vector<1xf32>
    %51 = vector.multi_reduction <maximumf>, %50, %cst_22 [1] : vector<1x128xf32> to vector<1xf32>
    %52 = vector.shape_cast %51 : vector<1xf32> to vector<1x1xf32>
    %53 = vector.broadcast %52 : vector<1x1xf32> to vector<1x128xf32>
    %54 = arith.subf %50, %53 : vector<1x128xf32>
    %55 = math.exp %54 : vector<1x128xf32>
    %cst_23 = arith.constant dense<0.000000e+00> : vector<1xf32>
    %56 = vector.multi_reduction <add>, %55, %cst_23 [1] : vector<1x128xf32> to vector<1xf32>
    %57 = vector.shape_cast %56 : vector<1xf32> to vector<1x1xf32>
    %58 = tpu.reciprocal %57 {approx = true} : vector<1x1xf32> -> vector<1x1xf32>
    %59 = arith.mulf %57, %58 : vector<1x1xf32>
    %cst_24 = arith.constant 2.000000e+00 : f32
    %60 = vector.broadcast %cst_24 : f32 to vector<1x1xf32>
    %61 = arith.subf %60, %59 : vector<1x1xf32>
    %62 = arith.mulf %58, %61 : vector<1x1xf32>
    %63 = vector.broadcast %62 : vector<1x1xf32> to vector<1x128xf32>
    %64 = arith.mulf %55, %63 : vector<1x128xf32>
    %65 = vector.broadcast %52 : vector<1x1xf32> to vector<1x128xf32>
    %66 = arith.subf %48, %65 : vector<1x128xf32>
    %67 = math.log %57 : vector<1x1xf32>
    %68 = vector.broadcast %67 : vector<1x1xf32> to vector<1x128xf32>
    %69 = arith.subf %66, %68 : vector<1x128xf32>
    %cst_25 = arith.constant 0.000000e+00 : f32
    %70 = vector.broadcast %cst_25 : f32 to vector<1x128xf32>
    %71 = arith.select %6, %69, %70 : vector<1x128xi1>, vector<1x128xf32>
    %72 = arith.index_cast %c0_i32 : i32 to index
    %c0_26 = arith.constant 0 : index
    %73 = vector.load %arg2[%72, %c0_26] : memref<8x128xf32, #tpu.memory_space<vmem>>, vector<1x128xf32>
    %74 = arith.addf %71, %73 : vector<1x128xf32>
    %75 = vector.broadcast %cst_9 : f32 to vector<1x128xf32>
    %76 = arith.select %6, %74, %75 : vector<1x128xi1>, vector<1x128xf32>
    %cst_27 = arith.constant dense<0xFF800000> : vector<1xf32>
    %77 = vector.multi_reduction <maximumf>, %76, %cst_27 [1] : vector<1x128xf32> to vector<1xf32>
    %78 = vector.shape_cast %77 : vector<1xf32> to vector<1x1xf32>
    %79 = vector.broadcast %78 : vector<1x1xf32> to vector<1x128xf32>
    %80 = arith.cmpf oge, %76, %79 : vector<1x128xf32>
    %c128_i32 = arith.constant 128 : i32
    %81 = vector.broadcast %c128_i32 : i32 to vector<1x128xi32>
    %82 = arith.select %80, %4, %81 : vector<1x128xi1>, vector<1x128xi32>
    %cst_28 = arith.constant dense<2147483647> : vector<1xi32>
    %83 = vector.multi_reduction <minsi>, %82, %cst_28 [1] : vector<1x128xi32> to vector<1xi32>
    %84 = vector.shape_cast %83 : vector<1xi32> to vector<1x1xi32>
    %85 = vector.broadcast %84 : vector<1x1xi32> to vector<1x128xi32>
    %86 = arith.cmpi eq, %4, %85 : vector<1x128xi32>
    %cst_29 = arith.constant 0.000000e+00 : f32
    %87 = vector.broadcast %cst_29 : f32 to vector<1x128xf32>
    %88 = arith.select %86, %71, %87 : vector<1x128xi1>, vector<1x128xf32>
    %cst_30 = arith.constant dense<0.000000e+00> : vector<1xf32>
    %89 = vector.multi_reduction <add>, %88, %cst_30 [1] : vector<1x128xf32> to vector<1xf32>
    %90 = vector.shape_cast %89 : vector<1xf32> to vector<1x1xf32>
    %c8_i32_31 = arith.constant 8 : i32
    %91 = vector.broadcast %c8_i32_31 : i32 to vector<1x128xi32>
    %92 = arith.cmpi eq, %4, %91 : vector<1x128xi32>
    %cst_32 = arith.constant 0.000000e+00 : f32
    %93 = vector.shape_cast %90 : vector<1x1xf32> to vector<1x1xf32>
    %94 = vector.broadcast %93 : vector<1x1xf32> to vector<1x128xf32>
    %95 = vector.broadcast %cst_32 : f32 to vector<1x128xf32>
    %96 = arith.select %92, %94, %95 : vector<1x128xi1>, vector<1x128xf32>
    %97 = arith.addf %64, %96 : vector<1x128xf32>
    %c9_i32 = arith.constant 9 : i32
    %98 = vector.broadcast %c9_i32 : i32 to vector<1x128xi32>
    %99 = arith.cmpi eq, %4, %98 : vector<1x128xi32>
    %100 = arith.sitofp %84 : vector<1x1xi32> to vector<1x1xf32>
    %cst_33 = arith.constant 0.000000e+00 : f32
    %101 = vector.shape_cast %100 : vector<1x1xf32> to vector<1x1xf32>
    %102 = vector.broadcast %101 : vector<1x1xf32> to vector<1x128xf32>
    %103 = vector.broadcast %cst_33 : f32 to vector<1x128xf32>
    %104 = arith.select %99, %102, %103 : vector<1x128xi1>, vector<1x128xf32>
    %105 = arith.addf %97, %104 : vector<1x128xf32>
    %106 = arith.index_cast %c0_i32 : i32 to index
    %c0_34 = arith.constant 0 : index
    %107 = vector.load %arg5[%106, %c0_34] : memref<8x128xf32, #tpu.memory_space<vmem>>, vector<1x128xf32>
    tpu.vector_store %arg5[%106, %c0_34], %105 {strides = array<i32>} : memref<8x128xf32, #tpu.memory_space<vmem>>, vector<1x128xf32>,
    %c1_i32 = arith.constant 1 : i32
    %108 = arith.index_cast %c1_i32 : i32 to index
    %c0_35 = arith.constant 0 : index
    %109 = vector.load %arg1[%108, %c0_35] : memref<8x32xf32, #tpu.memory_space<vmem>>, vector<1x32xf32>
    %110 = tpu.concatenate %109, %46 in 1 : vector<1x32xf32>, vector<1x32xf32> -> vector<1x64xf32>
    %cst_36 = arith.constant dense<0.000000e+00> : vector<1x128xf32>
    %111 = tpu.matmul %110, %0, %cst_36 {dimension_numbers = #tpu.dot_dimension_numbers<[1], [0], [0], [1], [0, 0, 1, 1], [], []>} : vector<1x64xf32>, vector<64x128xf32>, vector<1x128xf32> -> vector<1x128xf32>
    %112 = arith.addf %111, %2 : vector<1x128xf32>
    %113 = vector.extract_strided_slice %112 {offsets = [0, 0], sizes = [1, 32], strides = [1, 1]} : vector<1x128xf32> to vector<1x32xf32>
    %cst_37 = arith.constant 5.000000e-01 : f32
    %114 = vector.broadcast %cst_37 : f32 to vector<1x32xf32>
    %115 = arith.mulf %114, %113 : vector<1x32xf32>
    %116 = math.tanh %115 : vector<1x32xf32>
    %cst_38 = arith.constant 1.000000e+00 : f32
    %117 = vector.broadcast %cst_38 : f32 to vector<1x32xf32>
    %118 = arith.addf %116, %117 : vector<1x32xf32>
    %cst_39 = arith.constant 5.000000e-01 : f32
    %119 = vector.broadcast %cst_39 : f32 to vector<1x32xf32>
    %120 = arith.mulf %119, %118 : vector<1x32xf32>
    %121 = vector.extract_strided_slice %112 {offsets = [0, 32], sizes = [1, 32], strides = [1, 1]} : vector<1x128xf32> to vector<1x32xf32>
    %cst_40 = arith.constant 5.000000e-01 : f32
    %122 = vector.broadcast %cst_40 : f32 to vector<1x32xf32>
    %123 = arith.mulf %122, %121 : vector<1x32xf32>
    %124 = math.tanh %123 : vector<1x32xf32>
    %cst_41 = arith.constant 1.000000e+00 : f32
    %125 = vector.broadcast %cst_41 : f32 to vector<1x32xf32>
    %126 = arith.addf %124, %125 : vector<1x32xf32>
    %cst_42 = arith.constant 5.000000e-01 : f32
    %127 = vector.broadcast %cst_42 : f32 to vector<1x32xf32>
    %128 = arith.mulf %127, %126 : vector<1x32xf32>
    %129 = vector.extract_strided_slice %112 {offsets = [0, 64], sizes = [1, 32], strides = [1, 1]} : vector<1x128xf32> to vector<1x32xf32>
    %130 = math.tanh %129 : vector<1x32xf32>
    %131 = vector.extract_strided_slice %112 {offsets = [0, 96], sizes = [1, 32], strides = [1, 1]} : vector<1x128xf32> to vector<1x32xf32>
    %cst_43 = arith.constant 5.000000e-01 : f32
    %132 = vector.broadcast %cst_43 : f32 to vector<1x32xf32>
    %133 = arith.mulf %132, %131 : vector<1x32xf32>
    %134 = math.tanh %133 : vector<1x32xf32>
    %cst_44 = arith.constant 1.000000e+00 : f32
    %135 = vector.broadcast %cst_44 : f32 to vector<1x32xf32>
    %136 = arith.addf %134, %135 : vector<1x32xf32>
    %cst_45 = arith.constant 5.000000e-01 : f32
    %137 = vector.broadcast %cst_45 : f32 to vector<1x32xf32>
    %138 = arith.mulf %137, %136 : vector<1x32xf32>
    %139 = arith.mulf %128, %44 : vector<1x32xf32>
    %140 = arith.mulf %120, %130 : vector<1x32xf32>
    %141 = arith.addf %139, %140 : vector<1x32xf32>
    %142 = math.tanh %141 : vector<1x32xf32>
    %143 = arith.mulf %138, %142 : vector<1x32xf32>
    %cst_46 = arith.constant dense<0.000000e+00> : vector<1x128xf32>
    %144 = tpu.matmul %143, %1, %cst_46 {dimension_numbers = #tpu.dot_dimension_numbers<[1], [0], [0], [1], [0, 0, 1, 1], [], []>} : vector<1x32xf32>, vector<32x128xf32>, vector<1x128xf32> -> vector<1x128xf32>
    %145 = arith.addf %144, %3 : vector<1x128xf32>
    %146 = vector.broadcast %cst_9 : f32 to vector<1x128xf32>
    %147 = arith.select %6, %145, %146 : vector<1x128xi1>, vector<1x128xf32>
    %cst_47 = arith.constant dense<0xFF800000> : vector<1xf32>
    %148 = vector.multi_reduction <maximumf>, %147, %cst_47 [1] : vector<1x128xf32> to vector<1xf32>
    %149 = vector.shape_cast %148 : vector<1xf32> to vector<1x1xf32>
    %150 = vector.broadcast %149 : vector<1x1xf32> to vector<1x128xf32>
    %151 = arith.subf %147, %150 : vector<1x128xf32>
    %152 = math.exp %151 : vector<1x128xf32>
    %cst_48 = arith.constant dense<0.000000e+00> : vector<1xf32>
    %153 = vector.multi_reduction <add>, %152, %cst_48 [1] : vector<1x128xf32> to vector<1xf32>
    %154 = vector.shape_cast %153 : vector<1xf32> to vector<1x1xf32>
    %155 = tpu.reciprocal %154 {approx = true} : vector<1x1xf32> -> vector<1x1xf32>
    %156 = arith.mulf %154, %155 : vector<1x1xf32>
    %cst_49 = arith.constant 2.000000e+00 : f32
    %157 = vector.broadcast %cst_49 : f32 to vector<1x1xf32>
    %158 = arith.subf %157, %156 : vector<1x1xf32>
    %159 = arith.mulf %155, %158 : vector<1x1xf32>
    %160 = vector.broadcast %159 : vector<1x1xf32> to vector<1x128xf32>
    %161 = arith.mulf %152, %160 : vector<1x128xf32>
    %162 = vector.broadcast %149 : vector<1x1xf32> to vector<1x128xf32>
    %163 = arith.subf %145, %162 : vector<1x128xf32>
    %164 = math.log %154 : vector<1x1xf32>
    %165 = vector.broadcast %164 : vector<1x1xf32> to vector<1x128xf32>
    %166 = arith.subf %163, %165 : vector<1x128xf32>
    %cst_50 = arith.constant 0.000000e+00 : f32
    %167 = vector.broadcast %cst_50 : f32 to vector<1x128xf32>
    %168 = arith.select %6, %166, %167 : vector<1x128xi1>, vector<1x128xf32>
    %169 = arith.index_cast %c1_i32 : i32 to index
    %c0_51 = arith.constant 0 : index
    %170 = vector.load %arg2[%169, %c0_51] : memref<8x128xf32, #tpu.memory_space<vmem>>, vector<1x128xf32>
    %171 = arith.addf %168, %170 : vector<1x128xf32>
    %172 = vector.broadcast %cst_9 : f32 to vector<1x128xf32>
    %173 = arith.select %6, %171, %172 : vector<1x128xi1>, vector<1x128xf32>
    %cst_52 = arith.constant dense<0xFF800000> : vector<1xf32>
    %174 = vector.multi_reduction <maximumf>, %173, %cst_52 [1] : vector<1x128xf32> to vector<1xf32>
    %175 = vector.shape_cast %174 : vector<1xf32> to vector<1x1xf32>
    %176 = vector.broadcast %175 : vector<1x1xf32> to vector<1x128xf32>
    %177 = arith.cmpf oge, %173, %176 : vector<1x128xf32>
    %c128_i32_53 = arith.constant 128 : i32
    %178 = vector.broadcast %c128_i32_53 : i32 to vector<1x128xi32>
    %179 = arith.select %177, %4, %178 : vector<1x128xi1>, vector<1x128xi32>
    %cst_54 = arith.constant dense<2147483647> : vector<1xi32>
    %180 = vector.multi_reduction <minsi>, %179, %cst_54 [1] : vector<1x128xi32> to vector<1xi32>
    %181 = vector.shape_cast %180 : vector<1xi32> to vector<1x1xi32>
    %182 = vector.broadcast %181 : vector<1x1xi32> to vector<1x128xi32>
    %183 = arith.cmpi eq, %4, %182 : vector<1x128xi32>
    %cst_55 = arith.constant 0.000000e+00 : f32
    %184 = vector.broadcast %cst_55 : f32 to vector<1x128xf32>
    %185 = arith.select %183, %168, %184 : vector<1x128xi1>, vector<1x128xf32>
    %cst_56 = arith.constant dense<0.000000e+00> : vector<1xf32>
    %186 = vector.multi_reduction <add>, %185, %cst_56 [1] : vector<1x128xf32> to vector<1xf32>
    %187 = vector.shape_cast %186 : vector<1xf32> to vector<1x1xf32>
    %c8_i32_57 = arith.constant 8 : i32
    %188 = vector.broadcast %c8_i32_57 : i32 to vector<1x128xi32>
    %189 = arith.cmpi eq, %4, %188 : vector<1x128xi32>
    %cst_58 = arith.constant 0.000000e+00 : f32
    %190 = vector.shape_cast %187 : vector<1x1xf32> to vector<1x1xf32>
    %191 = vector.broadcast %190 : vector<1x1xf32> to vector<1x128xf32>
    %192 = vector.broadcast %cst_58 : f32 to vector<1x128xf32>
    %193 = arith.select %189, %191, %192 : vector<1x128xi1>, vector<1x128xf32>
    %194 = arith.addf %161, %193 : vector<1x128xf32>
    %c9_i32_59 = arith.constant 9 : i32
    %195 = vector.broadcast %c9_i32_59 : i32 to vector<1x128xi32>
    %196 = arith.cmpi eq, %4, %195 : vector<1x128xi32>
    %197 = arith.sitofp %181 : vector<1x1xi32> to vector<1x1xf32>
    %cst_60 = arith.constant 0.000000e+00 : f32
    %198 = vector.shape_cast %197 : vector<1x1xf32> to vector<1x1xf32>
    %199 = vector.broadcast %198 : vector<1x1xf32> to vector<1x128xf32>
    %200 = vector.broadcast %cst_60 : f32 to vector<1x128xf32>
    %201 = arith.select %196, %199, %200 : vector<1x128xi1>, vector<1x128xf32>
    %202 = arith.addf %194, %201 : vector<1x128xf32>
    %203 = arith.index_cast %c1_i32 : i32 to index
    %c0_61 = arith.constant 0 : index
    %204 = vector.load %arg5[%203, %c0_61] : memref<8x128xf32, #tpu.memory_space<vmem>>, vector<1x128xf32>
    tpu.vector_store %arg5[%203, %c0_61], %202 {strides = array<i32>} : memref<8x128xf32, #tpu.memory_space<vmem>>, vector<1x128xf32>,
    %c2_i32 = arith.constant 2 : i32
    %205 = arith.index_cast %c2_i32 : i32 to index
    %c0_62 = arith.constant 0 : index
    %206 = vector.load %arg1[%205, %c0_62] : memref<8x32xf32, #tpu.memory_space<vmem>>, vector<1x32xf32>
    %207 = tpu.concatenate %206, %143 in 1 : vector<1x32xf32>, vector<1x32xf32> -> vector<1x64xf32>
    %cst_63 = arith.constant dense<0.000000e+00> : vector<1x128xf32>
    %208 = tpu.matmul %207, %0, %cst_63 {dimension_numbers = #tpu.dot_dimension_numbers<[1], [0], [0], [1], [0, 0, 1, 1], [], []>} : vector<1x64xf32>, vector<64x128xf32>, vector<1x128xf32> -> vector<1x128xf32>
    %209 = arith.addf %208, %2 : vector<1x128xf32>
    %210 = vector.extract_strided_slice %209 {offsets = [0, 0], sizes = [1, 32], strides = [1, 1]} : vector<1x128xf32> to vector<1x32xf32>
    %cst_64 = arith.constant 5.000000e-01 : f32
    %211 = vector.broadcast %cst_64 : f32 to vector<1x32xf32>
    %212 = arith.mulf %211, %210 : vector<1x32xf32>
    %213 = math.tanh %212 : vector<1x32xf32>
    %cst_65 = arith.constant 1.000000e+00 : f32
    %214 = vector.broadcast %cst_65 : f32 to vector<1x32xf32>
    %215 = arith.addf %213, %214 : vector<1x32xf32>
    %cst_66 = arith.constant 5.000000e-01 : f32
    %216 = vector.broadcast %cst_66 : f32 to vector<1x32xf32>
    %217 = arith.mulf %216, %215 : vector<1x32xf32>
    %218 = vector.extract_strided_slice %209 {offsets = [0, 32], sizes = [1, 32], strides = [1, 1]} : vector<1x128xf32> to vector<1x32xf32>
    %cst_67 = arith.constant 5.000000e-01 : f32
    %219 = vector.broadcast %cst_67 : f32 to vector<1x32xf32>
    %220 = arith.mulf %219, %218 : vector<1x32xf32>
    %221 = math.tanh %220 : vector<1x32xf32>
    %cst_68 = arith.constant 1.000000e+00 : f32
    %222 = vector.broadcast %cst_68 : f32 to vector<1x32xf32>
    %223 = arith.addf %221, %222 : vector<1x32xf32>
    %cst_69 = arith.constant 5.000000e-01 : f32
    %224 = vector.broadcast %cst_69 : f32 to vector<1x32xf32>
    %225 = arith.mulf %224, %223 : vector<1x32xf32>
    %226 = vector.extract_strided_slice %209 {offsets = [0, 64], sizes = [1, 32], strides = [1, 1]} : vector<1x128xf32> to vector<1x32xf32>
    %227 = math.tanh %226 : vector<1x32xf32>
    %228 = vector.extract_strided_slice %209 {offsets = [0, 96], sizes = [1, 32], strides = [1, 1]} : vector<1x128xf32> to vector<1x32xf32>
    %cst_70 = arith.constant 5.000000e-01 : f32
    %229 = vector.broadcast %cst_70 : f32 to vector<1x32xf32>
    %230 = arith.mulf %229, %228 : vector<1x32xf32>
    %231 = math.tanh %230 : vector<1x32xf32>
    %cst_71 = arith.constant 1.000000e+00 : f32
    %232 = vector.broadcast %cst_71 : f32 to vector<1x32xf32>
    %233 = arith.addf %231, %232 : vector<1x32xf32>
    %cst_72 = arith.constant 5.000000e-01 : f32
    %234 = vector.broadcast %cst_72 : f32 to vector<1x32xf32>
    %235 = arith.mulf %234, %233 : vector<1x32xf32>
    %236 = arith.mulf %225, %141 : vector<1x32xf32>
    %237 = arith.mulf %217, %227 : vector<1x32xf32>
    %238 = arith.addf %236, %237 : vector<1x32xf32>
    %239 = math.tanh %238 : vector<1x32xf32>
    %240 = arith.mulf %235, %239 : vector<1x32xf32>
    %cst_73 = arith.constant dense<0.000000e+00> : vector<1x128xf32>
    %241 = tpu.matmul %240, %1, %cst_73 {dimension_numbers = #tpu.dot_dimension_numbers<[1], [0], [0], [1], [0, 0, 1, 1], [], []>} : vector<1x32xf32>, vector<32x128xf32>, vector<1x128xf32> -> vector<1x128xf32>
    %242 = arith.addf %241, %3 : vector<1x128xf32>
    %243 = vector.broadcast %cst_9 : f32 to vector<1x128xf32>
    %244 = arith.select %6, %242, %243 : vector<1x128xi1>, vector<1x128xf32>
    %cst_74 = arith.constant dense<0xFF800000> : vector<1xf32>
    %245 = vector.multi_reduction <maximumf>, %244, %cst_74 [1] : vector<1x128xf32> to vector<1xf32>
    %246 = vector.shape_cast %245 : vector<1xf32> to vector<1x1xf32>
    %247 = vector.broadcast %246 : vector<1x1xf32> to vector<1x128xf32>
    %248 = arith.subf %244, %247 : vector<1x128xf32>
    %249 = math.exp %248 : vector<1x128xf32>
    %cst_75 = arith.constant dense<0.000000e+00> : vector<1xf32>
    %250 = vector.multi_reduction <add>, %249, %cst_75 [1] : vector<1x128xf32> to vector<1xf32>
    %251 = vector.shape_cast %250 : vector<1xf32> to vector<1x1xf32>
    %252 = tpu.reciprocal %251 {approx = true} : vector<1x1xf32> -> vector<1x1xf32>
    %253 = arith.mulf %251, %252 : vector<1x1xf32>
    %cst_76 = arith.constant 2.000000e+00 : f32
    %254 = vector.broadcast %cst_76 : f32 to vector<1x1xf32>
    %255 = arith.subf %254, %253 : vector<1x1xf32>
    %256 = arith.mulf %252, %255 : vector<1x1xf32>
    %257 = vector.broadcast %256 : vector<1x1xf32> to vector<1x128xf32>
    %258 = arith.mulf %249, %257 : vector<1x128xf32>
    %259 = vector.broadcast %246 : vector<1x1xf32> to vector<1x128xf32>
    %260 = arith.subf %242, %259 : vector<1x128xf32>
    %261 = math.log %251 : vector<1x1xf32>
    %262 = vector.broadcast %261 : vector<1x1xf32> to vector<1x128xf32>
    %263 = arith.subf %260, %262 : vector<1x128xf32>
    %cst_77 = arith.constant 0.000000e+00 : f32
    %264 = vector.broadcast %cst_77 : f32 to vector<1x128xf32>
    %265 = arith.select %6, %263, %264 : vector<1x128xi1>, vector<1x128xf32>
    %266 = arith.index_cast %c2_i32 : i32 to index
    %c0_78 = arith.constant 0 : index
    %267 = vector.load %arg2[%266, %c0_78] : memref<8x128xf32, #tpu.memory_space<vmem>>, vector<1x128xf32>
    %268 = arith.addf %265, %267 : vector<1x128xf32>
    %269 = vector.broadcast %cst_9 : f32 to vector<1x128xf32>
    %270 = arith.select %6, %268, %269 : vector<1x128xi1>, vector<1x128xf32>
    %cst_79 = arith.constant dense<0xFF800000> : vector<1xf32>
    %271 = vector.multi_reduction <maximumf>, %270, %cst_79 [1] : vector<1x128xf32> to vector<1xf32>
    %272 = vector.shape_cast %271 : vector<1xf32> to vector<1x1xf32>
    %273 = vector.broadcast %272 : vector<1x1xf32> to vector<1x128xf32>
    %274 = arith.cmpf oge, %270, %273 : vector<1x128xf32>
    %c128_i32_80 = arith.constant 128 : i32
    %275 = vector.broadcast %c128_i32_80 : i32 to vector<1x128xi32>
    %276 = arith.select %274, %4, %275 : vector<1x128xi1>, vector<1x128xi32>
    %cst_81 = arith.constant dense<2147483647> : vector<1xi32>
    %277 = vector.multi_reduction <minsi>, %276, %cst_81 [1] : vector<1x128xi32> to vector<1xi32>
    %278 = vector.shape_cast %277 : vector<1xi32> to vector<1x1xi32>
    %279 = vector.broadcast %278 : vector<1x1xi32> to vector<1x128xi32>
    %280 = arith.cmpi eq, %4, %279 : vector<1x128xi32>
    %cst_82 = arith.constant 0.000000e+00 : f32
    %281 = vector.broadcast %cst_82 : f32 to vector<1x128xf32>
    %282 = arith.select %280, %265, %281 : vector<1x128xi1>, vector<1x128xf32>
    %cst_83 = arith.constant dense<0.000000e+00> : vector<1xf32>
    %283 = vector.multi_reduction <add>, %282, %cst_83 [1] : vector<1x128xf32> to vector<1xf32>
    %284 = vector.shape_cast %283 : vector<1xf32> to vector<1x1xf32>
    %c8_i32_84 = arith.constant 8 : i32
    %285 = vector.broadcast %c8_i32_84 : i32 to vector<1x128xi32>
    %286 = arith.cmpi eq, %4, %285 : vector<1x128xi32>
    %cst_85 = arith.constant 0.000000e+00 : f32
    %287 = vector.shape_cast %284 : vector<1x1xf32> to vector<1x1xf32>
    %288 = vector.broadcast %287 : vector<1x1xf32> to vector<1x128xf32>
    %289 = vector.broadcast %cst_85 : f32 to vector<1x128xf32>
    %290 = arith.select %286, %288, %289 : vector<1x128xi1>, vector<1x128xf32>
    %291 = arith.addf %258, %290 : vector<1x128xf32>
    %c9_i32_86 = arith.constant 9 : i32
    %292 = vector.broadcast %c9_i32_86 : i32 to vector<1x128xi32>
    %293 = arith.cmpi eq, %4, %292 : vector<1x128xi32>
    %294 = arith.sitofp %278 : vector<1x1xi32> to vector<1x1xf32>
    %cst_87 = arith.constant 0.000000e+00 : f32
    %295 = vector.shape_cast %294 : vector<1x1xf32> to vector<1x1xf32>
    %296 = vector.broadcast %295 : vector<1x1xf32> to vector<1x128xf32>
    %297 = vector.broadcast %cst_87 : f32 to vector<1x128xf32>
    %298 = arith.select %293, %296, %297 : vector<1x128xi1>, vector<1x128xf32>
    %299 = arith.addf %291, %298 : vector<1x128xf32>
    %300 = arith.index_cast %c2_i32 : i32 to index
    %c0_88 = arith.constant 0 : index
    %301 = vector.load %arg5[%300, %c0_88] : memref<8x128xf32, #tpu.memory_space<vmem>>, vector<1x128xf32>
    tpu.vector_store %arg5[%300, %c0_88], %299 {strides = array<i32>} : memref<8x128xf32, #tpu.memory_space<vmem>>, vector<1x128xf32>,
    %c3_i32 = arith.constant 3 : i32
    %302 = arith.index_cast %c3_i32 : i32 to index
    %c0_89 = arith.constant 0 : index
    %303 = vector.load %arg1[%302, %c0_89] : memref<8x32xf32, #tpu.memory_space<vmem>>, vector<1x32xf32>
    %304 = tpu.concatenate %303, %240 in 1 : vector<1x32xf32>, vector<1x32xf32> -> vector<1x64xf32>
    %cst_90 = arith.constant dense<0.000000e+00> : vector<1x128xf32>
    %305 = tpu.matmul %304, %0, %cst_90 {dimension_numbers = #tpu.dot_dimension_numbers<[1], [0], [0], [1], [0, 0, 1, 1], [], []>} : vector<1x64xf32>, vector<64x128xf32>, vector<1x128xf32> -> vector<1x128xf32>
    %306 = arith.addf %305, %2 : vector<1x128xf32>
    %307 = vector.extract_strided_slice %306 {offsets = [0, 0], sizes = [1, 32], strides = [1, 1]} : vector<1x128xf32> to vector<1x32xf32>
    %cst_91 = arith.constant 5.000000e-01 : f32
    %308 = vector.broadcast %cst_91 : f32 to vector<1x32xf32>
    %309 = arith.mulf %308, %307 : vector<1x32xf32>
    %310 = math.tanh %309 : vector<1x32xf32>
    %cst_92 = arith.constant 1.000000e+00 : f32
    %311 = vector.broadcast %cst_92 : f32 to vector<1x32xf32>
    %312 = arith.addf %310, %311 : vector<1x32xf32>
    %cst_93 = arith.constant 5.000000e-01 : f32
    %313 = vector.broadcast %cst_93 : f32 to vector<1x32xf32>
    %314 = arith.mulf %313, %312 : vector<1x32xf32>
    %315 = vector.extract_strided_slice %306 {offsets = [0, 32], sizes = [1, 32], strides = [1, 1]} : vector<1x128xf32> to vector<1x32xf32>
    %cst_94 = arith.constant 5.000000e-01 : f32
    %316 = vector.broadcast %cst_94 : f32 to vector<1x32xf32>
    %317 = arith.mulf %316, %315 : vector<1x32xf32>
    %318 = math.tanh %317 : vector<1x32xf32>
    %cst_95 = arith.constant 1.000000e+00 : f32
    %319 = vector.broadcast %cst_95 : f32 to vector<1x32xf32>
    %320 = arith.addf %318, %319 : vector<1x32xf32>
    %cst_96 = arith.constant 5.000000e-01 : f32
    %321 = vector.broadcast %cst_96 : f32 to vector<1x32xf32>
    %322 = arith.mulf %321, %320 : vector<1x32xf32>
    %323 = vector.extract_strided_slice %306 {offsets = [0, 64], sizes = [1, 32], strides = [1, 1]} : vector<1x128xf32> to vector<1x32xf32>
    %324 = math.tanh %323 : vector<1x32xf32>
    %325 = vector.extract_strided_slice %306 {offsets = [0, 96], sizes = [1, 32], strides = [1, 1]} : vector<1x128xf32> to vector<1x32xf32>
    %cst_97 = arith.constant 5.000000e-01 : f32
    %326 = vector.broadcast %cst_97 : f32 to vector<1x32xf32>
    %327 = arith.mulf %326, %325 : vector<1x32xf32>
    %328 = math.tanh %327 : vector<1x32xf32>
    %cst_98 = arith.constant 1.000000e+00 : f32
    %329 = vector.broadcast %cst_98 : f32 to vector<1x32xf32>
    %330 = arith.addf %328, %329 : vector<1x32xf32>
    %cst_99 = arith.constant 5.000000e-01 : f32
    %331 = vector.broadcast %cst_99 : f32 to vector<1x32xf32>
    %332 = arith.mulf %331, %330 : vector<1x32xf32>
    %333 = arith.mulf %322, %238 : vector<1x32xf32>
    %334 = arith.mulf %314, %324 : vector<1x32xf32>
    %335 = arith.addf %333, %334 : vector<1x32xf32>
    %336 = math.tanh %335 : vector<1x32xf32>
    %337 = arith.mulf %332, %336 : vector<1x32xf32>
    %cst_100 = arith.constant dense<0.000000e+00> : vector<1x128xf32>
    %338 = tpu.matmul %337, %1, %cst_100 {dimension_numbers = #tpu.dot_dimension_numbers<[1], [0], [0], [1], [0, 0, 1, 1], [], []>} : vector<1x32xf32>, vector<32x128xf32>, vector<1x128xf32> -> vector<1x128xf32>
    %339 = arith.addf %338, %3 : vector<1x128xf32>
    %340 = vector.broadcast %cst_9 : f32 to vector<1x128xf32>
    %341 = arith.select %6, %339, %340 : vector<1x128xi1>, vector<1x128xf32>
    %cst_101 = arith.constant dense<0xFF800000> : vector<1xf32>
    %342 = vector.multi_reduction <maximumf>, %341, %cst_101 [1] : vector<1x128xf32> to vector<1xf32>
    %343 = vector.shape_cast %342 : vector<1xf32> to vector<1x1xf32>
    %344 = vector.broadcast %343 : vector<1x1xf32> to vector<1x128xf32>
    %345 = arith.subf %341, %344 : vector<1x128xf32>
    %346 = math.exp %345 : vector<1x128xf32>
    %cst_102 = arith.constant dense<0.000000e+00> : vector<1xf32>
    %347 = vector.multi_reduction <add>, %346, %cst_102 [1] : vector<1x128xf32> to vector<1xf32>
    %348 = vector.shape_cast %347 : vector<1xf32> to vector<1x1xf32>
    %349 = tpu.reciprocal %348 {approx = true} : vector<1x1xf32> -> vector<1x1xf32>
    %350 = arith.mulf %348, %349 : vector<1x1xf32>
    %cst_103 = arith.constant 2.000000e+00 : f32
    %351 = vector.broadcast %cst_103 : f32 to vector<1x1xf32>
    %352 = arith.subf %351, %350 : vector<1x1xf32>
    %353 = arith.mulf %349, %352 : vector<1x1xf32>
    %354 = vector.broadcast %353 : vector<1x1xf32> to vector<1x128xf32>
    %355 = arith.mulf %346, %354 : vector<1x128xf32>
    %356 = vector.broadcast %343 : vector<1x1xf32> to vector<1x128xf32>
    %357 = arith.subf %339, %356 : vector<1x128xf32>
    %358 = math.log %348 : vector<1x1xf32>
    %359 = vector.broadcast %358 : vector<1x1xf32> to vector<1x128xf32>
    %360 = arith.subf %357, %359 : vector<1x128xf32>
    %cst_104 = arith.constant 0.000000e+00 : f32
    %361 = vector.broadcast %cst_104 : f32 to vector<1x128xf32>
    %362 = arith.select %6, %360, %361 : vector<1x128xi1>, vector<1x128xf32>
    %363 = arith.index_cast %c3_i32 : i32 to index
    %c0_105 = arith.constant 0 : index
    %364 = vector.load %arg2[%363, %c0_105] : memref<8x128xf32, #tpu.memory_space<vmem>>, vector<1x128xf32>
    %365 = arith.addf %362, %364 : vector<1x128xf32>
    %366 = vector.broadcast %cst_9 : f32 to vector<1x128xf32>
    %367 = arith.select %6, %365, %366 : vector<1x128xi1>, vector<1x128xf32>
    %cst_106 = arith.constant dense<0xFF800000> : vector<1xf32>
    %368 = vector.multi_reduction <maximumf>, %367, %cst_106 [1] : vector<1x128xf32> to vector<1xf32>
    %369 = vector.shape_cast %368 : vector<1xf32> to vector<1x1xf32>
    %370 = vector.broadcast %369 : vector<1x1xf32> to vector<1x128xf32>
    %371 = arith.cmpf oge, %367, %370 : vector<1x128xf32>
    %c128_i32_107 = arith.constant 128 : i32
    %372 = vector.broadcast %c128_i32_107 : i32 to vector<1x128xi32>
    %373 = arith.select %371, %4, %372 : vector<1x128xi1>, vector<1x128xi32>
    %cst_108 = arith.constant dense<2147483647> : vector<1xi32>
    %374 = vector.multi_reduction <minsi>, %373, %cst_108 [1] : vector<1x128xi32> to vector<1xi32>
    %375 = vector.shape_cast %374 : vector<1xi32> to vector<1x1xi32>
    %376 = vector.broadcast %375 : vector<1x1xi32> to vector<1x128xi32>
    %377 = arith.cmpi eq, %4, %376 : vector<1x128xi32>
    %cst_109 = arith.constant 0.000000e+00 : f32
    %378 = vector.broadcast %cst_109 : f32 to vector<1x128xf32>
    %379 = arith.select %377, %362, %378 : vector<1x128xi1>, vector<1x128xf32>
    %cst_110 = arith.constant dense<0.000000e+00> : vector<1xf32>
    %380 = vector.multi_reduction <add>, %379, %cst_110 [1] : vector<1x128xf32> to vector<1xf32>
    %381 = vector.shape_cast %380 : vector<1xf32> to vector<1x1xf32>
    %c8_i32_111 = arith.constant 8 : i32
    %382 = vector.broadcast %c8_i32_111 : i32 to vector<1x128xi32>
    %383 = arith.cmpi eq, %4, %382 : vector<1x128xi32>
    %cst_112 = arith.constant 0.000000e+00 : f32
    %384 = vector.shape_cast %381 : vector<1x1xf32> to vector<1x1xf32>
    %385 = vector.broadcast %384 : vector<1x1xf32> to vector<1x128xf32>
    %386 = vector.broadcast %cst_112 : f32 to vector<1x128xf32>
    %387 = arith.select %383, %385, %386 : vector<1x128xi1>, vector<1x128xf32>
    %388 = arith.addf %355, %387 : vector<1x128xf32>
    %c9_i32_113 = arith.constant 9 : i32
    %389 = vector.broadcast %c9_i32_113 : i32 to vector<1x128xi32>
    %390 = arith.cmpi eq, %4, %389 : vector<1x128xi32>
    %391 = arith.sitofp %375 : vector<1x1xi32> to vector<1x1xf32>
    %cst_114 = arith.constant 0.000000e+00 : f32
    %392 = vector.shape_cast %391 : vector<1x1xf32> to vector<1x1xf32>
    %393 = vector.broadcast %392 : vector<1x1xf32> to vector<1x128xf32>
    %394 = vector.broadcast %cst_114 : f32 to vector<1x128xf32>
    %395 = arith.select %390, %393, %394 : vector<1x128xi1>, vector<1x128xf32>
    %396 = arith.addf %388, %395 : vector<1x128xf32>
    %397 = arith.index_cast %c3_i32 : i32 to index
    %c0_115 = arith.constant 0 : index
    %398 = vector.load %arg5[%397, %c0_115] : memref<8x128xf32, #tpu.memory_space<vmem>>, vector<1x128xf32>
    tpu.vector_store %arg5[%397, %c0_115], %396 {strides = array<i32>} : memref<8x128xf32, #tpu.memory_space<vmem>>, vector<1x128xf32>,
    %c4_i32 = arith.constant 4 : i32
    %399 = arith.index_cast %c4_i32 : i32 to index
    %c0_116 = arith.constant 0 : index
    %400 = vector.load %arg1[%399, %c0_116] : memref<8x32xf32, #tpu.memory_space<vmem>>, vector<1x32xf32>
    %401 = tpu.concatenate %400, %337 in 1 : vector<1x32xf32>, vector<1x32xf32> -> vector<1x64xf32>
    %cst_117 = arith.constant dense<0.000000e+00> : vector<1x128xf32>
    %402 = tpu.matmul %401, %0, %cst_117 {dimension_numbers = #tpu.dot_dimension_numbers<[1], [0], [0], [1], [0, 0, 1, 1], [], []>} : vector<1x64xf32>, vector<64x128xf32>, vector<1x128xf32> -> vector<1x128xf32>
    %403 = arith.addf %402, %2 : vector<1x128xf32>
    %404 = vector.extract_strided_slice %403 {offsets = [0, 0], sizes = [1, 32], strides = [1, 1]} : vector<1x128xf32> to vector<1x32xf32>
    %cst_118 = arith.constant 5.000000e-01 : f32
    %405 = vector.broadcast %cst_118 : f32 to vector<1x32xf32>
    %406 = arith.mulf %405, %404 : vector<1x32xf32>
    %407 = math.tanh %406 : vector<1x32xf32>
    %cst_119 = arith.constant 1.000000e+00 : f32
    %408 = vector.broadcast %cst_119 : f32 to vector<1x32xf32>
    %409 = arith.addf %407, %408 : vector<1x32xf32>
    %cst_120 = arith.constant 5.000000e-01 : f32
    %410 = vector.broadcast %cst_120 : f32 to vector<1x32xf32>
    %411 = arith.mulf %410, %409 : vector<1x32xf32>
    %412 = vector.extract_strided_slice %403 {offsets = [0, 32], sizes = [1, 32], strides = [1, 1]} : vector<1x128xf32> to vector<1x32xf32>
    %cst_121 = arith.constant 5.000000e-01 : f32
    %413 = vector.broadcast %cst_121 : f32 to vector<1x32xf32>
    %414 = arith.mulf %413, %412 : vector<1x32xf32>
    %415 = math.tanh %414 : vector<1x32xf32>
    %cst_122 = arith.constant 1.000000e+00 : f32
    %416 = vector.broadcast %cst_122 : f32 to vector<1x32xf32>
    %417 = arith.addf %415, %416 : vector<1x32xf32>
    %cst_123 = arith.constant 5.000000e-01 : f32
    %418 = vector.broadcast %cst_123 : f32 to vector<1x32xf32>
    %419 = arith.mulf %418, %417 : vector<1x32xf32>
    %420 = vector.extract_strided_slice %403 {offsets = [0, 64], sizes = [1, 32], strides = [1, 1]} : vector<1x128xf32> to vector<1x32xf32>
    %421 = math.tanh %420 : vector<1x32xf32>
    %422 = vector.extract_strided_slice %403 {offsets = [0, 96], sizes = [1, 32], strides = [1, 1]} : vector<1x128xf32> to vector<1x32xf32>
    %cst_124 = arith.constant 5.000000e-01 : f32
    %423 = vector.broadcast %cst_124 : f32 to vector<1x32xf32>
    %424 = arith.mulf %423, %422 : vector<1x32xf32>
    %425 = math.tanh %424 : vector<1x32xf32>
    %cst_125 = arith.constant 1.000000e+00 : f32
    %426 = vector.broadcast %cst_125 : f32 to vector<1x32xf32>
    %427 = arith.addf %425, %426 : vector<1x32xf32>
    %cst_126 = arith.constant 5.000000e-01 : f32
    %428 = vector.broadcast %cst_126 : f32 to vector<1x32xf32>
    %429 = arith.mulf %428, %427 : vector<1x32xf32>
    %430 = arith.mulf %419, %335 : vector<1x32xf32>
    %431 = arith.mulf %411, %421 : vector<1x32xf32>
    %432 = arith.addf %430, %431 : vector<1x32xf32>
    %433 = math.tanh %432 : vector<1x32xf32>
    %434 = arith.mulf %429, %433 : vector<1x32xf32>
    %cst_127 = arith.constant dense<0.000000e+00> : vector<1x128xf32>
    %435 = tpu.matmul %434, %1, %cst_127 {dimension_numbers = #tpu.dot_dimension_numbers<[1], [0], [0], [1], [0, 0, 1, 1], [], []>} : vector<1x32xf32>, vector<32x128xf32>, vector<1x128xf32> -> vector<1x128xf32>
    %436 = arith.addf %435, %3 : vector<1x128xf32>
    %437 = vector.broadcast %cst_9 : f32 to vector<1x128xf32>
    %438 = arith.select %6, %436, %437 : vector<1x128xi1>, vector<1x128xf32>
    %cst_128 = arith.constant dense<0xFF800000> : vector<1xf32>
    %439 = vector.multi_reduction <maximumf>, %438, %cst_128 [1] : vector<1x128xf32> to vector<1xf32>
    %440 = vector.shape_cast %439 : vector<1xf32> to vector<1x1xf32>
    %441 = vector.broadcast %440 : vector<1x1xf32> to vector<1x128xf32>
    %442 = arith.subf %438, %441 : vector<1x128xf32>
    %443 = math.exp %442 : vector<1x128xf32>
    %cst_129 = arith.constant dense<0.000000e+00> : vector<1xf32>
    %444 = vector.multi_reduction <add>, %443, %cst_129 [1] : vector<1x128xf32> to vector<1xf32>
    %445 = vector.shape_cast %444 : vector<1xf32> to vector<1x1xf32>
    %446 = tpu.reciprocal %445 {approx = true} : vector<1x1xf32> -> vector<1x1xf32>
    %447 = arith.mulf %445, %446 : vector<1x1xf32>
    %cst_130 = arith.constant 2.000000e+00 : f32
    %448 = vector.broadcast %cst_130 : f32 to vector<1x1xf32>
    %449 = arith.subf %448, %447 : vector<1x1xf32>
    %450 = arith.mulf %446, %449 : vector<1x1xf32>
    %451 = vector.broadcast %450 : vector<1x1xf32> to vector<1x128xf32>
    %452 = arith.mulf %443, %451 : vector<1x128xf32>
    %453 = vector.broadcast %440 : vector<1x1xf32> to vector<1x128xf32>
    %454 = arith.subf %436, %453 : vector<1x128xf32>
    %455 = math.log %445 : vector<1x1xf32>
    %456 = vector.broadcast %455 : vector<1x1xf32> to vector<1x128xf32>
    %457 = arith.subf %454, %456 : vector<1x128xf32>
    %cst_131 = arith.constant 0.000000e+00 : f32
    %458 = vector.broadcast %cst_131 : f32 to vector<1x128xf32>
    %459 = arith.select %6, %457, %458 : vector<1x128xi1>, vector<1x128xf32>
    %460 = arith.index_cast %c4_i32 : i32 to index
    %c0_132 = arith.constant 0 : index
    %461 = vector.load %arg2[%460, %c0_132] : memref<8x128xf32, #tpu.memory_space<vmem>>, vector<1x128xf32>
    %462 = arith.addf %459, %461 : vector<1x128xf32>
    %463 = vector.broadcast %cst_9 : f32 to vector<1x128xf32>
    %464 = arith.select %6, %462, %463 : vector<1x128xi1>, vector<1x128xf32>
    %cst_133 = arith.constant dense<0xFF800000> : vector<1xf32>
    %465 = vector.multi_reduction <maximumf>, %464, %cst_133 [1] : vector<1x128xf32> to vector<1xf32>
    %466 = vector.shape_cast %465 : vector<1xf32> to vector<1x1xf32>
    %467 = vector.broadcast %466 : vector<1x1xf32> to vector<1x128xf32>
    %468 = arith.cmpf oge, %464, %467 : vector<1x128xf32>
    %c128_i32_134 = arith.constant 128 : i32
    %469 = vector.broadcast %c128_i32_134 : i32 to vector<1x128xi32>
    %470 = arith.select %468, %4, %469 : vector<1x128xi1>, vector<1x128xi32>
    %cst_135 = arith.constant dense<2147483647> : vector<1xi32>
    %471 = vector.multi_reduction <minsi>, %470, %cst_135 [1] : vector<1x128xi32> to vector<1xi32>
    %472 = vector.shape_cast %471 : vector<1xi32> to vector<1x1xi32>
    %473 = vector.broadcast %472 : vector<1x1xi32> to vector<1x128xi32>
    %474 = arith.cmpi eq, %4, %473 : vector<1x128xi32>
    %cst_136 = arith.constant 0.000000e+00 : f32
    %475 = vector.broadcast %cst_136 : f32 to vector<1x128xf32>
    %476 = arith.select %474, %459, %475 : vector<1x128xi1>, vector<1x128xf32>
    %cst_137 = arith.constant dense<0.000000e+00> : vector<1xf32>
    %477 = vector.multi_reduction <add>, %476, %cst_137 [1] : vector<1x128xf32> to vector<1xf32>
    %478 = vector.shape_cast %477 : vector<1xf32> to vector<1x1xf32>
    %c8_i32_138 = arith.constant 8 : i32
    %479 = vector.broadcast %c8_i32_138 : i32 to vector<1x128xi32>
    %480 = arith.cmpi eq, %4, %479 : vector<1x128xi32>
    %cst_139 = arith.constant 0.000000e+00 : f32
    %481 = vector.shape_cast %478 : vector<1x1xf32> to vector<1x1xf32>
    %482 = vector.broadcast %481 : vector<1x1xf32> to vector<1x128xf32>
    %483 = vector.broadcast %cst_139 : f32 to vector<1x128xf32>
    %484 = arith.select %480, %482, %483 : vector<1x128xi1>, vector<1x128xf32>
    %485 = arith.addf %452, %484 : vector<1x128xf32>
    %c9_i32_140 = arith.constant 9 : i32
    %486 = vector.broadcast %c9_i32_140 : i32 to vector<1x128xi32>
    %487 = arith.cmpi eq, %4, %486 : vector<1x128xi32>
    %488 = arith.sitofp %472 : vector<1x1xi32> to vector<1x1xf32>
    %cst_141 = arith.constant 0.000000e+00 : f32
    %489 = vector.shape_cast %488 : vector<1x1xf32> to vector<1x1xf32>
    %490 = vector.broadcast %489 : vector<1x1xf32> to vector<1x128xf32>
    %491 = vector.broadcast %cst_141 : f32 to vector<1x128xf32>
    %492 = arith.select %487, %490, %491 : vector<1x128xi1>, vector<1x128xf32>
    %493 = arith.addf %485, %492 : vector<1x128xf32>
    %494 = arith.index_cast %c4_i32 : i32 to index
    %c0_142 = arith.constant 0 : index
    %495 = vector.load %arg5[%494, %c0_142] : memref<8x128xf32, #tpu.memory_space<vmem>>, vector<1x128xf32>
    tpu.vector_store %arg5[%494, %c0_142], %493 {strides = array<i32>} : memref<8x128xf32, #tpu.memory_space<vmem>>, vector<1x128xf32>,
    %c5_i32 = arith.constant 5 : i32
    %496 = arith.index_cast %c5_i32 : i32 to index
    %c0_143 = arith.constant 0 : index
    %497 = vector.load %arg1[%496, %c0_143] : memref<8x32xf32, #tpu.memory_space<vmem>>, vector<1x32xf32>
    %498 = tpu.concatenate %497, %434 in 1 : vector<1x32xf32>, vector<1x32xf32> -> vector<1x64xf32>
    %cst_144 = arith.constant dense<0.000000e+00> : vector<1x128xf32>
    %499 = tpu.matmul %498, %0, %cst_144 {dimension_numbers = #tpu.dot_dimension_numbers<[1], [0], [0], [1], [0, 0, 1, 1], [], []>} : vector<1x64xf32>, vector<64x128xf32>, vector<1x128xf32> -> vector<1x128xf32>
    %500 = arith.addf %499, %2 : vector<1x128xf32>
    %501 = vector.extract_strided_slice %500 {offsets = [0, 0], sizes = [1, 32], strides = [1, 1]} : vector<1x128xf32> to vector<1x32xf32>
    %cst_145 = arith.constant 5.000000e-01 : f32
    %502 = vector.broadcast %cst_145 : f32 to vector<1x32xf32>
    %503 = arith.mulf %502, %501 : vector<1x32xf32>
    %504 = math.tanh %503 : vector<1x32xf32>
    %cst_146 = arith.constant 1.000000e+00 : f32
    %505 = vector.broadcast %cst_146 : f32 to vector<1x32xf32>
    %506 = arith.addf %504, %505 : vector<1x32xf32>
    %cst_147 = arith.constant 5.000000e-01 : f32
    %507 = vector.broadcast %cst_147 : f32 to vector<1x32xf32>
    %508 = arith.mulf %507, %506 : vector<1x32xf32>
    %509 = vector.extract_strided_slice %500 {offsets = [0, 32], sizes = [1, 32], strides = [1, 1]} : vector<1x128xf32> to vector<1x32xf32>
    %cst_148 = arith.constant 5.000000e-01 : f32
    %510 = vector.broadcast %cst_148 : f32 to vector<1x32xf32>
    %511 = arith.mulf %510, %509 : vector<1x32xf32>
    %512 = math.tanh %511 : vector<1x32xf32>
    %cst_149 = arith.constant 1.000000e+00 : f32
    %513 = vector.broadcast %cst_149 : f32 to vector<1x32xf32>
    %514 = arith.addf %512, %513 : vector<1x32xf32>
    %cst_150 = arith.constant 5.000000e-01 : f32
    %515 = vector.broadcast %cst_150 : f32 to vector<1x32xf32>
    %516 = arith.mulf %515, %514 : vector<1x32xf32>
    %517 = vector.extract_strided_slice %500 {offsets = [0, 64], sizes = [1, 32], strides = [1, 1]} : vector<1x128xf32> to vector<1x32xf32>
    %518 = math.tanh %517 : vector<1x32xf32>
    %519 = vector.extract_strided_slice %500 {offsets = [0, 96], sizes = [1, 32], strides = [1, 1]} : vector<1x128xf32> to vector<1x32xf32>
    %cst_151 = arith.constant 5.000000e-01 : f32
    %520 = vector.broadcast %cst_151 : f32 to vector<1x32xf32>
    %521 = arith.mulf %520, %519 : vector<1x32xf32>
    %522 = math.tanh %521 : vector<1x32xf32>
    %cst_152 = arith.constant 1.000000e+00 : f32
    %523 = vector.broadcast %cst_152 : f32 to vector<1x32xf32>
    %524 = arith.addf %522, %523 : vector<1x32xf32>
    %cst_153 = arith.constant 5.000000e-01 : f32
    %525 = vector.broadcast %cst_153 : f32 to vector<1x32xf32>
    %526 = arith.mulf %525, %524 : vector<1x32xf32>
    %527 = arith.mulf %516, %432 : vector<1x32xf32>
    %528 = arith.mulf %508, %518 : vector<1x32xf32>
    %529 = arith.addf %527, %528 : vector<1x32xf32>
    %530 = math.tanh %529 : vector<1x32xf32>
    %531 = arith.mulf %526, %530 : vector<1x32xf32>
    %cst_154 = arith.constant dense<0.000000e+00> : vector<1x128xf32>
    %532 = tpu.matmul %531, %1, %cst_154 {dimension_numbers = #tpu.dot_dimension_numbers<[1], [0], [0], [1], [0, 0, 1, 1], [], []>} : vector<1x32xf32>, vector<32x128xf32>, vector<1x128xf32> -> vector<1x128xf32>
    %533 = arith.addf %532, %3 : vector<1x128xf32>
    %534 = vector.broadcast %cst_9 : f32 to vector<1x128xf32>
    %535 = arith.select %6, %533, %534 : vector<1x128xi1>, vector<1x128xf32>
    %cst_155 = arith.constant dense<0xFF800000> : vector<1xf32>
    %536 = vector.multi_reduction <maximumf>, %535, %cst_155 [1] : vector<1x128xf32> to vector<1xf32>
    %537 = vector.shape_cast %536 : vector<1xf32> to vector<1x1xf32>
    %538 = vector.broadcast %537 : vector<1x1xf32> to vector<1x128xf32>
    %539 = arith.subf %535, %538 : vector<1x128xf32>
    %540 = math.exp %539 : vector<1x128xf32>
    %cst_156 = arith.constant dense<0.000000e+00> : vector<1xf32>
    %541 = vector.multi_reduction <add>, %540, %cst_156 [1] : vector<1x128xf32> to vector<1xf32>
    %542 = vector.shape_cast %541 : vector<1xf32> to vector<1x1xf32>
    %543 = tpu.reciprocal %542 {approx = true} : vector<1x1xf32> -> vector<1x1xf32>
    %544 = arith.mulf %542, %543 : vector<1x1xf32>
    %cst_157 = arith.constant 2.000000e+00 : f32
    %545 = vector.broadcast %cst_157 : f32 to vector<1x1xf32>
    %546 = arith.subf %545, %544 : vector<1x1xf32>
    %547 = arith.mulf %543, %546 : vector<1x1xf32>
    %548 = vector.broadcast %547 : vector<1x1xf32> to vector<1x128xf32>
    %549 = arith.mulf %540, %548 : vector<1x128xf32>
    %550 = vector.broadcast %537 : vector<1x1xf32> to vector<1x128xf32>
    %551 = arith.subf %533, %550 : vector<1x128xf32>
    %552 = math.log %542 : vector<1x1xf32>
    %553 = vector.broadcast %552 : vector<1x1xf32> to vector<1x128xf32>
    %554 = arith.subf %551, %553 : vector<1x128xf32>
    %cst_158 = arith.constant 0.000000e+00 : f32
    %555 = vector.broadcast %cst_158 : f32 to vector<1x128xf32>
    %556 = arith.select %6, %554, %555 : vector<1x128xi1>, vector<1x128xf32>
    %557 = arith.index_cast %c5_i32 : i32 to index
    %c0_159 = arith.constant 0 : index
    %558 = vector.load %arg2[%557, %c0_159] : memref<8x128xf32, #tpu.memory_space<vmem>>, vector<1x128xf32>
    %559 = arith.addf %556, %558 : vector<1x128xf32>
    %560 = vector.broadcast %cst_9 : f32 to vector<1x128xf32>
    %561 = arith.select %6, %559, %560 : vector<1x128xi1>, vector<1x128xf32>
    %cst_160 = arith.constant dense<0xFF800000> : vector<1xf32>
    %562 = vector.multi_reduction <maximumf>, %561, %cst_160 [1] : vector<1x128xf32> to vector<1xf32>
    %563 = vector.shape_cast %562 : vector<1xf32> to vector<1x1xf32>
    %564 = vector.broadcast %563 : vector<1x1xf32> to vector<1x128xf32>
    %565 = arith.cmpf oge, %561, %564 : vector<1x128xf32>
    %c128_i32_161 = arith.constant 128 : i32
    %566 = vector.broadcast %c128_i32_161 : i32 to vector<1x128xi32>
    %567 = arith.select %565, %4, %566 : vector<1x128xi1>, vector<1x128xi32>
    %cst_162 = arith.constant dense<2147483647> : vector<1xi32>
    %568 = vector.multi_reduction <minsi>, %567, %cst_162 [1] : vector<1x128xi32> to vector<1xi32>
    %569 = vector.shape_cast %568 : vector<1xi32> to vector<1x1xi32>
    %570 = vector.broadcast %569 : vector<1x1xi32> to vector<1x128xi32>
    %571 = arith.cmpi eq, %4, %570 : vector<1x128xi32>
    %cst_163 = arith.constant 0.000000e+00 : f32
    %572 = vector.broadcast %cst_163 : f32 to vector<1x128xf32>
    %573 = arith.select %571, %556, %572 : vector<1x128xi1>, vector<1x128xf32>
    %cst_164 = arith.constant dense<0.000000e+00> : vector<1xf32>
    %574 = vector.multi_reduction <add>, %573, %cst_164 [1] : vector<1x128xf32> to vector<1xf32>
    %575 = vector.shape_cast %574 : vector<1xf32> to vector<1x1xf32>
    %c8_i32_165 = arith.constant 8 : i32
    %576 = vector.broadcast %c8_i32_165 : i32 to vector<1x128xi32>
    %577 = arith.cmpi eq, %4, %576 : vector<1x128xi32>
    %cst_166 = arith.constant 0.000000e+00 : f32
    %578 = vector.shape_cast %575 : vector<1x1xf32> to vector<1x1xf32>
    %579 = vector.broadcast %578 : vector<1x1xf32> to vector<1x128xf32>
    %580 = vector.broadcast %cst_166 : f32 to vector<1x128xf32>
    %581 = arith.select %577, %579, %580 : vector<1x128xi1>, vector<1x128xf32>
    %582 = arith.addf %549, %581 : vector<1x128xf32>
    %c9_i32_167 = arith.constant 9 : i32
    %583 = vector.broadcast %c9_i32_167 : i32 to vector<1x128xi32>
    %584 = arith.cmpi eq, %4, %583 : vector<1x128xi32>
    %585 = arith.sitofp %569 : vector<1x1xi32> to vector<1x1xf32>
    %cst_168 = arith.constant 0.000000e+00 : f32
    %586 = vector.shape_cast %585 : vector<1x1xf32> to vector<1x1xf32>
    %587 = vector.broadcast %586 : vector<1x1xf32> to vector<1x128xf32>
    %588 = vector.broadcast %cst_168 : f32 to vector<1x128xf32>
    %589 = arith.select %584, %587, %588 : vector<1x128xi1>, vector<1x128xf32>
    %590 = arith.addf %582, %589 : vector<1x128xf32>
    %591 = arith.index_cast %c5_i32 : i32 to index
    %c0_169 = arith.constant 0 : index
    %592 = vector.load %arg5[%591, %c0_169] : memref<8x128xf32, #tpu.memory_space<vmem>>, vector<1x128xf32>
    tpu.vector_store %arg5[%591, %c0_169], %590 {strides = array<i32>} : memref<8x128xf32, #tpu.memory_space<vmem>>, vector<1x128xf32>,
    %c6_i32 = arith.constant 6 : i32
    %593 = arith.index_cast %c6_i32 : i32 to index
    %c0_170 = arith.constant 0 : index
    %594 = vector.load %arg1[%593, %c0_170] : memref<8x32xf32, #tpu.memory_space<vmem>>, vector<1x32xf32>
    %595 = tpu.concatenate %594, %531 in 1 : vector<1x32xf32>, vector<1x32xf32> -> vector<1x64xf32>
    %cst_171 = arith.constant dense<0.000000e+00> : vector<1x128xf32>
    %596 = tpu.matmul %595, %0, %cst_171 {dimension_numbers = #tpu.dot_dimension_numbers<[1], [0], [0], [1], [0, 0, 1, 1], [], []>} : vector<1x64xf32>, vector<64x128xf32>, vector<1x128xf32> -> vector<1x128xf32>
    %597 = arith.addf %596, %2 : vector<1x128xf32>
    %598 = vector.extract_strided_slice %597 {offsets = [0, 0], sizes = [1, 32], strides = [1, 1]} : vector<1x128xf32> to vector<1x32xf32>
    %cst_172 = arith.constant 5.000000e-01 : f32
    %599 = vector.broadcast %cst_172 : f32 to vector<1x32xf32>
    %600 = arith.mulf %599, %598 : vector<1x32xf32>
    %601 = math.tanh %600 : vector<1x32xf32>
    %cst_173 = arith.constant 1.000000e+00 : f32
    %602 = vector.broadcast %cst_173 : f32 to vector<1x32xf32>
    %603 = arith.addf %601, %602 : vector<1x32xf32>
    %cst_174 = arith.constant 5.000000e-01 : f32
    %604 = vector.broadcast %cst_174 : f32 to vector<1x32xf32>
    %605 = arith.mulf %604, %603 : vector<1x32xf32>
    %606 = vector.extract_strided_slice %597 {offsets = [0, 32], sizes = [1, 32], strides = [1, 1]} : vector<1x128xf32> to vector<1x32xf32>
    %cst_175 = arith.constant 5.000000e-01 : f32
    %607 = vector.broadcast %cst_175 : f32 to vector<1x32xf32>
    %608 = arith.mulf %607, %606 : vector<1x32xf32>
    %609 = math.tanh %608 : vector<1x32xf32>
    %cst_176 = arith.constant 1.000000e+00 : f32
    %610 = vector.broadcast %cst_176 : f32 to vector<1x32xf32>
    %611 = arith.addf %609, %610 : vector<1x32xf32>
    %cst_177 = arith.constant 5.000000e-01 : f32
    %612 = vector.broadcast %cst_177 : f32 to vector<1x32xf32>
    %613 = arith.mulf %612, %611 : vector<1x32xf32>
    %614 = vector.extract_strided_slice %597 {offsets = [0, 64], sizes = [1, 32], strides = [1, 1]} : vector<1x128xf32> to vector<1x32xf32>
    %615 = math.tanh %614 : vector<1x32xf32>
    %616 = vector.extract_strided_slice %597 {offsets = [0, 96], sizes = [1, 32], strides = [1, 1]} : vector<1x128xf32> to vector<1x32xf32>
    %cst_178 = arith.constant 5.000000e-01 : f32
    %617 = vector.broadcast %cst_178 : f32 to vector<1x32xf32>
    %618 = arith.mulf %617, %616 : vector<1x32xf32>
    %619 = math.tanh %618 : vector<1x32xf32>
    %cst_179 = arith.constant 1.000000e+00 : f32
    %620 = vector.broadcast %cst_179 : f32 to vector<1x32xf32>
    %621 = arith.addf %619, %620 : vector<1x32xf32>
    %cst_180 = arith.constant 5.000000e-01 : f32
    %622 = vector.broadcast %cst_180 : f32 to vector<1x32xf32>
    %623 = arith.mulf %622, %621 : vector<1x32xf32>
    %624 = arith.mulf %613, %529 : vector<1x32xf32>
    %625 = arith.mulf %605, %615 : vector<1x32xf32>
    %626 = arith.addf %624, %625 : vector<1x32xf32>
    %627 = math.tanh %626 : vector<1x32xf32>
    %628 = arith.mulf %623, %627 : vector<1x32xf32>
    %cst_181 = arith.constant dense<0.000000e+00> : vector<1x128xf32>
    %629 = tpu.matmul %628, %1, %cst_181 {dimension_numbers = #tpu.dot_dimension_numbers<[1], [0], [0], [1], [0, 0, 1, 1], [], []>} : vector<1x32xf32>, vector<32x128xf32>, vector<1x128xf32> -> vector<1x128xf32>
    %630 = arith.addf %629, %3 : vector<1x128xf32>
    %631 = vector.broadcast %cst_9 : f32 to vector<1x128xf32>
    %632 = arith.select %6, %630, %631 : vector<1x128xi1>, vector<1x128xf32>
    %cst_182 = arith.constant dense<0xFF800000> : vector<1xf32>
    %633 = vector.multi_reduction <maximumf>, %632, %cst_182 [1] : vector<1x128xf32> to vector<1xf32>
    %634 = vector.shape_cast %633 : vector<1xf32> to vector<1x1xf32>
    %635 = vector.broadcast %634 : vector<1x1xf32> to vector<1x128xf32>
    %636 = arith.subf %632, %635 : vector<1x128xf32>
    %637 = math.exp %636 : vector<1x128xf32>
    %cst_183 = arith.constant dense<0.000000e+00> : vector<1xf32>
    %638 = vector.multi_reduction <add>, %637, %cst_183 [1] : vector<1x128xf32> to vector<1xf32>
    %639 = vector.shape_cast %638 : vector<1xf32> to vector<1x1xf32>
    %640 = tpu.reciprocal %639 {approx = true} : vector<1x1xf32> -> vector<1x1xf32>
    %641 = arith.mulf %639, %640 : vector<1x1xf32>
    %cst_184 = arith.constant 2.000000e+00 : f32
    %642 = vector.broadcast %cst_184 : f32 to vector<1x1xf32>
    %643 = arith.subf %642, %641 : vector<1x1xf32>
    %644 = arith.mulf %640, %643 : vector<1x1xf32>
    %645 = vector.broadcast %644 : vector<1x1xf32> to vector<1x128xf32>
    %646 = arith.mulf %637, %645 : vector<1x128xf32>
    %647 = vector.broadcast %634 : vector<1x1xf32> to vector<1x128xf32>
    %648 = arith.subf %630, %647 : vector<1x128xf32>
    %649 = math.log %639 : vector<1x1xf32>
    %650 = vector.broadcast %649 : vector<1x1xf32> to vector<1x128xf32>
    %651 = arith.subf %648, %650 : vector<1x128xf32>
    %cst_185 = arith.constant 0.000000e+00 : f32
    %652 = vector.broadcast %cst_185 : f32 to vector<1x128xf32>
    %653 = arith.select %6, %651, %652 : vector<1x128xi1>, vector<1x128xf32>
    %654 = arith.index_cast %c6_i32 : i32 to index
    %c0_186 = arith.constant 0 : index
    %655 = vector.load %arg2[%654, %c0_186] : memref<8x128xf32, #tpu.memory_space<vmem>>, vector<1x128xf32>
    %656 = arith.addf %653, %655 : vector<1x128xf32>
    %657 = vector.broadcast %cst_9 : f32 to vector<1x128xf32>
    %658 = arith.select %6, %656, %657 : vector<1x128xi1>, vector<1x128xf32>
    %cst_187 = arith.constant dense<0xFF800000> : vector<1xf32>
    %659 = vector.multi_reduction <maximumf>, %658, %cst_187 [1] : vector<1x128xf32> to vector<1xf32>
    %660 = vector.shape_cast %659 : vector<1xf32> to vector<1x1xf32>
    %661 = vector.broadcast %660 : vector<1x1xf32> to vector<1x128xf32>
    %662 = arith.cmpf oge, %658, %661 : vector<1x128xf32>
    %c128_i32_188 = arith.constant 128 : i32
    %663 = vector.broadcast %c128_i32_188 : i32 to vector<1x128xi32>
    %664 = arith.select %662, %4, %663 : vector<1x128xi1>, vector<1x128xi32>
    %cst_189 = arith.constant dense<2147483647> : vector<1xi32>
    %665 = vector.multi_reduction <minsi>, %664, %cst_189 [1] : vector<1x128xi32> to vector<1xi32>
    %666 = vector.shape_cast %665 : vector<1xi32> to vector<1x1xi32>
    %667 = vector.broadcast %666 : vector<1x1xi32> to vector<1x128xi32>
    %668 = arith.cmpi eq, %4, %667 : vector<1x128xi32>
    %cst_190 = arith.constant 0.000000e+00 : f32
    %669 = vector.broadcast %cst_190 : f32 to vector<1x128xf32>
    %670 = arith.select %668, %653, %669 : vector<1x128xi1>, vector<1x128xf32>
    %cst_191 = arith.constant dense<0.000000e+00> : vector<1xf32>
    %671 = vector.multi_reduction <add>, %670, %cst_191 [1] : vector<1x128xf32> to vector<1xf32>
    %672 = vector.shape_cast %671 : vector<1xf32> to vector<1x1xf32>
    %c8_i32_192 = arith.constant 8 : i32
    %673 = vector.broadcast %c8_i32_192 : i32 to vector<1x128xi32>
    %674 = arith.cmpi eq, %4, %673 : vector<1x128xi32>
    %cst_193 = arith.constant 0.000000e+00 : f32
    %675 = vector.shape_cast %672 : vector<1x1xf32> to vector<1x1xf32>
    %676 = vector.broadcast %675 : vector<1x1xf32> to vector<1x128xf32>
    %677 = vector.broadcast %cst_193 : f32 to vector<1x128xf32>
    %678 = arith.select %674, %676, %677 : vector<1x128xi1>, vector<1x128xf32>
    %679 = arith.addf %646, %678 : vector<1x128xf32>
    %c9_i32_194 = arith.constant 9 : i32
    %680 = vector.broadcast %c9_i32_194 : i32 to vector<1x128xi32>
    %681 = arith.cmpi eq, %4, %680 : vector<1x128xi32>
    %682 = arith.sitofp %666 : vector<1x1xi32> to vector<1x1xf32>
    %cst_195 = arith.constant 0.000000e+00 : f32
    %683 = vector.shape_cast %682 : vector<1x1xf32> to vector<1x1xf32>
    %684 = vector.broadcast %683 : vector<1x1xf32> to vector<1x128xf32>
    %685 = vector.broadcast %cst_195 : f32 to vector<1x128xf32>
    %686 = arith.select %681, %684, %685 : vector<1x128xi1>, vector<1x128xf32>
    %687 = arith.addf %679, %686 : vector<1x128xf32>
    %688 = arith.index_cast %c6_i32 : i32 to index
    %c0_196 = arith.constant 0 : index
    %689 = vector.load %arg5[%688, %c0_196] : memref<8x128xf32, #tpu.memory_space<vmem>>, vector<1x128xf32>
    tpu.vector_store %arg5[%688, %c0_196], %687 {strides = array<i32>} : memref<8x128xf32, #tpu.memory_space<vmem>>, vector<1x128xf32>,
    %c7_i32 = arith.constant 7 : i32
    %690 = arith.index_cast %c7_i32 : i32 to index
    %c0_197 = arith.constant 0 : index
    %691 = vector.load %arg1[%690, %c0_197] : memref<8x32xf32, #tpu.memory_space<vmem>>, vector<1x32xf32>
    %692 = tpu.concatenate %691, %628 in 1 : vector<1x32xf32>, vector<1x32xf32> -> vector<1x64xf32>
    %cst_198 = arith.constant dense<0.000000e+00> : vector<1x128xf32>
    %693 = tpu.matmul %692, %0, %cst_198 {dimension_numbers = #tpu.dot_dimension_numbers<[1], [0], [0], [1], [0, 0, 1, 1], [], []>} : vector<1x64xf32>, vector<64x128xf32>, vector<1x128xf32> -> vector<1x128xf32>
    %694 = arith.addf %693, %2 : vector<1x128xf32>
    %695 = vector.extract_strided_slice %694 {offsets = [0, 0], sizes = [1, 32], strides = [1, 1]} : vector<1x128xf32> to vector<1x32xf32>
    %cst_199 = arith.constant 5.000000e-01 : f32
    %696 = vector.broadcast %cst_199 : f32 to vector<1x32xf32>
    %697 = arith.mulf %696, %695 : vector<1x32xf32>
    %698 = math.tanh %697 : vector<1x32xf32>
    %cst_200 = arith.constant 1.000000e+00 : f32
    %699 = vector.broadcast %cst_200 : f32 to vector<1x32xf32>
    %700 = arith.addf %698, %699 : vector<1x32xf32>
    %cst_201 = arith.constant 5.000000e-01 : f32
    %701 = vector.broadcast %cst_201 : f32 to vector<1x32xf32>
    %702 = arith.mulf %701, %700 : vector<1x32xf32>
    %703 = vector.extract_strided_slice %694 {offsets = [0, 32], sizes = [1, 32], strides = [1, 1]} : vector<1x128xf32> to vector<1x32xf32>
    %cst_202 = arith.constant 5.000000e-01 : f32
    %704 = vector.broadcast %cst_202 : f32 to vector<1x32xf32>
    %705 = arith.mulf %704, %703 : vector<1x32xf32>
    %706 = math.tanh %705 : vector<1x32xf32>
    %cst_203 = arith.constant 1.000000e+00 : f32
    %707 = vector.broadcast %cst_203 : f32 to vector<1x32xf32>
    %708 = arith.addf %706, %707 : vector<1x32xf32>
    %cst_204 = arith.constant 5.000000e-01 : f32
    %709 = vector.broadcast %cst_204 : f32 to vector<1x32xf32>
    %710 = arith.mulf %709, %708 : vector<1x32xf32>
    %711 = vector.extract_strided_slice %694 {offsets = [0, 64], sizes = [1, 32], strides = [1, 1]} : vector<1x128xf32> to vector<1x32xf32>
    %712 = math.tanh %711 : vector<1x32xf32>
    %713 = vector.extract_strided_slice %694 {offsets = [0, 96], sizes = [1, 32], strides = [1, 1]} : vector<1x128xf32> to vector<1x32xf32>
    %cst_205 = arith.constant 5.000000e-01 : f32
    %714 = vector.broadcast %cst_205 : f32 to vector<1x32xf32>
    %715 = arith.mulf %714, %713 : vector<1x32xf32>
    %716 = math.tanh %715 : vector<1x32xf32>
    %cst_206 = arith.constant 1.000000e+00 : f32
    %717 = vector.broadcast %cst_206 : f32 to vector<1x32xf32>
    %718 = arith.addf %716, %717 : vector<1x32xf32>
    %cst_207 = arith.constant 5.000000e-01 : f32
    %719 = vector.broadcast %cst_207 : f32 to vector<1x32xf32>
    %720 = arith.mulf %719, %718 : vector<1x32xf32>
    %721 = arith.mulf %710, %626 : vector<1x32xf32>
    %722 = arith.mulf %702, %712 : vector<1x32xf32>
    %723 = arith.addf %721, %722 : vector<1x32xf32>
    %724 = math.tanh %723 : vector<1x32xf32>
    %725 = arith.mulf %720, %724 : vector<1x32xf32>
    %cst_208 = arith.constant dense<0.000000e+00> : vector<1x128xf32>
    %726 = tpu.matmul %725, %1, %cst_208 {dimension_numbers = #tpu.dot_dimension_numbers<[1], [0], [0], [1], [0, 0, 1, 1], [], []>} : vector<1x32xf32>, vector<32x128xf32>, vector<1x128xf32> -> vector<1x128xf32>
    %727 = arith.addf %726, %3 : vector<1x128xf32>
    %728 = vector.broadcast %cst_9 : f32 to vector<1x128xf32>
    %729 = arith.select %6, %727, %728 : vector<1x128xi1>, vector<1x128xf32>
    %cst_209 = arith.constant dense<0xFF800000> : vector<1xf32>
    %730 = vector.multi_reduction <maximumf>, %729, %cst_209 [1] : vector<1x128xf32> to vector<1xf32>
    %731 = vector.shape_cast %730 : vector<1xf32> to vector<1x1xf32>
    %732 = vector.broadcast %731 : vector<1x1xf32> to vector<1x128xf32>
    %733 = arith.subf %729, %732 : vector<1x128xf32>
    %734 = math.exp %733 : vector<1x128xf32>
    %cst_210 = arith.constant dense<0.000000e+00> : vector<1xf32>
    %735 = vector.multi_reduction <add>, %734, %cst_210 [1] : vector<1x128xf32> to vector<1xf32>
    %736 = vector.shape_cast %735 : vector<1xf32> to vector<1x1xf32>
    %737 = tpu.reciprocal %736 {approx = true} : vector<1x1xf32> -> vector<1x1xf32>
    %738 = arith.mulf %736, %737 : vector<1x1xf32>
    %cst_211 = arith.constant 2.000000e+00 : f32
    %739 = vector.broadcast %cst_211 : f32 to vector<1x1xf32>
    %740 = arith.subf %739, %738 : vector<1x1xf32>
    %741 = arith.mulf %737, %740 : vector<1x1xf32>
    %742 = vector.broadcast %741 : vector<1x1xf32> to vector<1x128xf32>
    %743 = arith.mulf %734, %742 : vector<1x128xf32>
    %744 = vector.broadcast %731 : vector<1x1xf32> to vector<1x128xf32>
    %745 = arith.subf %727, %744 : vector<1x128xf32>
    %746 = math.log %736 : vector<1x1xf32>
    %747 = vector.broadcast %746 : vector<1x1xf32> to vector<1x128xf32>
    %748 = arith.subf %745, %747 : vector<1x128xf32>
    %cst_212 = arith.constant 0.000000e+00 : f32
    %749 = vector.broadcast %cst_212 : f32 to vector<1x128xf32>
    %750 = arith.select %6, %748, %749 : vector<1x128xi1>, vector<1x128xf32>
    %751 = arith.index_cast %c7_i32 : i32 to index
    %c0_213 = arith.constant 0 : index
    %752 = vector.load %arg2[%751, %c0_213] : memref<8x128xf32, #tpu.memory_space<vmem>>, vector<1x128xf32>
    %753 = arith.addf %750, %752 : vector<1x128xf32>
    %754 = vector.broadcast %cst_9 : f32 to vector<1x128xf32>
    %755 = arith.select %6, %753, %754 : vector<1x128xi1>, vector<1x128xf32>
    %cst_214 = arith.constant dense<0xFF800000> : vector<1xf32>
    %756 = vector.multi_reduction <maximumf>, %755, %cst_214 [1] : vector<1x128xf32> to vector<1xf32>
    %757 = vector.shape_cast %756 : vector<1xf32> to vector<1x1xf32>
    %758 = vector.broadcast %757 : vector<1x1xf32> to vector<1x128xf32>
    %759 = arith.cmpf oge, %755, %758 : vector<1x128xf32>
    %c128_i32_215 = arith.constant 128 : i32
    %760 = vector.broadcast %c128_i32_215 : i32 to vector<1x128xi32>
    %761 = arith.select %759, %4, %760 : vector<1x128xi1>, vector<1x128xi32>
    %cst_216 = arith.constant dense<2147483647> : vector<1xi32>
    %762 = vector.multi_reduction <minsi>, %761, %cst_216 [1] : vector<1x128xi32> to vector<1xi32>
    %763 = vector.shape_cast %762 : vector<1xi32> to vector<1x1xi32>
    %764 = vector.broadcast %763 : vector<1x1xi32> to vector<1x128xi32>
    %765 = arith.cmpi eq, %4, %764 : vector<1x128xi32>
    %cst_217 = arith.constant 0.000000e+00 : f32
    %766 = vector.broadcast %cst_217 : f32 to vector<1x128xf32>
    %767 = arith.select %765, %750, %766 : vector<1x128xi1>, vector<1x128xf32>
    %cst_218 = arith.constant dense<0.000000e+00> : vector<1xf32>
    %768 = vector.multi_reduction <add>, %767, %cst_218 [1] : vector<1x128xf32> to vector<1xf32>
    %769 = vector.shape_cast %768 : vector<1xf32> to vector<1x1xf32>
    %c8_i32_219 = arith.constant 8 : i32
    %770 = vector.broadcast %c8_i32_219 : i32 to vector<1x128xi32>
    %771 = arith.cmpi eq, %4, %770 : vector<1x128xi32>
    %cst_220 = arith.constant 0.000000e+00 : f32
    %772 = vector.shape_cast %769 : vector<1x1xf32> to vector<1x1xf32>
    %773 = vector.broadcast %772 : vector<1x1xf32> to vector<1x128xf32>
    %774 = vector.broadcast %cst_220 : f32 to vector<1x128xf32>
    %775 = arith.select %771, %773, %774 : vector<1x128xi1>, vector<1x128xf32>
    %776 = arith.addf %743, %775 : vector<1x128xf32>
    %c9_i32_221 = arith.constant 9 : i32
    %777 = vector.broadcast %c9_i32_221 : i32 to vector<1x128xi32>
    %778 = arith.cmpi eq, %4, %777 : vector<1x128xi32>
    %779 = arith.sitofp %763 : vector<1x1xi32> to vector<1x1xf32>
    %cst_222 = arith.constant 0.000000e+00 : f32
    %780 = vector.shape_cast %779 : vector<1x1xf32> to vector<1x1xf32>
    %781 = vector.broadcast %780 : vector<1x1xf32> to vector<1x128xf32>
    %782 = vector.broadcast %cst_222 : f32 to vector<1x128xf32>
    %783 = arith.select %778, %781, %782 : vector<1x128xi1>, vector<1x128xf32>
    %784 = arith.addf %776, %783 : vector<1x128xf32>
    %785 = arith.index_cast %c7_i32 : i32 to index
    %c0_223 = arith.constant 0 : index
    %786 = vector.load %arg5[%785, %c0_223] : memref<8x128xf32, #tpu.memory_space<vmem>>, vector<1x128xf32>
    tpu.vector_store %arg5[%785, %c0_223], %784 {strides = array<i32>} : memref<8x128xf32, #tpu.memory_space<vmem>>, vector<1x128xf32>,
    %c8_i32_224 = arith.constant 8 : i32
    %787 = tpu.concatenate %725, %723 in 0 : vector<1x32xf32>, vector<1x32xf32> -> vector<2x32xf32>
    %c0_225 = arith.constant 0 : index
    %c0_226 = arith.constant 0 : index
    %788 = vector.load %arg6[%c0_225, %c0_226] : memref<2x32xf32, #tpu.memory_space<vmem>>, vector<2x32xf32>
    tpu.vector_store %arg6[%c0_225, %c0_226], %787 {strides = array<i32>} : memref<2x32xf32, #tpu.memory_space<vmem>>, vector<2x32xf32>,
    return
  }
  func.func @transform_0(%arg0: i32) -> (i32, i32) {
    %c0_i32 = arith.constant 0 : i32
    %c0_i32_0 = arith.constant 0 : i32
    %c0_i32_1 = arith.constant 0 : i32
    return %c0_i32, %c0_i32_0 : i32, i32
  }
  func.func @transform_1(%arg0: i32) -> (i32, i32) {
    %c0_i32 = arith.constant 0 : i32
    %c0_i32_0 = arith.constant 0 : i32
    %c0_i32_1 = arith.constant 0 : i32
    return %c0_i32, %c0_i32_0 : i32, i32
  }
  func.func @transform_2(%arg0: i32) -> (i32, i32) {
    %c0_i32 = arith.constant 0 : i32
    %c0_i32_0 = arith.constant 0 : i32
    %c0_i32_1 = arith.constant 0 : i32
    return %c0_i32, %c0_i32_0 : i32, i32
  }
  func.func @transform_3(%arg0: i32) -> (i32, i32) {
    %c0_i32 = arith.constant 0 : i32
    %c0_i32_0 = arith.constant 0 : i32
    %c0_i32_1 = arith.constant 0 : i32
    return %c0_i32, %c0_i32_0 : i32, i32
  }
  func.func @transform_4(%arg0: i32) -> (i32, i32) {
    %c0_i32 = arith.constant 0 : i32
    %c0_i32_0 = arith.constant 0 : i32
    %c0_i32_1 = arith.constant 0 : i32
    return %c0_i32, %c0_i32_0 : i32, i32
  }
  func.func @transform_5(%arg0: i32) -> (i32, i32) {
    %c0_i32 = arith.constant 0 : i32
    %c0_i32_0 = arith.constant 0 : i32
    %c0_i32_1 = arith.constant 0 : i32
    return %c0_i32, %c0_i32_0 : i32, i32
  }
}

</mosaic_0001>

<bundles_post_ra>
// kernel: squeeze.37
= control target key start
LH: loop header
LB: loop body
LE: loop exit
PB: predicated region body
PF: predicated region fallthrough
CT: control target
= control target key end

     0   :  { %s915_s0 = inlined_call_operand.vmem [shape: bf16[8,1,16,16], index: 0, kind: input, shape index: {}]   ;;  %s916_s1 = inlined_call_operand.vmem [shape: bf16[8,1,256], index: 1, kind: output, shape index: {}]  }
   0x1   :  { %917 = sst [smem:[#allocation14_spill]] %s916_s1 }
   0x2   :  { %v651_v0 = vld [vmem:[%s915_s0 + $0x38] sm:$0xff]   ;;  %v652_v1 = vld [vmem:[%s915_s0 + $0x30] sm:$0xff]   ;;  %v653_v2 = vld [vmem:[%s915_s0 + $0x28] sm:$0xff]   ;;  %s726_s12 = smov 3  ;;  %s728_s13 = smov 12  ;;  %vm275_vm0 = vcmask 1043458  }
   0x3   :  { %v616_v3 = vunpack.c.l.bf16 %v651_v0  ;;  %v617_v4 = vunpack.c.h.bf16 %v651_v0  ;;  %v621_v5 = vunpack.c.h.bf16 %v652_v1  ;;  %s730_s14 = smov 48  ;;  %v620_v6 = vunpack.c.l.bf16 %v652_v1  ;;  %v654_v7 = vld [vmem:[%s915_s0 + $0x20] sm:$0xff]   ;;  %s735_s17 = smov 192  ;;  %v655_v10 = vld [vmem:[%s915_s0 + $0x18] sm:$0xff]   ;;  %v656_v13 = vld [vmem:[%s915_s0 + $0x10] sm:$0xff]  }
   0x4   :  { %v625_v8 = vunpack.c.h.bf16 %v653_v2  ;;  %s737_s18 = smov 3  ;;  %s739_s19 = smov 12  ;;  %v624_v9 = vunpack.c.l.bf16 %v653_v2  ;;  %v629_v11 = vunpack.c.h.bf16 %v654_v7  ;;  %v628_v12 = vunpack.c.l.bf16 %v654_v7  ;;  %v657_v16 = vld [vmem:[%s915_s0 + $0x8] sm:$0xff]   ;;  %v643_v19 = vld [vmem:[%s915_s0] sm:$0xff]  }
   0x5   :  { %18 = vst [vmem:[#allocation1 + $0x78] sm:$0xff] %v617_v4  ;;  %s744_s22 = smov 48  ;;  %s746_s23 = smov 192  ;;  %v633_v14 = vunpack.c.h.bf16 %v655_v10  ;;  %v632_v15 = vunpack.c.l.bf16 %v655_v10  ;;  %v637_v17 = vunpack.c.h.bf16 %v656_v13  ;;  %v636_v18 = vunpack.c.l.bf16 %v656_v13 }
   0x6   :  { %33 = vst [vmem:[#allocation1 + $0x70] sm:$0xff] %v616_v3  ;;  %s748_s24 = smov 3  ;;  %s750_s25 = smov 12  ;;  %v641_v20 = vunpack.c.h.bf16 %v657_v16  ;;  %v640_v21 = vunpack.c.l.bf16 %v657_v16  ;;  %v645_v22 = vunpack.c.h.bf16 %v643_v19  ;;  %v644_v23 = vunpack.c.l.bf16 %v643_v19 }
   0x7   :  { %48 = vst [vmem:[#allocation1 + $0x68] sm:$0xff] %v621_v5  ;;  %s755_s28 = smov 48  ;;  %s757_s29 = smov 192  ;;  %vm280_vm1 = vcmask 1045508   ;;  %vm285_vm2 = vcmask 1047558   ;;  %vm244_vm3 = vcmask 1047556  }
   0x8   :  { %63 = vst [vmem:[#allocation1 + $0x60] sm:$0xff] %v620_v6  ;;  %s759_s30 = smov 3  ;;  %s764_s4 = smov 12  ;;  %vm246_vm4 = vcmask 130048   ;;  %vm289_vm5 = vcmask 1048448   ;;  %vm334_vm6 = vcmask 917248  }
   0x9   :  { %78 = vst [vmem:[#allocation1 + $0x58] sm:$0xff] %v625_v8  ;;  %s766_s5 = smov 48  ;;  %s768_s6 = smov 192  ;;  %vm379_vm7 = vcmask 786048   ;;  %vm424_vm8 = vcmask 654848   ;;  %vm469_vm9 = vcmask 523648  }
   0xa   :  { %93 = vst [vmem:[#allocation1 + $0x50] sm:$0xff] %v624_v9  ;;  %s770_s7 = smov 3  ;;  %s775_s0 = smov 12  ;;  %vm514_vm10 = vcmask 392448   ;;  %vm559_vm11 = vcmask 261248  }
   0xb   :  { %108 = vst [vmem:[#allocation1 + $0x48] sm:$0xff] %v629_v11  ;;  %s777_s10 = smov 48  ;;  %s779_s11 = smov 192 }
   0xc   :  { %123 = vst [vmem:[#allocation1 + $0x40] sm:$0xff] %v628_v12  ;;  %s781_s15 = smov 3  ;;  %s783_s16 = smov 12 }
   0xd   :  { %138 = vst [vmem:[#allocation1 + $0x38] sm:$0xff] %v633_v14  ;;  %s785_s20 = smov 48  ;;  %s787_s21 = smov 192 }
   0xe   :  { %153 = vst [vmem:[#allocation1 + $0x30] sm:$0xff] %v632_v15  ;;  %s789_s26 = smov 3  ;;  %s791_s27 = smov 12 }
   0xf   :  { %168 = vst [vmem:[#allocation1 + $0x28] sm:$0xff] %v637_v17  ;;  %s793_s2 = smov 48  ;;  %s795_s3 = smov 192 }
  0x10   :  { %183 = vst [vmem:[#allocation1 + $0x20] sm:$0xff] %v636_v18  ;;  %s797_s8 = smov 3  ;;  %s799_s9 = smov 12 }
  0x11   :  { %198 = vst [vmem:[#allocation1 + $0x18] sm:$0xff] %v641_v20  ;;  %s801_s1 = smov 48 }
  0x12   :  { %213 = vst [vmem:[#allocation1 + $0x10] sm:$0xff] %v640_v21  ;;  %918 = sst [smem:[#allocation2_spill]] %s801_s1  ;;  %s803_s1 = smov 192 }
  0x13   :  { %228 = vst [vmem:[#allocation1 + $0x8] sm:$0xff] %v645_v22  ;;  %919 = sst [smem:[#allocation3_spill]] %s803_s1  ;;  %s805_s1 = smov 3 }
  0x14   :  { %241 = vst [vmem:[#allocation1] sm:$0xff] %v644_v23  ;;  %920 = sst [smem:[#allocation4_spill]] %s805_s1  ;;  %s807_s1 = smov 12 }
  0x15   :  { %921 = sst [smem:[#allocation5_spill]] %s807_s1  ;;  %s809_s1 = smov 48 }
  0x16   :  { %922 = sst [smem:[#allocation6_spill]] %s809_s1  ;;  %s811_s1 = smov 192 }
  0x17   :  { %923 = sst [smem:[#allocation7_spill]] %s811_s1  ;;  %s813_s1 = smov 3 }
  0x18   :  { %924 = sst [smem:[#allocation8_spill]] %s813_s1  ;;  %s815_s1 = smov 12 }
  0x19   :  { %925 = sst [smem:[#allocation9_spill]] %s815_s1  ;;  %s817_s1 = smov 48 }
  0x1a   :  { %926 = sst [smem:[#allocation10_spill]] %s817_s1  ;;  %s819_s1 = smov 192  ;;  %v293_v24 = vld [vmem:[#allocation1 + $0xf] ss:$16 sm:%s737_s18]   ;;  %v383_v43 = vld [vmem:[#allocation1 + $0xd] ss:$16 sm:%s759_s30]  }
  0x1b   :  { %927 = sst [smem:[#allocation11_spill]] %s819_s1  ;;  %s821_s1 = smov 3  ;;  %v296_v25 = vld [vmem:[#allocation1 + $0xf] ss:$16 sm:%s739_s19]   ;;  %v271_v27 = vld [vmem:[#allocation1 + $0x7] ss:$16 sm:%s726_s12]  }
  0x1c   :  { %928 = sst [smem:[#allocation12_spill]] %s821_s1  ;;  %s823_s1 = smov 12  ;;  %v301_v26 = vld [vmem:[#allocation1 + $0xf] ss:$16 sm:%s744_s22]   ;;  %v274_v28 = vld [vmem:[#allocation1 + $0x7] ss:$16 sm:%s728_s13]   ;;  %v298_v30 = vsel %vm275_vm0, %v296_v25, %v293_v24 }
  0x1d   :  { %929 = sst [smem:[#allocation13_spill]] %s823_s1  ;;  %s825_s1 = smov 48  ;;  %v279_v29 = vld [vmem:[#allocation1 + $0x7] ss:$16 sm:%s730_s14]   ;;  %v276_v31 = vsel %vm275_vm0, %v274_v28, %v271_v27  ;;  %v303_v33 = vsel %vm280_vm1, %v301_v26, %v298_v30  ;;  %v306_v34 = vld [vmem:[#allocation1 + $0xf] ss:$16 sm:%s746_s23]  }
  0x1e   :  { %v284_v32 = vld [vmem:[#allocation1 + $0x7] ss:$16 sm:%s735_s17]   ;;  %v361_v35 = vld [vmem:[#allocation1 + $0x5] ss:$16 sm:%s748_s24]   ;;  %v281_v36 = vsel %vm280_vm1, %v279_v29, %v276_v31  ;;  %v308_v37 = vsel %vm285_vm2, %v306_v34, %v303_v33  ;;  %v386_v44 = vld [vmem:[#allocation1 + $0xd] ss:$16 sm:%s764_s4]  }
  0x1f   :  { %v364_v38 = vld [vmem:[#allocation1 + $0x5] ss:$16 sm:%s750_s25]   ;;  %v286_v41 = vsel %vm285_vm2, %v284_v32, %v281_v36  ;;  %v391_v45 = vld [vmem:[#allocation1 + $0xd] ss:$16 sm:%s766_s5]   ;;  %v388_v48 = vsel %vm275_vm0, %v386_v44, %v383_v43  ;;  %v316_v50 = vld [vmem:[#allocation1 + $0x6] ss:$16 sm:%s770_s7]  }
  0x20   :  { %v369_v39 = vld [vmem:[#allocation1 + $0x5] ss:$16 sm:%s755_s28]   ;;  %v366_v42 = vsel %vm275_vm0, %v364_v38, %v361_v35  ;;  %v665_v46 = vpack.i.bf16 %v308_v37, %v286_v41  ;;  %v396_v49 = vld [vmem:[#allocation1 + $0xd] ss:$16 sm:%s768_s6]   ;;  %v319_v51 = vld [vmem:[#allocation1 + $0x6] ss:$16 sm:%s775_s0]   ;;  %v393_v53 = vsel %vm280_vm1, %v391_v45, %v388_v48 }
  0x21   :  { %v374_v40 = vld [vmem:[#allocation1 + $0x5] ss:$16 sm:%s757_s29]   ;;  %v371_v47 = vsel %vm280_vm1, %v369_v39, %v366_v42  ;;  %v321_v54 = vsel %vm275_vm0, %v319_v51, %v316_v50  ;;  %v324_v55 = vld [vmem:[#allocation1 + $0x6] ss:$16 sm:%s777_s10]   ;;  %v338_v57 = vld [vmem:[#allocation1 + $0xe] ss:$16 sm:%s781_s15]   ;;  %v398_v58 = vsel %vm285_vm2, %v396_v49, %v393_v53 }
  0x22   :  { %v376_v52 = vsel %vm285_vm2, %v374_v40, %v371_v47  ;;  %v329_v56 = vld [vmem:[#allocation1 + $0x6] ss:$16 sm:%s779_s11]   ;;  %s700_s12 = smov 112   ;;  %v326_v59 = vsel %vm280_vm1, %v324_v55, %v321_v54  ;;  %v341_v60 = vld [vmem:[#allocation1 + $0xe] ss:$16 sm:%s783_s16]   ;;  %s930_s13 = sld [smem:[#allocation2_spill]] }
  0x23   :  { %666 = vrot.lane.b32.xlu0 %v665_v46, %s700_s12  ;;  %v346_v61 = vld [vmem:[#allocation1 + $0xe] ss:$16 sm:%s785_s20]   ;;  %v675_v63 = vpack.i.bf16 %v398_v58, %v376_v52  ;;  %v331_v0 = vsel %vm285_vm2, %v329_v56, %v326_v59  ;;  %s931_s14 = sld [smem:[#allocation3_spill]]  ;;  %v343_v1 = vsel %vm275_vm0, %v341_v60, %v338_v57  ;;  %v406_v2 = vld [vmem:[#allocation1 + $0x4] ss:$16 sm:%s789_s26]   ;;  %s701_s23 = smov 80  }
  0x24   :  { %v351_v62 = vld [vmem:[#allocation1 + $0xe] ss:$16 sm:%s787_s21]   ;;  %s932_s17 = sld [smem:[#allocation4_spill]]  ;;  %v409_v3 = vld [vmem:[#allocation1 + $0x4] ss:$16 sm:%s791_s27]   ;;  %v348_v5 = vsel %vm280_vm1, %v346_v61, %v343_v1  ;;  %s702_s5 = smov 96  }
  0x25   :  { %v414_v4 = vld [vmem:[#allocation1 + $0x4] ss:$16 sm:%s793_s2]   ;;  %s933_s18 = sld [smem:[#allocation5_spill]]  ;;  %v411_v6 = vsel %vm275_vm0, %v409_v3, %v406_v2  ;;  %v428_v8 = vld [vmem:[#allocation1 + $0xc] ss:$16 sm:%s797_s8]   ;;  %676 = vrot.lane.b32.xlu1 %v675_v63, %s701_s23  ;;  %v353_v10 = vsel %vm285_vm2, %v351_v62, %v348_v5  ;;  %s472_s6 = smov 3 }
  0x26   :  { %s934_s19 = sld [smem:[#allocation6_spill]]  ;;  %v419_v7 = vld [vmem:[#allocation1 + $0x4] ss:$16 sm:%s795_s3]   ;;  %v431_v9 = vld [vmem:[#allocation1 + $0xc] ss:$16 sm:%s799_s9]   ;;  %v416_v11 = vsel %vm280_vm1, %v414_v4, %v411_v6  ;;  %v670_v16 = vpack.i.bf16 %v353_v10, %v331_v0  ;;  %s475_s7 = smov 12 }
  0x27   :  { %s935_s22 = sld [smem:[#allocation7_spill]]  ;;  %v433_v12 = vsel %vm275_vm0, %v431_v9, %v428_v8  ;;  %v421_v17 = vsel %vm285_vm2, %v419_v7, %v416_v11  ;;  %v459_v35 = vld [vmem:[#allocation1 + $0x3] ss:$16 sm:%s825_s1]   ;;  %s463_s1 = smov 192  ;;  %v473_v40 = vld [vmem:[#allocation1 + $0xb] ss:$16 sm:%s472_s6]  }
  0x28   :  { %s936_s24 = sld [smem:[#allocation8_spill]]  ;;  %v436_v13 = vld [vmem:[#allocation1 + $0xc] ss:$16 sm:%s930_s13]   ;;  %v464_v37 = vld [vmem:[#allocation1 + $0x3] ss:$16 sm:%s463_s1]   ;;  %s480_s0 = smov 48 }
  0x29   :  { %s937_s25 = sld [smem:[#allocation9_spill]]  ;;  %v441_v14 = vld [vmem:[#allocation1 + $0xc] ss:$16 sm:%s931_s14]   ;;  %v438_v18 = vsel %vm280_vm1, %v436_v13, %v433_v12  ;;  %v476_v41 = vld [vmem:[#allocation1 + $0xb] ss:$16 sm:%s475_s7]   ;;  %s485_s10 = smov 192 }
  0x2a   :  { %s938_s28 = sld [smem:[#allocation10_spill]]  ;;  %v541_v15 = vld [vmem:[#allocation1 + $0x1] ss:$16 sm:%s932_s17]   ;;  %v443_v22 = vsel %vm285_vm2, %v441_v14, %v438_v18  ;;  %v478_v43 = vsel %vm275_vm0, %v476_v41, %v473_v40  ;;  %v481_v44 = vld [vmem:[#allocation1 + $0xb] ss:$16 sm:%s480_s0]   ;;  %s495_s11 = smov 3 }
  0x2b   :  { %s939_s29 = sld [smem:[#allocation11_spill]]  ;;  %v544_v19 = vld [vmem:[#allocation1 + $0x1] ss:$16 sm:%s933_s18]   ;;  %v680_v32 = vpack.i.bf16 %v443_v22, %v421_v17  ;;  %671 = vrot.lane.b32.xlu0 %v670_v16, %s702_s5  ;;  %v486_v45 = vld [vmem:[#allocation1 + $0xb] ss:$16 sm:%s485_s10]   ;;  %s498_s15 = smov 12  ;;  %v483_v46 = vsel %vm280_vm1, %v481_v44, %v478_v43 }
  0x2c   :  { %s940_s30 = sld [smem:[#allocation12_spill]]  ;;  %v549_v20 = vld [vmem:[#allocation1 + $0x1] ss:$16 sm:%s934_s19]   ;;  %v546_v23 = vsel %vm275_vm0, %v544_v19, %v541_v15  ;;  %s703_s16 = smov 64   ;;  %v496_v47 = vld [vmem:[#allocation1 + $0x2] ss:$16 sm:%s495_s11]   ;;  %v488_v50 = vsel %vm285_vm2, %v486_v45, %v483_v46 }
  0x2d   :  { %s941_s4 = sld [smem:[#allocation13_spill]]  ;;  %v554_v21 = vld [vmem:[#allocation1 + $0x1] ss:$16 sm:%s935_s22]   ;;  %v551_v27 = vsel %vm280_vm1, %v549_v20, %v546_v23  ;;  %681 = vrot.lane.b32.xlu1 %v680_v32, %s703_s16  ;;  %v499_v48 = vld [vmem:[#allocation1 + $0x2] ss:$16 sm:%s498_s15]   ;;  %s503_s20 = smov 48 }
  0x2e   :  { %v563_v24 = vld [vmem:[#allocation1 + $0x9] ss:$16 sm:%s936_s24]   ;;  %v556_v38 = vsel %vm285_vm2, %v554_v21, %v551_v27  ;;  %s508_s21 = smov 192  ;;  %v501_v51 = vsel %vm275_vm0, %v499_v48, %v496_v47  ;;  %v504_v52 = vld [vmem:[#allocation1 + $0x2] ss:$16 sm:%s503_s20]   ;;  %s517_s26 = smov 3 }
  0x2f   :  { %v566_v25 = vld [vmem:[#allocation1 + $0x9] ss:$16 sm:%s937_s25]   ;;  %v506_v54 = vsel %vm280_vm1, %v504_v52, %v501_v51  ;;  %v509_v55 = vld [vmem:[#allocation1 + $0x2] ss:$16 sm:%s508_s21]   ;;  %v518_v56 = vld [vmem:[#allocation1 + $0xa] ss:$16 sm:%s517_s26]  }
  0x30   :  { %v571_v26 = vld [vmem:[#allocation1 + $0x9] ss:$16 sm:%s938_s28]   ;;  %v568_v28 = vsel %vm275_vm0, %v566_v25, %v563_v24  ;;  %s520_s27 = smov 12  ;;  %s525_s2 = smov 48  ;;  %v511_v61 = vsel %vm285_vm2, %v509_v55, %v506_v54 }
  0x31   :  { %v576_v29 = vld [vmem:[#allocation1 + $0x9] ss:$16 sm:%s939_s29]   ;;  %v573_v33 = vsel %vm280_vm1, %v571_v26, %v568_v28  ;;  %v521_v57 = vld [vmem:[#allocation1 + $0xa] ss:$16 sm:%s520_s27]   ;;  %s530_s3 = smov 192  ;;  %s704_s8 = smov 48  }
  0x32   :  { %v451_v30 = vld [vmem:[#allocation1 + $0x3] ss:$16 sm:%s940_s30]   ;;  %v578_v39 = vsel %vm285_vm2, %v576_v29, %v573_v33  ;;  %v526_v58 = vld [vmem:[#allocation1 + $0xa] ss:$16 sm:%s525_s2]   ;;  %v523_v59 = vsel %vm275_vm0, %v521_v57, %v518_v56  ;;  %s705_s9 = smov 16   ;;  %s706_s12 = smov 32  }
  0x33   :  { %v454_v31 = vld [vmem:[#allocation1 + $0x3] ss:$16 sm:%s941_s4]   ;;  %v695_v49 = vpack.i.bf16 %v578_v39, %v556_v38  ;;  %v531_v60 = vld [vmem:[#allocation1 + $0xa] ss:$16 sm:%s530_s3]   ;;  %v528_v62 = vsel %vm280_vm1, %v526_v58, %v523_v59  ;;  %s942_s17 = sld [smem:[#allocation14_spill]] }
  0x34   :  { %v456_v34 = vsel %vm275_vm0, %v454_v31, %v451_v30  ;;  %v533_v63 = vsel %vm285_vm2, %v531_v60, %v528_v62  ;;  %v242_v1 = vld [vmem:[#allocation1] ss:$8 sm:$0xf]  }
  0x35   :  { %v461_v36 = vsel %vm280_vm1, %v459_v35, %v456_v34  ;;  %696 = vrot.lane.b32.xlu0 %v695_v49, %s705_s9  ;;  %v690_v0 = vpack.i.bf16 %v533_v63, %v511_v61  ;;  %v243_v2 = vld [vmem:[#allocation1] ss:$8 sm:$0xf0]  }
  0x36   :  { %v466_v42 = vsel %vm285_vm2, %v464_v37, %v461_v36  ;;  %v245_v3 = vsel %vm244_vm3, %v243_v2, %v242_v1  ;;  %v255_v4 = vld [vmem:[#allocation1 + $0x40] ss:$8 sm:$0xf]  }
  0x37   :  { %v685_v53 = vpack.i.bf16 %v488_v50, %v466_v42  ;;  %247 = vst.msk [vmem:[#allocation0] ss:$8 sm:$0x3] %vm246_vm4, %v245_v3   ;;  %v257_v5 = vld [vmem:[#allocation1 + $0x40] ss:$8 sm:$0xf0]  }
  0x38   :  { %249 = vst.msk [vmem:[#allocation0 - $0xf] ss:$8 sm:$0xc] %vm246_vm4, %v245_v3   ;;  %v259_v6 = vsel %vm244_vm3, %v257_v5, %v255_v4 }
  0x39   :  { %686 = vrot.lane.b32.xlu2 %v685_v53, %s704_s8  ;;  %251 = vst.msk [vmem:[#allocation0 - $0x1e] ss:$8 sm:$0x30] %vm246_vm4, %v245_v3  }
  0x3a   :  { %253 = vst.msk [vmem:[#allocation0 - $0x2d] ss:$8 sm:$0xc0] %vm246_vm4, %v245_v3  }
  0x3b   :  { %262 = vst.msk [vmem:[#allocation0 + $0x4] ss:$8 sm:$0x3] %vm246_vm4, %v259_v6  }
  0x3c   :  { %264 = vst.msk [vmem:[#allocation0 - $0xb] ss:$8 sm:$0xc] %vm246_vm4, %v259_v6  }
  0x3d   :  { %266 = vst.msk [vmem:[#allocation0 - $0x1a] ss:$8 sm:$0x30] %vm246_vm4, %v259_v6  }
  0x3e   :  { %268 = vst.msk [vmem:[#allocation0 - $0x29] ss:$8 sm:$0xc0] %vm246_vm4, %v259_v6  }
  0x41   :  { %691 = vrot.lane.b32.xlu2 %v690_v0, %s706_s12 }
  0x93   :  { %v687_v7 = vpop.permute.xlu2 %686 }
  0x94   :  { %v688_v21 = vunpack.i.l.bf16 %v687_v7  ;;  %v689_v23 = vunpack.i.h.bf16 %v687_v7 }
  0x95   :  { %v667_v9 = vpop.permute.xlu0 %666 }
  0x96   :  { %v669_v10 = vunpack.i.h.bf16 %v667_v9  ;;  %v668_v11 = vunpack.i.l.bf16 %v667_v9 }
  0x97   :  { %v677_v12 = vpop.permute.xlu1 %676 }
  0x98   :  { %290 = vst.msk [vmem:[#allocation0] sm:$0xff] %vm289_vm5, %v668_v11   ;;  %v678_v16 = vunpack.i.l.bf16 %v677_v12  ;;  %v679_v18 = vunpack.i.h.bf16 %v677_v12 }
  0x99   :  { %313 = vst.msk [vmem:[#allocation0 + $0x8] sm:$0xff] %vm289_vm5, %v669_v10  }
  0x9b   :  { %v692_v8 = vpop.permute.xlu2 %691 }
  0x9c   :  { %v693_v22 = vunpack.i.l.bf16 %v692_v8  ;;  %v694_v24 = vunpack.i.h.bf16 %v692_v8 }
  0x9d   :  { %v672_v13 = vpop.permute.xlu0 %671 }
  0x9e   :  { %v674_v14 = vunpack.i.h.bf16 %v672_v13  ;;  %v673_v15 = vunpack.i.l.bf16 %v672_v13 }
  0x9f   :  { %v682_v17 = vpop.permute.xlu1 %681 }
  0xa0   :  { %335 = vst.msk [vmem:[#allocation0] sm:$0xff] %vm334_vm6, %v673_v15   ;;  %v684_v19 = vunpack.i.h.bf16 %v682_v17  ;;  %v683_v20 = vunpack.i.l.bf16 %v682_v17 }
  0xa1   :  { %358 = vst.msk [vmem:[#allocation0 + $0x8] sm:$0xff] %vm334_vm6, %v674_v14  }
  0xa2   :  { %380 = vst.msk [vmem:[#allocation0] sm:$0xff] %vm379_vm7, %v678_v16  }
  0xa3   :  { %403 = vst.msk [vmem:[#allocation0 + $0x8] sm:$0xff] %vm379_vm7, %v679_v18  }
  0xa4   :  { %425 = vst.msk [vmem:[#allocation0] sm:$0xff] %vm424_vm8, %v683_v20  }
  0xa5   :  { %448 = vst.msk [vmem:[#allocation0 + $0x8] sm:$0xff] %vm424_vm8, %v684_v19  }
  0xa6   :  { %470 = vst.msk [vmem:[#allocation0] sm:$0xff] %vm469_vm9, %v688_v21  }
  0xa7   :  { %v697_v25 = vpop.permute.xlu0 %696  ;;  %493 = vst.msk [vmem:[#allocation0 + $0x8] sm:$0xff] %vm469_vm9, %v689_v23  }
  0xa8   :  { %v698_v26 = vunpack.i.l.bf16 %v697_v25  ;;  %v699_v27 = vunpack.i.h.bf16 %v697_v25  ;;  %515 = vst.msk [vmem:[#allocation0] sm:$0xff] %vm514_vm10, %v693_v22  }
  0xa9   :  { %538 = vst.msk [vmem:[#allocation0 + $0x8] sm:$0xff] %vm514_vm10, %v694_v24  }
  0xaa   :  { %560 = vst.msk [vmem:[#allocation0] sm:$0xff] %vm559_vm11, %v698_v26  }
  0xab   :  { %583 = vst.msk [vmem:[#allocation0 + $0x8] sm:$0xff] %vm559_vm11, %v699_v27  }
  0xb1   :  { %v586_v28 = vld [vmem:[#allocation0] sm:$0xff] }
  0xb2   :  { %v592_v29 = vld [vmem:[#allocation0 + $0x8] sm:$0xff] }
  0xb3   :  { %v649_v30 = vpack.c.bf16 %v592_v29, %v586_v28 }
  0xb5   :  { %650 = vst [vmem:[%s942_s17] sm:$0xff] %v649_v30  }

// kernel: _rollout.2
= control target key start
LH: loop header
LB: loop body
LE: loop exit
PB: predicated region body
PF: predicated region fallthrough
CT: control target
= control target key end

     0   :  { %vm276_vm0 = vcmask 1043456   ;;  %vm269_vm1 = vcmask 326656   ;;  %vm1029_vm2 = vcmask 261120   ;;  %s1650_s0 = inlined_call_operand.vmem [shape: bf16[40,2048], index: 0, kind: input, shape index: {}]   ;;  %s1651_s1 = inlined_call_operand.vmem [shape: bf16[32,40], index: 1, kind: input, shape index: {}]   ;;  %s1652_s2 = inlined_call_operand.vmem [shape: f32[8,2048], index: 2, kind: input, shape index: {}]   ;;  %s1653_s3 = inlined_call_operand.vmem [shape: f32[8,32], index: 3, kind: output, shape index: {}]  }
   0x1   :  { %v51_v0 = vld [vmem:[%s1650_s0 + $0x100] sm:$0xff]  ;;  %v52_v1 = vld [vmem:[%s1650_s0 + $0x108] sm:$0xff]  ;;  %v54_v31 = vld [vmem:[%s1650_s0 + $0x118] sm:$0xff] }
   0x2   :  { %v173_v2 = vunpack.c.l.b16 %v51_v0  ;;  %v174_v3 = vunpack.c.h.b16 %v51_v0  ;;  %v175_v4 = vunpack.c.l.b16 %v52_v1  ;;  %v176_v5 = vunpack.c.h.b16 %v52_v1  ;;  %v1109_v6 = vld [vmem:[%s1650_s0 + $0x80] sm:$0xf]  ;;  %v1221_v12 = vld [vmem:[%s1650_s0 + $0x84] sm:$0xf]  ;;  %v1117_v14 = vld [vmem:[%s1650_s0 + $0x88] sm:$0xf] }
   0x3   :  { %v1229_v7 = vld [vmem:[%s1650_s0 + $0xbc] sm:$0xf0]  ;;  %v1111_v13 = vld [vmem:[%s1650_s0 + $0xc0] sm:$0xf0]  ;;  %v1230_v15 = vld [vmem:[%s1650_s0 + $0xc4] sm:$0xf0]  ;;  %v179_v36 = vunpack.c.l.b16 %v54_v31  ;;  %v180_v37 = vunpack.c.h.b16 %v54_v31 }
   0x4   :  { %v221_v8 = vpack.c.b16 %v173_v2, %v173_v2  ;;  %v222_v9 = vpack.c.b16 %v174_v3, %v174_v3  ;;  %v223_v10 = vpack.c.b16 %v175_v4, %v175_v4  ;;  %v224_v11 = vpack.c.b16 %v176_v5, %v176_v5  ;;  %v1222_v16 = vld [vmem:[%s1650_s0 + $0x8c] sm:$0xf]  ;;  %v1045_v22 = vld [vmem:[%s1650_s0] sm:$0xf]  ;;  %v1205_v26 = vld [vmem:[%s1650_s0 + $0x4] sm:$0xf] }
   0x5   :  { %v1119_v17 = vld [vmem:[%s1650_s0 + $0xc8] sm:$0xf0]  ;;  %v1110_v23 = vor.u32 %v1229_v7, %v1109_v6  ;;  %v1114_v24 = vor.u32 %v1221_v12, %v1111_v13  ;;  %v1213_v25 = vld [vmem:[%s1650_s0 + $0x3c] sm:$0xf0]  ;;  %v1047_v27 = vld [vmem:[%s1650_s0 + $0x40] sm:$0xf0]  ;;  %v1118_v28 = vor.u32 %v1230_v15, %v1117_v14  ;;  %v227_v42 = vpack.c.b16 %v179_v36, %v179_v36 }
   0x6   :  { %v278_v18 = vsel %vm276_vm0, %v221_v8, 0  ;;  %v281_v19 = vsel %vm276_vm0, %v222_v9, 0  ;;  %v284_v20 = vsel %vm276_vm0, %v223_v10, 0  ;;  %v287_v21 = vsel %vm276_vm0, %v224_v11, 0  ;;  %v1053_v30 = vld [vmem:[%s1650_s0 + $0x8] sm:$0xf] }
   0x7   :  { %330 = vmatpush.bf16.msra.mxu0 %v278_v18  ;;  %349 = vmatpush.bf16.msra.mxu1 %v281_v19  ;;  %v1122_v29 = vor.u32 %v1222_v16, %v1119_v17  ;;  %v53_v32 = vld [vmem:[%s1650_s0 + $0x110] sm:$0xff]  ;;  %v1214_v33 = vld [vmem:[%s1650_s0 + $0x44] sm:$0xf0]  ;;  %v1206_v34 = vld [vmem:[%s1650_s0 + $0xc] sm:$0xf]  ;;  %v1046_v40 = vor.u32 %v1213_v25, %v1045_v22  ;;  %v1050_v41 = vor.u32 %v1205_v26, %v1047_v27  ;;  %v296_v51 = vsel %vm276_vm0, %v227_v42, 0 }
   0x8   :  { %368 = vmatpush.bf16.msra.mxu2 %v284_v20  ;;  %387 = vmatpush.bf16.msra.mxu3 %v287_v21  ;;  %v1055_v35 = vld [vmem:[%s1650_s0 + $0x48] sm:$0xf0]  ;;  %v177_v38 = vunpack.c.l.b16 %v53_v32  ;;  %v178_v39 = vunpack.c.h.b16 %v53_v32  ;;  %v228_v43 = vpack.c.b16 %v180_v37, %v180_v37  ;;  %v1054_v44 = vor.u32 %v1214_v33, %v1053_v30  ;;  %v1324_v46 = vld [vmem:[%s1651_s1] sm:$0xff]  ;;  %v1133_v49 = vld [vmem:[%s1650_s0 + $0x98] sm:$0xf] }
   0x9   :  { %v1058_v45 = vor.u32 %v1206_v34, %v1055_v35  ;;  %v1232_v50 = vld [vmem:[%s1650_s0 + $0xd4] sm:$0xf0]  ;;  %v1224_v53 = vld [vmem:[%s1650_s0 + $0x9c] sm:$0xf]  ;;  %v1125_v55 = vld [vmem:[%s1650_s0 + $0x90] sm:$0xf] }
   0xa   :  { %v225_v47 = vpack.c.b16 %v177_v38, %v177_v38  ;;  %v226_v48 = vpack.c.b16 %v178_v39, %v178_v39  ;;  %v299_v52 = vsel %vm276_vm0, %v228_v43, 0  ;;  %v1135_v54 = vld [vmem:[%s1650_s0 + $0xd8] sm:$0xf0]  ;;  %v1231_v56 = vld [vmem:[%s1650_s0 + $0xcc] sm:$0xf0]  ;;  %v1134_v61 = vor.u32 %v1232_v50, %v1133_v49  ;;  %v56_v5 = vld [vmem:[%s1650_s0 + $0x128] sm:$0xff] }
   0xb   :  { %331 = vmatpush.bf16.msra.mxu0 %v1110_v23  ;;  %350 = vmatpush.bf16.msra.mxu1 %v1114_v24  ;;  %v1223_v57 = vld [vmem:[%s1650_s0 + $0x94] sm:$0xf]  ;;  %v1138_v62 = vor.u32 %v1224_v53, %v1135_v54  ;;  %v1069_v63 = vld [vmem:[%s1650_s0 + $0x18] sm:$0xf]  ;;  %v1208_v1 = vld [vmem:[%s1650_s0 + $0x1c] sm:$0xf]  ;;  %v1126_v3 = vor.u32 %v1231_v56, %v1125_v55  ;;  %v183_v8 = vunpack.c.l.b16 %v56_v5  ;;  %v184_v9 = vunpack.c.h.b16 %v56_v5 }
   0xc   :  { %369 = vmatpush.bf16.msra.mxu2 %v1118_v28  ;;  %388 = vmatpush.bf16.msra.mxu3 %v1122_v29  ;;  %v1127_v58 = vld [vmem:[%s1650_s0 + $0xd0] sm:$0xf0]  ;;  %v290_v59 = vsel %vm276_vm0, %v225_v47, 0  ;;  %v293_v60 = vsel %vm276_vm0, %v226_v48, 0  ;;  %v1216_v0 = vld [vmem:[%s1650_s0 + $0x54] sm:$0xf0] }
   0xd   :  { %v1071_v2 = vld [vmem:[%s1650_s0 + $0x58] sm:$0xf0]  ;;  %v1130_v4 = vor.u32 %v1223_v57, %v1127_v58  ;;  %v55_v6 = vld [vmem:[%s1650_s0 + $0x120] sm:$0xff]  ;;  %v1061_v7 = vld [vmem:[%s1650_s0 + $0x10] sm:$0xf]  ;;  %v1070_v12 = vor.u32 %v1216_v0, %v1069_v63  ;;  %v231_v17 = vpack.c.b16 %v183_v8, %v183_v8  ;;  %v232_v18 = vpack.c.b16 %v184_v9, %v184_v9 }
   0xe   :  { %v181_v10 = vunpack.c.l.b16 %v55_v6  ;;  %v182_v11 = vunpack.c.h.b16 %v55_v6  ;;  %v1074_v13 = vor.u32 %v1208_v1, %v1071_v2  ;;  %v1215_v14 = vld [vmem:[%s1650_s0 + $0x4c] sm:$0xf0]  ;;  %v1207_v15 = vld [vmem:[%s1650_s0 + $0x14] sm:$0xf]  ;;  %v1149_v21 = vld [vmem:[%s1650_s0 + $0xa8] sm:$0xf] }
   0xf   :  { %332 = vmatpush.bf16.msra.mxu0 %v1046_v40  ;;  %351 = vmatpush.bf16.msra.mxu1 %v1050_v41  ;;  %v1063_v16 = vld [vmem:[%s1650_s0 + $0x50] sm:$0xf0]  ;;  %v1234_v22 = vld [vmem:[%s1650_s0 + $0xe4] sm:$0xf0]  ;;  %v1226_v23 = vld [vmem:[%s1650_s0 + $0xac] sm:$0xf]  ;;  %v1062_v25 = vor.u32 %v1215_v14, %v1061_v7 }
  0x10   :  { %370 = vmatpush.bf16.msra.mxu2 %v1054_v44  ;;  %389 = vmatpush.bf16.msra.mxu3 %v1058_v45  ;;  %v229_v19 = vpack.c.b16 %v181_v10, %v181_v10  ;;  %v230_v20 = vpack.c.b16 %v182_v11, %v182_v11  ;;  %v1151_v24 = vld [vmem:[%s1650_s0 + $0xe8] sm:$0xf0]  ;;  %v1066_v26 = vor.u32 %v1207_v15, %v1063_v16  ;;  %v308_v27 = vsel %vm276_vm0, %v231_v17, 0  ;;  %v1141_v34 = vld [vmem:[%s1650_s0 + $0xa0] sm:$0xf]  ;;  %v58_v53 = vld [vmem:[%s1650_s0 + $0x138] sm:$0xff] }
  0x11   :  { %v311_v28 = vsel %vm276_vm0, %v232_v18, 0  ;;  %v1150_v31 = vor.u32 %v1234_v22, %v1149_v21  ;;  %v1154_v32 = vor.u32 %v1226_v23, %v1151_v24  ;;  %v1411_v33 = vld [vmem:[%s1651_s1 + $0x8] sm:$0xff]  ;;  %v1233_v35 = vld [vmem:[%s1650_s0 + $0xdc] sm:$0xf0]  ;;  %v1225_v36 = vld [vmem:[%s1650_s0 + $0xa4] sm:$0xf]  ;;  %v187_v55 = vunpack.c.l.b16 %v58_v53 }
  0x12   :  { %1171 = vmatmul.msk.bf16.vlgmr.msra.gmra.mxu0 %vm269_vm1, %v1324_v46  ;;  %1173 = vmatmul.msk.bf16.vlgmr.msra.gmra.mxu1 %vm269_vm1, %v1324_v46  ;;  %v302_v29 = vsel %vm276_vm0, %v229_v19, 0  ;;  %v305_v30 = vsel %vm276_vm0, %v230_v20, 0  ;;  %v1142_v37 = vor.u32 %v1233_v35, %v1141_v34  ;;  %v1143_v38 = vld [vmem:[%s1650_s0 + $0xe0] sm:$0xf0]  ;;  %v1085_v39 = vld [vmem:[%s1650_s0 + $0x28] sm:$0xf]  ;;  %v188_v56 = vunpack.c.h.b16 %v58_v53 }
  0x13   :  { %1175 = vmatmul.msk.bf16.vlgmr.msra.gmra.mxu2 %vm269_vm1, %v1324_v46  ;;  %1177 = vmatmul.msk.bf16.vlgmr.msra.gmra.mxu3 %vm269_vm1, %v1324_v46  ;;  %v1218_v40 = vld [vmem:[%s1650_s0 + $0x64] sm:$0xf0]  ;;  %v1146_v41 = vor.u32 %v1225_v36, %v1143_v38  ;;  %v1210_v43 = vld [vmem:[%s1650_s0 + $0x2c] sm:$0xf]  ;;  %v1077_v45 = vld [vmem:[%s1650_s0 + $0x20] sm:$0xf] }
  0x14   :  { %444 = vmatpush.bf16.msrb.mxu2 %v296_v51  ;;  %463 = vmatpush.bf16.msrb.mxu3 %v299_v52  ;;  %v1086_v42 = vor.u32 %v1218_v40, %v1085_v39  ;;  %v1087_v44 = vld [vmem:[%s1650_s0 + $0x68] sm:$0xf0]  ;;  %v1217_v48 = vld [vmem:[%s1650_s0 + $0x5c] sm:$0xf0]  ;;  %v1209_v49 = vld [vmem:[%s1650_s0 + $0x24] sm:$0xf] }
  0x15   :  { %406 = vmatpush.bf16.msrb.mxu0 %v290_v59  ;;  %425 = vmatpush.bf16.msrb.mxu1 %v293_v60  ;;  %v1090_v47 = vor.u32 %v1210_v43, %v1087_v44  ;;  %v1079_v50 = vld [vmem:[%s1650_s0 + $0x60] sm:$0xf0]  ;;  %v1078_v51 = vor.u32 %v1217_v48, %v1077_v45  ;;  %v57_v54 = vld [vmem:[%s1650_s0 + $0x130] sm:$0xff]  ;;  %v1165_v59 = vld [vmem:[%s1650_s0 + $0xb8] sm:$0xf]  ;;  %v235_v60 = vpack.c.b16 %v187_v55, %v187_v55 }
  0x16   :  { %v1082_v52 = vor.u32 %v1209_v49, %v1079_v50  ;;  %v185_v57 = vunpack.c.l.b16 %v57_v54  ;;  %v186_v58 = vunpack.c.h.b16 %v57_v54  ;;  %v1236_v0 = vld [vmem:[%s1650_s0 + $0xf4] sm:$0xf0]  ;;  %v1228_v1 = vld [vmem:[%s1650_s0 + $0xbc] sm:$0xf]  ;;  %v1157_v9 = vld [vmem:[%s1650_s0 + $0xb0] sm:$0xf] }
  0x17   :  { %v1167_v2 = vld [vmem:[%s1650_s0 + $0xf8] sm:$0xf0]  ;;  %v1166_v7 = vor.u32 %v1236_v0, %v1165_v59  ;;  %v1235_v10 = vld [vmem:[%s1650_s0 + $0xec] sm:$0xf0]  ;;  %v1227_v11 = vld [vmem:[%s1650_s0 + $0xb4] sm:$0xf] }
  0x18   :  { %445 = vmatpush.bf16.msrb.mxu2 %v1134_v61  ;;  %464 = vmatpush.bf16.msrb.mxu3 %v1138_v62  ;;  %v236_v61 = vpack.c.b16 %v188_v56, %v188_v56  ;;  %v233_v62 = vpack.c.b16 %v185_v57, %v185_v57  ;;  %v234_v63 = vpack.c.b16 %v186_v58, %v186_v58  ;;  %v1101_v14 = vld [vmem:[%s1650_s0 + $0x38] sm:$0xf]  ;;  %v1212_v18 = vld [vmem:[%s1650_s0 + $0x3c] sm:$0xf]  ;;  %v1093_v20 = vld [vmem:[%s1650_s0 + $0x30] sm:$0xf] }
  0x19   :  { %407 = vmatpush.bf16.msrb.mxu0 %v1126_v3  ;;  %426 = vmatpush.bf16.msrb.mxu1 %v1130_v4  ;;  %v320_v3 = vsel %vm276_vm0, %v235_v60, 0  ;;  %v1170_v8 = vor.u32 %v1228_v1, %v1167_v2  ;;  %v1220_v15 = vld [vmem:[%s1650_s0 + $0x74] sm:$0xf0]  ;;  %v1103_v19 = vld [vmem:[%s1650_s0 + $0x78] sm:$0xf0] }
  0x1a   :  { %v323_v4 = vsel %vm276_vm0, %v236_v61, 0  ;;  %v314_v5 = vsel %vm276_vm0, %v233_v62, 0  ;;  %v317_v6 = vsel %vm276_vm0, %v234_v63, 0  ;;  %v1102_v17 = vor.u32 %v1220_v15, %v1101_v14  ;;  %v1219_v22 = vld [vmem:[%s1650_s0 + $0x6c] sm:$0xf0] }
  0x1b   :  { %v1106_v21 = vor.u32 %v1212_v18, %v1103_v19  ;;  %v1211_v23 = vld [vmem:[%s1650_s0 + $0x34] sm:$0xf] }
  0x1c   :  { %446 = vmatpush.bf16.msrb.mxu2 %v1070_v12  ;;  %465 = vmatpush.bf16.msrb.mxu3 %v1074_v13  ;;  %v1158_v12 = vor.u32 %v1235_v10, %v1157_v9  ;;  %v1159_v13 = vld [vmem:[%s1650_s0 + $0xf0] sm:$0xf0] }
  0x1d   :  { %408 = vmatpush.bf16.msrb.mxu0 %v1062_v25  ;;  %427 = vmatpush.bf16.msrb.mxu1 %v1066_v26  ;;  %v1162_v16 = vor.u32 %v1227_v11, %v1159_v13  ;;  %v1095_v24 = vld [vmem:[%s1650_s0 + $0x70] sm:$0xf0]  ;;  %v1094_v25 = vor.u32 %v1219_v22, %v1093_v20  ;;  %v693_v11 = vld [vmem:[%s1652_s2] sm:$0xff] }
  0x1e   :  { %v1098_v26 = vor.u32 %v1211_v23, %v1095_v24  ;;  %v695_v23 = vld [vmem:[%s1652_s2 + $0x10] sm:$0xff]  ;;  %v696_v24 = vld [vmem:[%s1652_s2 + $0x18] sm:$0xff] }
  0x20   :  { %520 = vmatpush.bf16.msra.mxu2 %v308_v27  ;;  %539 = vmatpush.bf16.msra.mxu3 %v311_v28 }
  0x21   :  { %482 = vmatpush.bf16.msra.mxu0 %v302_v29  ;;  %501 = vmatpush.bf16.msra.mxu1 %v305_v30 }
  0x22   :  { %1172 = vmatmul.msk.bf16.gmra.mxu0 %vm269_vm1, %v1411_v33  ;;  %1174 = vmatmul.msk.bf16.gmra.mxu1 %vm269_vm1, %v1411_v33 }
  0x23   :  { %1176 = vmatmul.msk.bf16.gmra.mxu2 %vm269_vm1, %v1411_v33  ;;  %1178 = vmatmul.msk.bf16.gmra.mxu3 %vm269_vm1, %v1411_v33 }
  0x24   :  { %521 = vmatpush.bf16.msra.mxu2 %v1150_v31  ;;  %540 = vmatpush.bf16.msra.mxu3 %v1154_v32 }
  0x25   :  { %483 = vmatpush.bf16.msra.mxu0 %v1142_v37  ;;  %502 = vmatpush.bf16.msra.mxu1 %v1146_v41 }
  0x28   :  { %522 = vmatpush.bf16.msra.mxu2 %v1086_v42  ;;  %541 = vmatpush.bf16.msra.mxu3 %v1090_v47 }
  0x29   :  { %484 = vmatpush.bf16.msra.mxu0 %v1078_v51  ;;  %503 = vmatpush.bf16.msra.mxu1 %v1082_v52 }
  0x32   :  { %1179 = vmatmul.msk.bf16.vlgmr.msrb.gmra.mxu0 %vm269_vm1, %v1324_v46  ;;  %1181 = vmatmul.msk.bf16.vlgmr.msrb.gmra.mxu1 %vm269_vm1, %v1324_v46 }
  0x33   :  { %1183 = vmatmul.msk.bf16.vlgmr.msrb.gmra.mxu2 %vm269_vm1, %v1324_v46  ;;  %1185 = vmatmul.msk.bf16.vlgmr.msrb.gmra.mxu3 %vm269_vm1, %v1324_v46 }
  0x34   :  { %596 = vmatpush.bf16.msrb.mxu2 %v320_v3  ;;  %615 = vmatpush.bf16.msrb.mxu3 %v323_v4 }
  0x35   :  { %558 = vmatpush.bf16.msrb.mxu0 %v314_v5  ;;  %577 = vmatpush.bf16.msrb.mxu1 %v317_v6 }
  0x38   :  { %597 = vmatpush.bf16.msrb.mxu2 %v1166_v7  ;;  %616 = vmatpush.bf16.msrb.mxu3 %v1170_v8 }
  0x39   :  { %559 = vmatpush.bf16.msrb.mxu0 %v1158_v12  ;;  %578 = vmatpush.bf16.msrb.mxu1 %v1162_v16  ;;  %v694_v12 = vld [vmem:[%s1652_s2 + $0x8] sm:$0xff] }
  0x3c   :  { %598 = vmatpush.bf16.msrb.mxu2 %v1102_v17  ;;  %617 = vmatpush.bf16.msrb.mxu3 %v1106_v21 }
  0x3d   :  { %560 = vmatpush.bf16.msrb.mxu0 %v1094_v25  ;;  %579 = vmatpush.bf16.msrb.mxu1 %v1098_v26 }
  0x42   :  { %1180 = vmatmul.msk.bf16.gmra.mxu0 %vm269_vm1, %v1411_v33  ;;  %1182 = vmatmul.msk.bf16.gmra.mxu1 %vm269_vm1, %v1411_v33 }
  0x43   :  { %1184 = vmatmul.msk.bf16.gmra.mxu2 %vm269_vm1, %v1411_v33  ;;  %1186 = vmatmul.msk.bf16.gmra.mxu3 %vm269_vm1, %v1411_v33 }
  0x52   :  { %1187 = vmatmul.msk.bf16.vlgmr.msra.gmra.mxu0 %vm269_vm1, %v1324_v46  ;;  %1189 = vmatmul.msk.bf16.vlgmr.msra.gmra.mxu1 %vm269_vm1, %v1324_v46 }
  0x53   :  { %1191 = vmatmul.msk.bf16.vlgmr.msra.gmra.mxu2 %vm269_vm1, %v1324_v46  ;;  %1193 = vmatmul.msk.bf16.vlgmr.msra.gmra.mxu3 %vm269_vm1, %v1324_v46 }
  0x62   :  { %1188 = vmatmul.msk.bf16.gmra.mxu0 %vm269_vm1, %v1411_v33  ;;  %1190 = vmatmul.msk.bf16.gmra.mxu1 %vm269_vm1, %v1411_v33 }
  0x63   :  { %1192 = vmatmul.msk.bf16.gmra.mxu2 %vm269_vm1, %v1411_v33  ;;  %1194 = vmatmul.msk.bf16.gmra.mxu3 %vm269_vm1, %v1411_v33 }
  0x72   :  { %1195 = vmatmul.msk.bf16.vlgmr.msrb.gmra.mxu0 %vm269_vm1, %v1324_v46  ;;  %1197 = vmatmul.msk.bf16.vlgmr.msrb.gmra.mxu1 %vm269_vm1, %v1324_v46 }
  0x73   :  { %1199 = vmatmul.msk.bf16.vlgmr.msrb.gmra.mxu2 %vm269_vm1, %v1324_v46  ;;  %1201 = vmatmul.msk.bf16.vlgmr.msrb.gmra.mxu3 %vm269_vm1, %v1324_v46 }
  0x82   :  { %1196 = vmatmul.msk.bf16.gmra.mxu0 %vm269_vm1, %v1411_v33  ;;  %1198 = vmatmul.msk.bf16.gmra.mxu1 %vm269_vm1, %v1411_v33 }
  0x83   :  { %1200 = vmatmul.msk.bf16.gmra.mxu2 %vm269_vm1, %v1411_v33  ;;  %1202 = vmatmul.msk.bf16.gmra.mxu3 %vm269_vm1, %v1411_v33 }
  0x8f   :  { %v334_v27 = vpop.f32.mrf.mxu0  ;;  %v353_v28 = vpop.f32.mrf.mxu1 }
  0x90   :  { %v629_v55 = vmax.f32 %v334_v27, 0.0  ;;  %v630_v56 = vmax.f32 %v353_v28, 0.0 }
  0x96   :  { %v372_v29 = vpop.f32.mrf.mxu2  ;;  %v391_v30 = vpop.f32.mrf.mxu3 }
  0x97   :  { %v336_v31 = vpop.f32.mrf.mxu0  ;;  %v355_v32 = vpop.f32.mrf.mxu1  ;;  %v631_v63 = vmax.f32 %v372_v29, 0.0  ;;  %v632_v0 = vmax.f32 %v391_v30, 0.0 }
  0x98   :  { %v645_v51 = vmax.f32 %v336_v31, 0.0  ;;  %v646_v52 = vmax.f32 %v355_v32, 0.0 }
  0x9e   :  { %v374_v34 = vpop.f32.mrf.mxu2  ;;  %v393_v46 = vpop.f32.mrf.mxu3 }
  0x9f   :  { %v339_v35 = vpop.f32.mrf.mxu0  ;;  %v358_v36 = vpop.f32.mrf.mxu1  ;;  %v647_v59 = vmax.f32 %v374_v34, 0.0  ;;  %v648_v60 = vmax.f32 %v393_v46, 0.0 }
  0xa0   :  { %v661_v43 = vmax.f32 %v339_v35, 0.0  ;;  %v662_v33 = vmax.f32 %v358_v36, 0.0 }
  0xa6   :  { %v377_v37 = vpop.f32.mrf.mxu2  ;;  %v396_v38 = vpop.f32.mrf.mxu3 }
  0xa7   :  { %v341_v39 = vpop.f32.mrf.mxu0  ;;  %v360_v40 = vpop.f32.mrf.mxu1  ;;  %v663_v53 = vmax.f32 %v377_v37, 0.0  ;;  %v664_v54 = vmax.f32 %v396_v38, 0.0 }
  0xa8   :  { %v677_v41 = vmax.f32 %v341_v39, 0.0  ;;  %v678_v42 = vmax.f32 %v360_v40, 0.0 }
  0xaa   :  { %721 = vmatpush.xpose.msra.mxu0 %v677_v41  ;;  %741 = vmatpush.xpose.msra.mxu1 %v678_v42 }
  0xae   :  { %v379_v44 = vpop.f32.mrf.mxu2  ;;  %v398_v45 = vpop.f32.mrf.mxu3  ;;  %722 = vmatpush.xpose.msra.mxu0 %v661_v43  ;;  %742 = vmatpush.xpose.msra.mxu1 %v662_v33 }
  0xaf   :  { %v679_v47 = vmax.f32 %v379_v44, 0.0  ;;  %v680_v48 = vmax.f32 %v398_v45, 0.0  ;;  %v1563_v49 = vpop.f32.mrf.mxu0  ;;  %v1565_v50 = vpop.f32.mrf.mxu1 }
  0xb0   :  { %v633_v27 = vmax.f32 %v1563_v49, 0.0  ;;  %v634_v28 = vmax.f32 %v1565_v50, 0.0  ;;  %v698_v49 = vld [vmem:[%s1652_s2 + $0x28] sm:$0xff]  ;;  %v700_v50 = vld [vmem:[%s1652_s2 + $0x38] sm:$0xff] }
  0xb1   :  { %761 = vmatpush.xpose.msra.mxu2 %v679_v47  ;;  %781 = vmatpush.xpose.msra.mxu3 %v680_v48  ;;  %v699_v47 = vld [vmem:[%s1652_s2 + $0x30] sm:$0xff]  ;;  %v697_v48 = vld [vmem:[%s1652_s2 + $0x20] sm:$0xff] }
  0xb2   :  { %723 = vmatpush.xpose.msra.mxu0 %v645_v51  ;;  %743 = vmatpush.xpose.msra.mxu1 %v646_v52 }
  0xb5   :  { %762 = vmatpush.xpose.msra.mxu2 %v663_v53  ;;  %782 = vmatpush.xpose.msra.mxu3 %v664_v54 }
  0xb6   :  { %v1567_v57 = vpop.f32.mrf.mxu2  ;;  %v1569_v58 = vpop.f32.mrf.mxu3  ;;  %724 = vmatpush.xpose.msra.mxu0 %v629_v55  ;;  %744 = vmatpush.xpose.msra.mxu1 %v630_v56 }
  0xb7   :  { %v412_v61 = vpop.f32.mrf.mxu0  ;;  %v431_v62 = vpop.f32.mrf.mxu1  ;;  %v635_v35 = vmax.f32 %v1567_v57, 0.0  ;;  %v636_v36 = vmax.f32 %v1569_v58, 0.0 }
  0xb8   :  { %v649_v21 = vmax.f32 %v412_v61, 0.0  ;;  %v650_v22 = vmax.f32 %v431_v62, 0.0 }
  0xb9   :  { %763 = vmatpush.xpose.msra.mxu2 %v647_v59  ;;  %783 = vmatpush.xpose.msra.mxu3 %v648_v60 }
  0xba   :  { %725 = vmatmul.f32.vlgmr.msra.gmra.mxu0 %v693_v11  ;;  %745 = vmatmul.f32.vlgmr.msra.gmra.mxu1 %v694_v12  ;;  %v703_v11 = vld [vmem:[%s1652_s2 + $0x50] sm:$0xff]  ;;  %v704_v12 = vld [vmem:[%s1652_s2 + $0x58] sm:$0xff] }
  0xbd   :  { %764 = vmatpush.xpose.msra.mxu2 %v631_v63  ;;  %784 = vmatpush.xpose.msra.mxu3 %v632_v0 }
  0xbe   :  { %v450_v1 = vpop.f32.mrf.mxu2  ;;  %v469_v2 = vpop.f32.mrf.mxu3 }
  0xbf   :  { %v415_v3 = vpop.f32.mrf.mxu0  ;;  %v434_v4 = vpop.f32.mrf.mxu1  ;;  %v651_v31 = vmax.f32 %v450_v1, 0.0  ;;  %v652_v32 = vmax.f32 %v469_v2, 0.0 }
  0xc0   :  { %v665_v13 = vmax.f32 %v415_v3, 0.0  ;;  %v666_v14 = vmax.f32 %v434_v4, 0.0  ;;  %765 = vmatmul.f32.vlgmr.msra.gmra.mxu2 %v695_v23  ;;  %785 = vmatmul.f32.vlgmr.msra.gmra.mxu3 %v696_v24 }
  0xc6   :  { %v453_v5 = vpop.f32.mrf.mxu2  ;;  %v472_v6 = vpop.f32.mrf.mxu3 }
  0xc7   :  { %v417_v7 = vpop.f32.mrf.mxu0  ;;  %v436_v8 = vpop.f32.mrf.mxu1  ;;  %v667_v25 = vmax.f32 %v453_v5, 0.0  ;;  %v668_v26 = vmax.f32 %v472_v6, 0.0 }
  0xc8   :  { %v681_v9 = vmax.f32 %v417_v7, 0.0  ;;  %v682_v10 = vmax.f32 %v436_v8, 0.0  ;;  %v701_v7 = vld [vmem:[%s1652_s2 + $0x40] sm:$0xff]  ;;  %v702_v8 = vld [vmem:[%s1652_s2 + $0x48] sm:$0xff] }
  0xca   :  { %801 = vmatpush.xpose.msrb.mxu0 %v681_v9  ;;  %821 = vmatpush.xpose.msrb.mxu1 %v682_v10 }
  0xce   :  { %v455_v15 = vpop.f32.mrf.mxu2  ;;  %v474_v16 = vpop.f32.mrf.mxu3  ;;  %802 = vmatpush.xpose.msrb.mxu0 %v665_v13  ;;  %822 = vmatpush.xpose.msrb.mxu1 %v666_v14 }
  0xcf   :  { %v683_v17 = vmax.f32 %v455_v15, 0.0  ;;  %v684_v18 = vmax.f32 %v474_v16, 0.0  ;;  %v1577_v19 = vpop.f32.mrf.mxu0  ;;  %v1579_v20 = vpop.f32.mrf.mxu1 }
  0xd0   :  { %v637_v63 = vmax.f32 %v1577_v19, 0.0  ;;  %v638_v0 = vmax.f32 %v1579_v20, 0.0 }
  0xd1   :  { %841 = vmatpush.xpose.msrb.mxu2 %v683_v17  ;;  %861 = vmatpush.xpose.msrb.mxu3 %v684_v18 }
  0xd2   :  { %803 = vmatpush.xpose.msrb.mxu0 %v649_v21  ;;  %823 = vmatpush.xpose.msrb.mxu1 %v650_v22 }
  0xd5   :  { %842 = vmatpush.xpose.msrb.mxu2 %v667_v25  ;;  %862 = vmatpush.xpose.msrb.mxu3 %v668_v26 }
  0xd6   :  { %v1589_v29 = vpop.f32.mrf.mxu2  ;;  %v1591_v30 = vpop.f32.mrf.mxu3  ;;  %804 = vmatpush.xpose.msrb.mxu0 %v633_v27  ;;  %824 = vmatpush.xpose.msrb.mxu1 %v634_v28 }
  0xd7   :  { %v488_v34 = vpop.f32.mrf.mxu0  ;;  %v507_v46 = vpop.f32.mrf.mxu1  ;;  %v639_v9 = vmax.f32 %v1589_v29, 0.0  ;;  %v640_v10 = vmax.f32 %v1591_v30, 0.0 }
  0xd8   :  { %v653_v59 = vmax.f32 %v488_v34, 0.0  ;;  %v654_v60 = vmax.f32 %v507_v46, 0.0 }
  0xd9   :  { %843 = vmatpush.xpose.msrb.mxu2 %v651_v31  ;;  %863 = vmatpush.xpose.msrb.mxu3 %v652_v32 }
  0xda   :  { %805 = vmatmul.f32.vlgmr.msrb.gmra.mxu0 %v697_v48  ;;  %825 = vmatmul.f32.vlgmr.msrb.gmra.mxu1 %v698_v49 }
  0xdd   :  { %844 = vmatpush.xpose.msrb.mxu2 %v635_v35  ;;  %864 = vmatpush.xpose.msrb.mxu3 %v636_v36 }
  0xde   :  { %v526_v37 = vpop.f32.mrf.mxu2  ;;  %v545_v38 = vpop.f32.mrf.mxu3 }
  0xdf   :  { %v491_v39 = vpop.f32.mrf.mxu0  ;;  %v510_v40 = vpop.f32.mrf.mxu1  ;;  %v655_v3 = vmax.f32 %v526_v37, 0.0  ;;  %v656_v4 = vmax.f32 %v545_v38, 0.0  ;;  %v705_v37 = vld [vmem:[%s1652_s2 + $0x60] sm:$0xff]  ;;  %v706_v38 = vld [vmem:[%s1652_s2 + $0x68] sm:$0xff] }
  0xe0   :  { %845 = vmatmul.f32.vlgmr.msrb.gmra.mxu2 %v699_v47  ;;  %865 = vmatmul.f32.vlgmr.msrb.gmra.mxu3 %v700_v50  ;;  %v669_v51 = vmax.f32 %v491_v39, 0.0  ;;  %v670_v52 = vmax.f32 %v510_v40, 0.0 }
  0xe6   :  { %v529_v41 = vpop.f32.mrf.mxu2  ;;  %v548_v42 = vpop.f32.mrf.mxu3 }
  0xe7   :  { %v493_v43 = vpop.f32.mrf.mxu0  ;;  %v512_v33 = vpop.f32.mrf.mxu1  ;;  %v671_v61 = vmax.f32 %v529_v41, 0.0  ;;  %v672_v62 = vmax.f32 %v548_v42, 0.0  ;;  %v707_v41 = vld [vmem:[%s1652_s2 + $0x70] sm:$0xff]  ;;  %v708_v42 = vld [vmem:[%s1652_s2 + $0x78] sm:$0xff] }
  0xe8   :  { %v685_v44 = vmax.f32 %v493_v43, 0.0  ;;  %v686_v45 = vmax.f32 %v512_v33, 0.0 }
  0xea   :  { %881 = vmatpush.xpose.msra.mxu0 %v685_v44  ;;  %901 = vmatpush.xpose.msra.mxu1 %v686_v45 }
  0xee   :  { %v531_v53 = vpop.f32.mrf.mxu2  ;;  %v550_v54 = vpop.f32.mrf.mxu3  ;;  %882 = vmatpush.xpose.msra.mxu0 %v669_v51  ;;  %902 = vmatpush.xpose.msra.mxu1 %v670_v52 }
  0xef   :  { %v687_v55 = vmax.f32 %v531_v53, 0.0  ;;  %v688_v56 = vmax.f32 %v550_v54, 0.0  ;;  %v1607_v57 = vpop.f32.mrf.mxu0  ;;  %v1609_v58 = vpop.f32.mrf.mxu1 }
  0xf0   :  { %v641_v34 = vmax.f32 %v1607_v57, 0.0  ;;  %v642_v46 = vmax.f32 %v1609_v58, 0.0 }
  0xf1   :  { %921 = vmatpush.xpose.msra.mxu2 %v687_v55  ;;  %941 = vmatpush.xpose.msra.mxu3 %v688_v56 }
  0xf2   :  { %883 = vmatpush.xpose.msra.mxu0 %v653_v59  ;;  %903 = vmatpush.xpose.msra.mxu1 %v654_v60 }
  0xf5   :  { %922 = vmatpush.xpose.msra.mxu2 %v671_v61  ;;  %942 = vmatpush.xpose.msra.mxu3 %v672_v62 }
  0xf6   :  { %v1613_v1 = vpop.f32.mrf.mxu2  ;;  %v1615_v2 = vpop.f32.mrf.mxu3  ;;  %884 = vmatpush.xpose.msra.mxu0 %v637_v63  ;;  %904 = vmatpush.xpose.msra.mxu1 %v638_v0 }
  0xf7   :  { %v564_v5 = vpop.f32.mrf.mxu0  ;;  %v583_v6 = vpop.f32.mrf.mxu1  ;;  %v643_v39 = vmax.f32 %v1613_v1, 0.0  ;;  %v644_v40 = vmax.f32 %v1615_v2, 0.0 }
  0xf8   :  { %v657_v29 = vmax.f32 %v564_v5, 0.0  ;;  %v658_v30 = vmax.f32 %v583_v6, 0.0 }
  0xf9   :  { %923 = vmatpush.xpose.msra.mxu2 %v655_v3  ;;  %943 = vmatpush.xpose.msra.mxu3 %v656_v4 }
  0xfa   :  { %885 = vmatmul.f32.vlgmr.msra.gmra.mxu0 %v701_v7  ;;  %905 = vmatmul.f32.vlgmr.msra.gmra.mxu1 %v702_v8 }
  0xfd   :  { %924 = vmatpush.xpose.msra.mxu2 %v639_v9  ;;  %944 = vmatpush.xpose.msra.mxu3 %v640_v10 }
  0xfe   :  { %v602_v13 = vpop.f32.mrf.mxu2  ;;  %v621_v14 = vpop.f32.mrf.mxu3 }
  0xff   :  { %v567_v15 = vpop.f32.mrf.mxu0  ;;  %v586_v16 = vpop.f32.mrf.mxu1  ;;  %v659_v35 = vmax.f32 %v602_v13, 0.0  ;;  %v660_v36 = vmax.f32 %v621_v14, 0.0 }
 0x100   :  { %925 = vmatmul.f32.vlgmr.msra.gmra.mxu2 %v703_v11  ;;  %945 = vmatmul.f32.vlgmr.msra.gmra.mxu3 %v704_v12  ;;  %v673_v23 = vmax.f32 %v567_v15, 0.0  ;;  %v674_v24 = vmax.f32 %v586_v16, 0.0 }
 0x106   :  { %v605_v17 = vpop.f32.mrf.mxu2  ;;  %v624_v18 = vpop.f32.mrf.mxu3 }
 0x107   :  { %v569_v19 = vpop.f32.mrf.mxu0  ;;  %v588_v20 = vpop.f32.mrf.mxu1  ;;  %v675_v31 = vmax.f32 %v605_v17, 0.0  ;;  %v676_v32 = vmax.f32 %v624_v18, 0.0 }
 0x108   :  { %v689_v21 = vmax.f32 %v569_v19, 0.0  ;;  %v690_v22 = vmax.f32 %v588_v20, 0.0 }
 0x10a   :  { %961 = vmatpush.xpose.msrb.mxu0 %v689_v21  ;;  %981 = vmatpush.xpose.msrb.mxu1 %v690_v22 }
 0x10e   :  { %v607_v25 = vpop.f32.mrf.mxu2  ;;  %v626_v26 = vpop.f32.mrf.mxu3  ;;  %962 = vmatpush.xpose.msrb.mxu0 %v673_v23  ;;  %982 = vmatpush.xpose.msrb.mxu1 %v674_v24 }
 0x10f   :  { %v691_v27 = vmax.f32 %v607_v25, 0.0  ;;  %v692_v28 = vmax.f32 %v626_v26, 0.0 }
 0x111   :  { %1001 = vmatpush.xpose.msrb.mxu2 %v691_v27  ;;  %1021 = vmatpush.xpose.msrb.mxu3 %v692_v28 }
 0x112   :  { %963 = vmatpush.xpose.msrb.mxu0 %v657_v29  ;;  %983 = vmatpush.xpose.msrb.mxu1 %v658_v30 }
 0x115   :  { %1002 = vmatpush.xpose.msrb.mxu2 %v675_v31  ;;  %1022 = vmatpush.xpose.msrb.mxu3 %v676_v32 }
 0x116   :  { %964 = vmatpush.xpose.msrb.mxu0 %v641_v34  ;;  %984 = vmatpush.xpose.msrb.mxu1 %v642_v46 }
 0x119   :  { %1003 = vmatpush.xpose.msrb.mxu2 %v659_v35  ;;  %1023 = vmatpush.xpose.msrb.mxu3 %v660_v36 }
 0x11a   :  { %965 = vmatmul.f32.vlgmr.msrb.gmra.mxu0 %v705_v37  ;;  %985 = vmatmul.f32.vlgmr.msrb.gmra.mxu1 %v706_v38 }
 0x11d   :  { %1004 = vmatpush.xpose.msrb.mxu2 %v643_v39  ;;  %1024 = vmatpush.xpose.msrb.mxu3 %v644_v40 }
 0x120   :  { %1005 = vmatmul.f32.vlgmr.msrb.gmra.mxu2 %v707_v41  ;;  %1025 = vmatmul.f32.vlgmr.msrb.gmra.mxu3 %v708_v42 }
 0x137   :  { %v746_v43 = vpop.f32.mrf.mxu1  ;;  %v726_v33 = vpop.f32.mrf.mxu0 }
 0x138   :  { %v747_v44 = vadd.f32 %v746_v43, %v726_v33 }
 0x143   :  { %v766_v45 = vpop.f32.mrf.mxu2  ;;  %v786_v48 = vpop.f32.mrf.mxu3 }
 0x144   :  { %v767_v47 = vadd.f32 %v766_v45, %v747_v44 }
 0x146   :  { %v787_v49 = vadd.f32 %v786_v48, %v767_v47 }
 0x157   :  { %v806_v50 = vpop.f32.mrf.mxu0  ;;  %v826_v52 = vpop.f32.mrf.mxu1 }
 0x158   :  { %v807_v51 = vadd.f32 %v806_v50, %v787_v49 }
 0x15a   :  { %v827_v53 = vadd.f32 %v826_v52, %v807_v51 }
 0x163   :  { %v846_v54 = vpop.f32.mrf.mxu2  ;;  %v866_v56 = vpop.f32.mrf.mxu3 }
 0x164   :  { %v847_v55 = vadd.f32 %v846_v54, %v827_v53 }
 0x166   :  { %v867_v57 = vadd.f32 %v866_v56, %v847_v55 }
 0x177   :  { %v886_v58 = vpop.f32.mrf.mxu0  ;;  %v906_v60 = vpop.f32.mrf.mxu1 }
 0x178   :  { %v887_v59 = vadd.f32 %v886_v58, %v867_v57 }
 0x17a   :  { %v907_v61 = vadd.f32 %v906_v60, %v887_v59 }
 0x183   :  { %v926_v62 = vpop.f32.mrf.mxu2  ;;  %v946_v0 = vpop.f32.mrf.mxu3 }
 0x184   :  { %v927_v63 = vadd.f32 %v926_v62, %v907_v61 }
 0x186   :  { %v947_v1 = vadd.f32 %v946_v0, %v927_v63 }
 0x197   :  { %v966_v2 = vpop.f32.mrf.mxu0  ;;  %v986_v4 = vpop.f32.mrf.mxu1 }
 0x198   :  { %v967_v3 = vadd.f32 %v966_v2, %v947_v1 }
 0x19a   :  { %v987_v5 = vadd.f32 %v986_v4, %v967_v3 }
 0x1a3   :  { %v1006_v6 = vpop.f32.mrf.mxu2  ;;  %v1026_v7 = vpop.f32.mrf.mxu3 }
 0x1a4   :  { %v1007_v8 = vadd.f32 %v1006_v6, %v987_v5 }
 0x1a6   :  { %v1027_v9 = vadd.f32 %v1026_v7, %v1007_v8 }
 0x1a8   :  { %1030 = vst.msk [vmem:[%s1653_s3] sm:$0xff] %vm1029_vm2, %v1027_v9 }

// kernel: _rollout.3
= control target key start
LH: loop header
LB: loop body
LE: loop exit
PB: predicated region body
PF: predicated region fallthrough
CT: control target
= control target key end

     0   :  { %s1256_s24 = smov 32   ;;  %s1976_s0 = inlined_call_operand.vmem [shape: f32[8,32], index: 0, kind: input, shape index: {}]   ;;  %s1977_s1 = inlined_call_operand.vmem [shape: f32[8,128], index: 1, kind: input, shape index: {}]   ;;  %s1978_s2 = inlined_call_operand.vmem [shape: f32[112,128], index: 2, kind: input, shape index: {}]   ;;  %s1979_s3 = inlined_call_operand.vmem [shape: f32[2,32], index: 3, kind: input, shape index: {}]   ;;  %s1980_s4 = inlined_call_operand.vmem [shape: f32[8,128], index: 4, kind: output, shape index: {0}]   ;;  %s1981_s5 = inlined_call_operand.hbm [shape: f32[2,32], index: 5, kind: output, shape index: {1}]  }
   0x1   :  { %v38_v0 = vld [vmem:[%s1979_s3] sm:$0x1]  ;;  %v1296_v1 = vld [vmem:[%s1978_s2 + $0x38] sm:$0xff]  ;;  %v1301_v2 = vld [vmem:[%s1978_s2 + $0x30] sm:$0xff] }
   0x2   :  { %42 = vrot.lane.b32.xlu0 %v38_v0, %s1256_s24  ;;  %59 = vmatpush.msra.mxu0 %v1296_v1  ;;  %v1308_v3 = vld [vmem:[%s1978_s2 + $0x28] sm:$0xff] }
   0x3   :  { %195 = vmatpush.msra.mxu2 %v1296_v1 }
   0x4   :  { %11 = vsyncpa [#allocation3], 0  ;;  %60 = vmatpush.msra.mxu0 %v1301_v2  ;;  %v1315_v4 = vld [vmem:[%s1978_s2 + $0x20] sm:$0xff]  ;;  %v1322_v5 = vld [vmem:[%s1978_s2 + $0x18] sm:$0xff]  ;;  %vm45_vm0 = vcmask 261120   ;;  %vm47_vm1 = vcmask 523264  }
   0x5   :  { %196 = vmatpush.msra.mxu2 %v1301_v2  ;;  %v1329_v6 = vld [vmem:[%s1978_s2 + $0x10] sm:$0xff]  ;;  %v1336_v7 = vld [vmem:[%s1978_s2 + $0x8] sm:$0xff]  ;;  %v1346_v8 = vld [vmem:[%s1978_s2] sm:$0xff]  ;;  %s1257_s17 = smov 64   ;;  %vm123_vm3 = vcmask 1040384   ;;  %s1259_s22 = smov [#allocation2]  }
   0x6   :  { %61 = vmatpush.msra.mxu0 %v1308_v3  ;;  %v39_v9 = vld [vmem:[%s1979_s3 + $0x1] sm:$0x1]  ;;  %v40_v10 = vld [vmem:[%s1976_s0] sm:$0x1]  ;;  %v1399_v36 = vld [vmem:[%s1978_s2 + $0x58] sm:$0xff]  ;;  %s1101_s23 = sshll.u32 %s1259_s22, 4  ;;  %s1102_s23 = int_to_ptr.vmem [resolvable:$true] %s1101_s23 }
   0x7   :  { %197 = vmatpush.msra.mxu2 %v1308_v3  ;;  %77 = vrot.lane.b32.xlu1 %v39_v9, %s1256_s24  ;;  %v1378_v13 = vld [vmem:[%s1978_s2 + $0x60] sm:$0x1]  ;;  %v179_v30 = vld [vmem:[%s1976_s0 + $0x1] sm:$0x1]  ;;  %v1406_v37 = vld [vmem:[%s1978_s2 + $0x50] sm:$0xff]  ;;  %s1103_s27 = sshll.u32 %s1981_s5, 4  ;;  %s1104_s27 = int_to_ptr.hbm [resolvable:$true] %s1103_s27 }
   0x8   :  { %62 = vmatpush.msra.mxu0 %v1315_v4  ;;  %114 = vmatpush.msra.mxu1 %v1399_v36  ;;  %v1411_v38 = vld [vmem:[%s1978_s2 + $0x48] sm:$0xff]  ;;  %v1419_v39 = vld [vmem:[%s1978_s2 + $0x40] sm:$0xff] }
   0x9   :  { %198 = vmatpush.msra.mxu2 %v1315_v4  ;;  %246 = vmatpush.msra.mxu3 %v1399_v36  ;;  %v308_v53 = vld [vmem:[%s1976_s0 + $0x2] sm:$0x1] }
   0xa   :  { %63 = vmatpush.msra.mxu0 %v1322_v5  ;;  %115 = vmatpush.msra.mxu1 %v1406_v37 }
   0xb   :  { %199 = vmatpush.msra.mxu2 %v1322_v5  ;;  %247 = vmatpush.msra.mxu3 %v1406_v37 }
   0xc   :  { %64 = vmatpush.msra.mxu0 %v1329_v6  ;;  %116 = vmatpush.msra.mxu1 %v1411_v38 }
   0xd   :  { %200 = vmatpush.msra.mxu2 %v1329_v6  ;;  %248 = vmatpush.msra.mxu3 %v1411_v38 }
   0xe   :  { %65 = vmatpush.msra.mxu0 %v1336_v7  ;;  %117 = vmatpush.msra.mxu1 %v1419_v39 }
   0xf   :  { %201 = vmatpush.msra.mxu2 %v1336_v7  ;;  %249 = vmatpush.msra.mxu3 %v1419_v39 }
  0x10   :  { %66 = vmatpush.msra.mxu0 %v1346_v8  ;;  %324 = vmatpush.msrb.mxu1 %v1296_v1 }
  0x11   :  { %202 = vmatpush.msra.mxu2 %v1346_v8  ;;  %375 = vmatpush.msrb.mxu3 %v1399_v36 }
  0x12   :  { %453 = vmatpush.msrb.mxu0 %v1296_v1  ;;  %325 = vmatpush.msrb.mxu1 %v1301_v2 }
  0x13   :  { %504 = vmatpush.msrb.mxu2 %v1399_v36  ;;  %376 = vmatpush.msrb.mxu3 %v1406_v37 }
  0x14   :  { %454 = vmatpush.msrb.mxu0 %v1301_v2  ;;  %326 = vmatpush.msrb.mxu1 %v1308_v3 }
  0x15   :  { %505 = vmatpush.msrb.mxu2 %v1406_v37  ;;  %377 = vmatpush.msrb.mxu3 %v1411_v38 }
  0x16   :  { %455 = vmatpush.msrb.mxu0 %v1308_v3  ;;  %327 = vmatpush.msrb.mxu1 %v1315_v4 }
  0x17   :  { %506 = vmatpush.msrb.mxu2 %v1411_v38  ;;  %378 = vmatpush.msrb.mxu3 %v1419_v39 }
  0x18   :  { %456 = vmatpush.msrb.mxu0 %v1315_v4  ;;  %328 = vmatpush.msrb.mxu1 %v1322_v5 }
  0x19   :  { %507 = vmatpush.msrb.mxu2 %v1419_v39 }
  0x1a   :  { %457 = vmatpush.msrb.mxu0 %v1322_v5  ;;  %329 = vmatpush.msrb.mxu1 %v1329_v6 }
  0x1c   :  { %458 = vmatpush.msrb.mxu0 %v1329_v6  ;;  %330 = vmatpush.msrb.mxu1 %v1336_v7 }
  0x1e   :  { %459 = vmatpush.msrb.mxu0 %v1336_v7  ;;  %331 = vmatpush.msrb.mxu1 %v1346_v8 }
  0x20   :  { %460 = vmatpush.msrb.mxu0 %v1346_v8 }
  0x74   :  { %v43_v11 = vpop.permute.xlu0 %42 }
  0x75   :  { %v46_v12 = vsel %vm45_vm0, %v40_v10, %v43_v11 }
  0x76   :  { %1114 = vmatmul.msk.f32.vlgmr.msra.gmra.mxu0 %vm47_vm1, %v46_v12 }
  0x77   :  { %969 = vmatpush.msra.mxu0 %v1296_v1 }
  0x79   :  { %970 = vmatpush.msra.mxu0 %v1301_v2  ;;  %v78_v23 = vpop.permute.xlu1 %77 }
  0x7b   :  { %971 = vmatpush.msra.mxu0 %v1308_v3 }
  0x7d   :  { %972 = vmatpush.msra.mxu0 %v1315_v4 }
  0x7f   :  { %973 = vmatpush.msra.mxu0 %v1322_v5 }
  0x81   :  { %974 = vmatpush.msra.mxu0 %v1329_v6 }
  0x83   :  { %975 = vmatpush.msra.mxu0 %v1336_v7 }
  0x85   :  { %976 = vmatpush.msra.mxu0 %v1346_v8 }
  0xf3   :  { %v68_v14 = vpop.f32.mrf.mxu0 }
  0xf4   :  { %v69_v15 = vadd.f32 %v68_v14, %v1378_v13 }
  0xf6   :  { %1134 = vtanh.f32 %v69_v15  ;;  %v71_v17 = vmul.f32 0.5, %v69_v15 }
  0xf8   :  { %1136 = vtanh.f32 %v71_v17  ;;  %v437_v17 = vld [vmem:[%s1976_s0 + $0x3] sm:$0x1] }
  0xfc   :  { %v1135_v16 = vpop.eup %1134 }
  0xfd   :  { %82 = vrot.lane.b32.xlu0 %v1135_v16, %s1257_s17 }
  0xfe   :  { %v1137_v18 = vpop.eup %1136 }
  0xff   :  { %v73_v19 = vadd.f32 1.0, %v1137_v18 }
 0x101   :  { %v74_v20 = vmul.f32 0.5, %v73_v19 }
 0x103   :  { %v80_v24 = vmul.f32 %v78_v23, %v74_v20 }
 0x16f   :  { %v83_v21 = vpop.permute.xlu0 %82 }
 0x170   :  { %v85_v22 = vmul.f32 %v83_v21, %v74_v20 }
 0x172   :  { %87 = vrot.lane.b32.xlu1 %v85_v22, %s1256_s24 }
 0x1e4   :  { %v88_v25 = vpop.permute.xlu1 %87 }
 0x1e5   :  { %v1383_v26 = vadd.f32 %v88_v25, %v80_v24 }
 0x1e7   :  { %1138 = vtanh.f32 %v1383_v26 }
 0x1ed   :  { %v1139_v27 = vpop.eup %1138 }
 0x1ee   :  { %93 = vrot.lane.b32.xlu2 %v1139_v27, %s1257_s17 }
 0x248   :  { %v94_v28 = vpop.permute.xlu2 %93 }
 0x249   :  { %v96_v29 = vmul.f32 %v94_v28, %v74_v20 }
 0x24b   :  { %180 = vrot.lane.b32.xlu2 %v96_v29, %s1257_s17 }
 0x2a5   :  { %v181_v31 = vpop.permute.xlu2 %180 }
 0x2a6   :  { %v183_v32 = vsel %vm45_vm0, %v179_v30, %v181_v31 }
 0x2a7   :  { %1116 = vmatmul.msk.f32.vlgmr.msra.gmra.mxu2 %vm47_vm1, %v183_v32 }
 0x2a8   :  { %711 = vmatpush.msra.mxu2 %v1296_v1 }
 0x2aa   :  { %712 = vmatpush.msra.mxu2 %v1301_v2 }
 0x2ac   :  { %713 = vmatpush.msra.mxu2 %v1308_v3 }
 0x2ae   :  { %714 = vmatpush.msra.mxu2 %v1315_v4 }
 0x2b0   :  { %715 = vmatpush.msra.mxu2 %v1322_v5 }
 0x2b2   :  { %716 = vmatpush.msra.mxu2 %v1329_v6 }
 0x2b4   :  { %717 = vmatpush.msra.mxu2 %v1336_v7 }
 0x2b6   :  { %718 = vmatpush.msra.mxu2 %v1346_v8 }
 0x32a   :  { %v204_v33 = vpop.f32.mrf.mxu2 }
 0x32b   :  { %v205_v34 = vadd.f32 %v204_v33, %v1378_v13 }
 0x32d   :  { %1140 = vtanh.f32 %v205_v34  ;;  %v207_v40 = vmul.f32 0.5, %v205_v34 }
 0x32f   :  { %1142 = vtanh.f32 %v207_v40 }
 0x333   :  { %v1141_v35 = vpop.eup %1140 }
 0x334   :  { %214 = vrot.lane.b32.xlu0 %v1141_v35, %s1257_s17 }
 0x335   :  { %v1143_v41 = vpop.eup %1142 }
 0x336   :  { %v209_v42 = vadd.f32 1.0, %v1143_v41 }
 0x338   :  { %v210_v43 = vmul.f32 0.5, %v209_v42 }
 0x33a   :  { %v212_v47 = vmul.f32 %v210_v43, %v1383_v26 }
 0x33c   :  { %98 = vrot.lane.b32.xlu0 %v96_v29, %s1256_s24 }
 0x3a6   :  { %v215_v44 = vpop.permute.xlu0 %214 }
 0x3a7   :  { %v217_v45 = vmul.f32 %v215_v44, %v210_v43 }
 0x3a9   :  { %219 = vrot.lane.b32.xlu1 %v217_v45, %s1256_s24 }
 0x3ae   :  { %v99_v46 = vpop.permute.xlu0 %98 }
 0x3af   :  { %1115 = vmatmul.msk.f32.vlgmr.msra.gmra.mxu1 %vm45_vm0, %v99_v46 }
 0x3b0   :  { %633 = vmatpush.msra.mxu1 %v1399_v36 }
 0x3b2   :  { %634 = vmatpush.msra.mxu1 %v1406_v37 }
 0x3b4   :  { %635 = vmatpush.msra.mxu1 %v1411_v38 }
 0x3b6   :  { %636 = vmatpush.msra.mxu1 %v1419_v39 }
 0x41b   :  { %v220_v48 = vpop.permute.xlu1 %219 }
 0x41c   :  { %v222_v49 = vadd.f32 %v220_v48, %v212_v47 }
 0x41e   :  { %1144 = vtanh.f32 %v222_v49 }
 0x424   :  { %v1145_v50 = vpop.eup %1144 }
 0x425   :  { %225 = vrot.lane.b32.xlu2 %v1145_v50, %s1257_s17 }
 0x42c   :  { %v1470_v56 = vpop.f32.mrf.mxu1 }
 0x47f   :  { %v226_v51 = vpop.permute.xlu2 %225 }
 0x480   :  { %v228_v52 = vmul.f32 %v226_v51, %v210_v43 }
 0x482   :  { %309 = vrot.lane.b32.xlu1 %v228_v52, %s1257_s17 }
 0x4f4   :  { %v310_v54 = vpop.permute.xlu1 %309 }
 0x4f5   :  { %v312_v55 = vsel %vm45_vm0, %v308_v53, %v310_v54 }
 0x4f6   :  { %1118 = vmatmul.msk.f32.vlgmr.msrb.gmra.mxu1 %vm47_vm1, %v312_v55 }
 0x4f7   :  { %840 = vmatpush.msrb.mxu1 %v1296_v1 }
 0x4f9   :  { %841 = vmatpush.msrb.mxu1 %v1301_v2 }
 0x4fb   :  { %842 = vmatpush.msrb.mxu1 %v1308_v3 }
 0x4fd   :  { %843 = vmatpush.msrb.mxu1 %v1315_v4 }
 0x4ff   :  { %844 = vmatpush.msrb.mxu1 %v1322_v5 }
 0x501   :  { %845 = vmatpush.msrb.mxu1 %v1329_v6 }
 0x503   :  { %846 = vmatpush.msrb.mxu1 %v1336_v7 }
 0x505   :  { %847 = vmatpush.msrb.mxu1 %v1346_v8 }
 0x573   :  { %v333_v57 = vpop.f32.mrf.mxu1 }
 0x574   :  { %v334_v58 = vadd.f32 %v333_v57, %v1378_v13 }
 0x576   :  { %1146 = vtanh.f32 %v334_v58  ;;  %v336_v60 = vmul.f32 0.5, %v334_v58 }
 0x578   :  { %1148 = vtanh.f32 %v336_v60 }
 0x57c   :  { %v1147_v59 = vpop.eup %1146 }
 0x57d   :  { %343 = vrot.lane.b32.xlu2 %v1147_v59, %s1257_s17 }
 0x57e   :  { %v1149_v61 = vpop.eup %1148 }
 0x57f   :  { %v338_v62 = vadd.f32 1.0, %v1149_v61 }
 0x581   :  { %v339_v63 = vmul.f32 0.5, %v338_v62 }
 0x583   :  { %v341_v10 = vmul.f32 %v339_v63, %v222_v49 }
 0x5d7   :  { %v344_v0 = vpop.permute.xlu2 %343 }
 0x5d8   :  { %v346_v9 = vmul.f32 %v344_v0, %v339_v63 }
 0x5da   :  { %348 = vrot.lane.b32.xlu0 %v346_v9, %s1256_s24 }
 0x64c   :  { %v349_v11 = vpop.permute.xlu0 %348 }
 0x64d   :  { %v351_v12 = vadd.f32 %v349_v11, %v341_v10 }
 0x64f   :  { %1150 = vtanh.f32 %v351_v12 }
 0x655   :  { %v1151_v14 = vpop.eup %1150 }
 0x656   :  { %354 = vrot.lane.b32.xlu1 %v1151_v14, %s1257_s17 }
 0x6c8   :  { %v355_v15 = vpop.permute.xlu1 %354 }
 0x6c9   :  { %v357_v16 = vmul.f32 %v355_v15, %v339_v63 }
 0x6cb   :  { %438 = vrot.lane.b32.xlu2 %v357_v16, %s1257_s17 }
 0x725   :  { %v439_v18 = vpop.permute.xlu2 %438 }
 0x726   :  { %v441_v19 = vsel %vm45_vm0, %v437_v17, %v439_v18 }
 0x727   :  { %1120 = vmatmul.msk.f32.vlgmr.msrb.gmra.mxu0 %vm47_vm1, %v441_v19 }
 0x7a4   :  { %v462_v20 = vpop.f32.mrf.mxu0 }
 0x7a5   :  { %v463_v21 = vadd.f32 %v462_v20, %v1378_v13 }
 0x7a7   :  { %1152 = vtanh.f32 %v463_v21  ;;  %v465_v23 = vmul.f32 0.5, %v463_v21 }
 0x7a9   :  { %1154 = vtanh.f32 %v465_v23 }
 0x7ad   :  { %v1153_v22 = vpop.eup %1152 }
 0x7ae   :  { %472 = vrot.lane.b32.xlu0 %v1153_v22, %s1257_s17 }
 0x7af   :  { %v1155_v24 = vpop.eup %1154 }
 0x7b0   :  { %v467_v25 = vadd.f32 1.0, %v1155_v24 }
 0x7b2   :  { %v468_v26 = vmul.f32 0.5, %v467_v25 }
 0x7b4   :  { %v470_v30 = vmul.f32 %v468_v26, %v351_v12 }
 0x7b6   :  { %230 = vrot.lane.b32.xlu0 %v228_v52, %s1256_s24 }
 0x820   :  { %v473_v27 = vpop.permute.xlu0 %472 }
 0x821   :  { %v475_v28 = vmul.f32 %v473_v27, %v468_v26 }
 0x823   :  { %477 = vrot.lane.b32.xlu1 %v475_v28, %s1256_s24 }
 0x828   :  { %v231_v29 = vpop.permute.xlu0 %230 }
 0x829   :  { %1117 = vmatmul.msk.f32.vlgmr.msra.gmra.mxu3 %vm45_vm0, %v231_v29 }
 0x82a   :  { %582 = vmatpush.msra.mxu3 %v1296_v1 }
 0x82b   :  { %359 = vrot.lane.b32.xlu1 %v357_v16, %s1256_s24  ;;  %v824_v16 = vld [vmem:[%s1976_s0 + $0x6] sm:$0x1] }
 0x82c   :  { %583 = vmatpush.msra.mxu3 %v1301_v2 }
 0x82e   :  { %584 = vmatpush.msra.mxu3 %v1308_v3 }
 0x830   :  { %585 = vmatpush.msra.mxu3 %v1315_v4  ;;  %v566_v4 = vld [vmem:[%s1976_s0 + $0x4] sm:$0x1] }
 0x832   :  { %586 = vmatpush.msra.mxu3 %v1322_v5 }
 0x834   :  { %587 = vmatpush.msra.mxu3 %v1329_v6 }
 0x836   :  { %588 = vmatpush.msra.mxu3 %v1336_v7 }
 0x838   :  { %589 = vmatpush.msra.mxu3 %v1346_v8 }
 0x895   :  { %v478_v31 = vpop.permute.xlu1 %477 }
 0x896   :  { %v480_v32 = vadd.f32 %v478_v31, %v470_v30 }
 0x898   :  { %1156 = vtanh.f32 %v480_v32 }
 0x89d   :  { %v360_v1 = vpop.permute.xlu1 %359 }
 0x89e   :  { %v1157_v33 = vpop.eup %1156  ;;  %1119 = vmatmul.msk.f32.vlgmr.msrb.gmra.mxu3 %vm45_vm0, %v360_v1 }
 0x89f   :  { %483 = vrot.lane.b32.xlu2 %v1157_v33, %s1257_s17  ;;  %762 = vmatpush.msrb.mxu3 %v1399_v36 }
 0x8a1   :  { %763 = vmatpush.msrb.mxu3 %v1406_v37 }
 0x8a3   :  { %764 = vmatpush.msrb.mxu3 %v1411_v38 }
 0x8a5   :  { %765 = vmatpush.msrb.mxu3 %v1419_v39 }
 0x8ac   :  { %v1512_v7 = vpop.f32.mrf.mxu3 }
 0x8f9   :  { %v484_v2 = vpop.permute.xlu2 %483 }
 0x8fa   :  { %v486_v3 = vmul.f32 %v484_v2, %v468_v26  ;;  %v953_v2 = vld [vmem:[%s1976_s0 + $0x7] sm:$0x1] }
 0x8fc   :  { %567 = vrot.lane.b32.xlu2 %v486_v3, %s1257_s17 }
 0x921   :  { %v1514_v8 = vpop.f32.mrf.mxu3 }
 0x956   :  { %v568_v5 = vpop.permute.xlu2 %567 }
 0x957   :  { %v570_v6 = vsel %vm45_vm0, %v566_v4, %v568_v5 }
 0x958   :  { %1122 = vmatmul.msk.f32.vlgmr.msra.gmra.mxu3 %vm47_vm1, %v570_v6 }
 0x959   :  { %891 = vmatpush.msra.mxu3 %v1399_v36 }
 0x95b   :  { %892 = vmatpush.msra.mxu3 %v1406_v37 }
 0x95d   :  { %893 = vmatpush.msra.mxu3 %v1411_v38 }
 0x95f   :  { %894 = vmatpush.msra.mxu3 %v1419_v39 }
 0x9db   :  { %v591_v34 = vpop.f32.mrf.mxu3 }
 0x9dc   :  { %v592_v35 = vadd.f32 %v591_v34, %v1378_v13 }
 0x9de   :  { %1158 = vtanh.f32 %v592_v35  ;;  %v594_v41 = vmul.f32 0.5, %v592_v35  ;;  %v34_v35 = vlaneseq }
 0x9e0   :  { %1160 = vtanh.f32 %v594_v41  ;;  %v1564_v41 = vand.u32 127, %v34_v35 }
 0x9e2   :  { %vm36_vm2 = vcmp.lt.s32.totalorder %v1564_v41, 8  ;;  %vm171_vm10 = vcmp.eq.s32.totalorder %v1564_v41, 8  ;;  %vm174_vm11 = vcmp.eq.s32.totalorder %v1564_v41, 9 }
 0x9e4   :  { %v1159_v40 = vpop.eup %1158 }
 0x9e5   :  { %601 = vrot.lane.b32.xlu0 %v1159_v40, %s1257_s17  ;;  %v1562_v40 = vld [vmem:[%s1978_s2 + $0x68] sm:$0x1] }
 0x9e6   :  { %v1161_v42 = vpop.eup %1160 }
 0x9e7   :  { %v596_v43 = vadd.f32 1.0, %v1161_v42  ;;  %v1568_v42 = vadd.f32 %v1470_v56, %v1562_v40 }
 0x9e9   :  { %v597_v44 = vmul.f32 0.5, %v596_v43 }
 0x9eb   :  { %v599_v48 = vmul.f32 %v597_v44, %v480_v32 }
 0x9ed   :  { %488 = vrot.lane.b32.xlu0 %v486_v3, %s1256_s24 }
 0xa57   :  { %v602_v45 = vpop.permute.xlu0 %601 }
 0xa58   :  { %v604_v46 = vmul.f32 %v602_v45, %v597_v44 }
 0xa5a   :  { %606 = vrot.lane.b32.xlu1 %v604_v46, %s1256_s24 }
 0xa5f   :  { %v489_v47 = vpop.permute.xlu0 %488 }
 0xa60   :  { %1121 = vmatmul.msk.f32.vlgmr.msrb.gmra.mxu2 %vm45_vm0, %v489_v47 }
 0xa61   :  { %1020 = vmatpush.msrb.mxu2 %v1399_v36  ;;  %v695_v36 = vld [vmem:[%s1976_s0 + $0x5] sm:$0x1] }
 0xa63   :  { %1021 = vmatpush.msrb.mxu2 %v1406_v37 }
 0xa65   :  { %1022 = vmatpush.msrb.mxu2 %v1411_v38 }
 0xa67   :  { %1023 = vmatpush.msrb.mxu2 %v1419_v39 }
 0xacc   :  { %v607_v49 = vpop.permute.xlu1 %606 }
 0xacd   :  { %v609_v50 = vadd.f32 %v607_v49, %v599_v48 }
 0xacf   :  { %1162 = vtanh.f32 %v609_v50 }
 0xad5   :  { %v1163_v51 = vpop.eup %1162 }
 0xad6   :  { %612 = vrot.lane.b32.xlu2 %v1163_v51, %s1257_s17 }
 0xae3   :  { %v1532_v39 = vpop.f32.mrf.mxu2 }
 0xb30   :  { %v613_v52 = vpop.permute.xlu2 %612 }
 0xb31   :  { %v615_v53 = vmul.f32 %v613_v52, %v597_v44  ;;  %v1577_v44 = vadd.f32 %v1532_v39, %v1562_v40 }
 0xb33   :  { %696 = vrot.lane.b32.xlu1 %v615_v53, %s1257_s17  ;;  %v512_v45 = vsel %vm36_vm2, %v1577_v44, -1e+30 }
 0xb34   :  { %v513_v56 = vsel %vm123_vm3, %v512_v45, -inf }
 0xba5   :  { %v697_v37 = vpop.permute.xlu1 %696 }
 0xba6   :  { %v699_v38 = vsel %vm45_vm0, %v695_v36, %v697_v37 }
 0xba7   :  { %1124 = vmatmul.msk.f32.vlgmr.msra.gmra.mxu2 %vm47_vm1, %v699_v38  ;;  %v1598_v38 = vadd.f32 %v1512_v7, %v1562_v40 }
 0xba9   :  { %v254_v39 = vsel %vm36_vm2, %v1598_v38, -1e+30 }
 0xc2a   :  { %v720_v54 = vpop.f32.mrf.mxu2 }
 0xc2b   :  { %v721_v55 = vadd.f32 %v720_v54, %v1378_v13  ;;  %v255_v54 = vsel %vm123_vm3, %v254_v39, -inf }
 0xc2d   :  { %1164 = vtanh.f32 %v721_v55  ;;  %v723_v58 = vmul.f32 0.5, %v721_v55 }
 0xc2f   :  { %1166 = vtanh.f32 %v723_v58 }
 0xc33   :  { %v1165_v57 = vpop.eup %1164 }
 0xc34   :  { %730 = vrot.lane.b32.xlu2 %v1165_v57, %s1257_s17 }
 0xc35   :  { %v1167_v59 = vpop.eup %1166 }
 0xc36   :  { %v725_v60 = vadd.f32 1.0, %v1167_v59 }
 0xc38   :  { %v726_v61 = vmul.f32 0.5, %v725_v60 }
 0xc3a   :  { %v728_v9 = vmul.f32 %v726_v61, %v609_v50 }
 0xc3c   :  { %617 = vrot.lane.b32.xlu2 %v615_v53, %s1256_s24 }
 0xc8e   :  { %v731_v62 = vpop.permute.xlu2 %730 }
 0xc8f   :  { %v733_v63 = vmul.f32 %v731_v62, %v726_v61 }
 0xc91   :  { %735 = vrot.lane.b32.xlu0 %v733_v63, %s1256_s24 }
 0xc96   :  { %v618_v0 = vpop.permute.xlu2 %617 }
 0xc97   :  { %1123 = vmatmul.msk.f32.vlgmr.msra.gmra.mxu1 %vm45_vm0, %v618_v0 }
 0xd03   :  { %v736_v10 = vpop.permute.xlu0 %735 }
 0xd04   :  { %v738_v11 = vadd.f32 %v736_v10, %v728_v9 }
 0xd06   :  { %1168 = vtanh.f32 %v738_v11 }
 0xd0c   :  { %v1169_v12 = vpop.eup %1168 }
 0xd0d   :  { %741 = vrot.lane.b32.xlu1 %v1169_v12, %s1257_s17 }
 0xd14   :  { %v638_v19 = vpop.f32.mrf.mxu1 }
 0xd15   :  { %v1584_v46 = vadd.f32 %v638_v19, %v1562_v40 }
 0xd17   :  { %v1589_v47 = vsel %vm36_vm2, %v1584_v46, -1e+30 }
 0xd18   :  { %v642_v48 = vsel %vm123_vm3, %v1589_v47, -inf }
 0xd7f   :  { %v742_v14 = vpop.permute.xlu1 %741 }
 0xd80   :  { %v744_v15 = vmul.f32 %v742_v14, %v726_v61 }
 0xd82   :  { %825 = vrot.lane.b32.xlu0 %v744_v15, %s1257_s17 }
 0xdf4   :  { %v826_v17 = vpop.permute.xlu0 %825 }
 0xdf5   :  { %v828_v18 = vsel %vm45_vm0, %v824_v16, %v826_v17 }
 0xdf6   :  { %1126 = vmatmul.msk.f32.vlgmr.msrb.gmra.mxu1 %vm47_vm1, %v828_v18 }
 0xe73   :  { %v849_v20 = vpop.f32.mrf.mxu1 }
 0xe74   :  { %v850_v21 = vadd.f32 %v849_v20, %v1378_v13 }
 0xe76   :  { %1170 = vtanh.f32 %v850_v21  ;;  %v852_v23 = vmul.f32 0.5, %v850_v21  ;;  %v1636_v21 = vadd.f32 %v1514_v8, %v1562_v40 }
 0xe78   :  { %1172 = vtanh.f32 %v852_v23  ;;  %v383_v23 = vsel %vm36_vm2, %v1636_v21, -1e+30 }
 0xe7c   :  { %v1171_v22 = vpop.eup %1170 }
 0xe7d   :  { %859 = vrot.lane.b32.xlu1 %v1171_v22, %s1257_s17 }
 0xe7e   :  { %v1173_v24 = vpop.eup %1172 }
 0xe7f   :  { %v854_v25 = vadd.f32 1.0, %v1173_v24 }
 0xe81   :  { %v855_v26 = vmul.f32 0.5, %v854_v25 }
 0xe83   :  { %v857_v29 = vmul.f32 %v855_v26, %v738_v11 }
 0xeef   :  { %v860_v27 = vpop.permute.xlu1 %859 }
 0xef0   :  { %v862_v28 = vmul.f32 %v860_v27, %v855_v26 }
 0xef2   :  { %864 = vrot.lane.b32.xlu2 %v862_v28, %s1256_s24 }
 0xf4c   :  { %v865_v30 = vpop.permute.xlu2 %864 }
 0xf4d   :  { %v867_v31 = vadd.f32 %v865_v30, %v857_v29 }
 0xf4f   :  { %1174 = vtanh.f32 %v867_v31 }
 0xf55   :  { %v1175_v32 = vpop.eup %1174 }
 0xf56   :  { %870 = vrot.lane.b32.xlu0 %v1175_v32, %s1257_s17 }
 0xfc8   :  { %v871_v1 = vpop.permute.xlu0 %870 }
 0xfc9   :  { %v873_v33 = vmul.f32 %v871_v1, %v855_v26  ;;  %v384_v26 = vsel %vm123_vm3, %v383_v23, -inf }
 0xfcb   :  { %954 = vrot.lane.b32.xlu1 %v873_v33, %s1257_s17 }
0x103d   :  { %v955_v3 = vpop.permute.xlu1 %954 }
0x103e   :  { %v957_v4 = vsel %vm45_vm0, %v953_v2, %v955_v3 }
0x103f   :  { %1128 = vmatmul.msk.f32.vlgmr.msra.gmra.mxu0 %vm47_vm1, %v957_v4 }
0x10bc   :  { %v978_v5 = vpop.f32.mrf.mxu0 }
0x10bd   :  { %v979_v6 = vadd.f32 %v978_v5, %v1378_v13  ;;  %v122_v13 = vsel %vm36_vm2, %v1568_v42, -1e+30 }
0x10be   :  { %v124_v43 = vsel %vm123_vm3, %v122_v13, -inf }
0x10bf   :  { %1176 = vtanh.f32 %v979_v6  ;;  %v981_v49 = vmul.f32 0.5, %v979_v6 }
0x10c1   :  { %1178 = vtanh.f32 %v981_v49 }
0x10c5   :  { %v1177_v34 = vpop.eup %1176 }
0x10c6   :  { %988 = vrot.lane.b32.xlu2 %v1177_v34, %s1257_s17 }
0x10c7   :  { %v1179_v50 = vpop.eup %1178 }
0x10c8   :  { %v983_v51 = vadd.f32 1.0, %v1179_v50 }
0x10ca   :  { %v984_v52 = vmul.f32 0.5, %v983_v51 }
0x10cc   :  { %v986_v55 = vmul.f32 %v984_v52, %v867_v31 }
0x10ce   :  { %746 = vrot.lane.b32.xlu2 %v744_v15, %s1256_s24 }
0x10f7   :  { %125 = vmax.xlane.f32.xlu2 %v124_v43 }
0x10ff   :  { %514 = vmax.xlane.f32.xlu2 %v513_v56 }
0x1107   :  { %643 = vmax.xlane.f32.xlu2 %v642_v48 }
0x1120   :  { %v989_v53 = vpop.permute.xlu2 %988 }
0x1121   :  { %v991_v36 = vmul.f32 %v989_v53, %v984_v52 }
0x1123   :  { %993 = vrot.lane.b32.xlu0 %v991_v36, %s1256_s24 }
0x1128   :  { %v747_v37 = vpop.permute.xlu2 %746 }
0x1129   :  { %1125 = vmatmul.msk.f32.vlgmr.msrb.gmra.mxu3 %vm45_vm0, %v747_v37 }
0x112b   :  { %875 = vrot.lane.b32.xlu0 %v873_v33, %s1256_s24 }
0x1155   :  { %256 = vmax.xlane.f32.xlu0 %v255_v54 }
0x116a   :  { %v1609_v7 = vpop.xlane.xlu2 %125 }
0x116b   :  { %v127_v61 = vsub.f32 %v122_v13, %v1609_v7 }
0x116d   :  { %v128_v62 = vmul.f32 1.442695, %v127_v61  ;;  %v143_v61 = vld [vmem:[%s1977_s1] sm:$0x1] }
0x1172   :  { %v1612_v63 = vpop.xlane.xlu2 %514 }
0x1173   :  { %v516_v10 = vsub.f32 %v512_v45, %v1612_v63 }
0x1175   :  { %v517_v14 = vmul.f32 1.442695, %v516_v10 }
0x117a   :  { %v1648_v29 = vpop.xlane.xlu2 %643 }
0x117b   :  { %v645_v30 = vsub.f32 %v1589_v47, %v1648_v29 }
0x117d   :  { %v646_v32 = vmul.f32 1.442695, %v645_v30 }
0x1195   :  { %v994_v57 = vpop.permute.xlu0 %993 }
0x1196   :  { %v1604_v58 = vadd.f32 %v994_v57, %v986_v55  ;;  %v138_v55 = vsub.f32 %v1568_v42, %v1609_v7 }
0x1198   :  { %1180 = vtanh.f32 %v1604_v58 }
0x1199   :  { %1182 = vpow2.f32 %v128_v62 }
0x119a   :  { %1184 = vpow2.f32 %v517_v14 }
0x119d   :  { %v876_v59 = vpop.permute.xlu0 %875 }
0x119e   :  { %v1181_v60 = vpop.eup %1180  ;;  %1127 = vmatmul.msk.f32.vlgmr.msra.gmra.mxu3 %vm45_vm0, %v876_v59 }
0x119f   :  { %999 = vrot.lane.b32.xlu1 %v1181_v60, %s1257_s17  ;;  %v1622_v15 = vpop.eup %1182 }
0x11a0   :  { %v130_v16 = vsel %vm123_vm3, %v1622_v15, 0.0  ;;  %v1626_v17 = vpop.eup %1184 }
0x11a1   :  { %v519_v18 = vsel %vm123_vm3, %v1626_v17, 0.0 }
0x11ac   :  { %v767_v0 = vpop.f32.mrf.mxu3 }
0x11ad   :  { %v1615_v9 = vadd.f32 %v767_v0, %v1562_v40 }
0x11af   :  { %v770_v11 = vsel %vm36_vm2, %v1615_v9, -1e+30 }
0x11b0   :  { %v771_v12 = vsel %vm123_vm3, %v770_v11, -inf }
0x11b1   :  { %772 = vmax.xlane.f32.xlu0 %v771_v12 }
0x11b9   :  { %131 = vadd.xlane.f32.xlu0 %v130_v16 }
0x11c1   :  { %520 = vadd.xlane.f32.xlu0 %v519_v18 }
0x11c8   :  { %v1638_v22 = vpop.xlane.xlu0 %256 }
0x11c9   :  { %v258_v25 = vsub.f32 %v254_v39, %v1638_v22 }
0x11cb   :  { %v259_v28 = vmul.f32 1.442695, %v258_v25 }
0x11cd   :  { %1186 = vpow2.f32 %v259_v28 }
0x11ce   :  { %1188 = vpow2.f32 %v646_v32 }
0x11d3   :  { %v1656_v1 = vpop.eup %1186 }
0x11d4   :  { %v261_v33 = vsel %vm123_vm3, %v1656_v1, 0.0  ;;  %v1660_v2 = vpop.eup %1188 }
0x11d5   :  { %v648_v3 = vsel %vm123_vm3, %v1660_v2, 0.0 }
0x1211   :  { %v1000_v19 = vpop.permute.xlu1 %999 }
0x1212   :  { %v1630_v20 = vmul.f32 %v1000_v19, %v984_v52 }
0x1214   :  { %1004 = vrot.lane.b32.xlu1 %v1630_v20, %s1256_s24 }
0x1221   :  { %v896_v24 = vpop.f32.mrf.mxu3 }
0x1222   :  { %v1646_v27 = vadd.f32 %v896_v24, %v1562_v40 }
0x1224   :  { %v899_v8 = vsel %vm36_vm2, %v1646_v27, -1e+30  ;;  %v773_v45 = vpop.xlane.xlu0 %772 }
0x1225   :  { %v900_v31 = vsel %vm123_vm3, %v899_v8, -inf  ;;  %v774_v51 = vsub.f32 %v770_v11, %v773_v45 }
0x1227   :  { %v775_v37 = vmul.f32 1.442695, %v774_v51 }
0x122c   :  { %v1672_v47 = vpop.xlane.xlu0 %131 }
0x123e   :  { %385 = vmax.xlane.f32.xlu1 %v384_v26 }
0x1246   :  { %901 = vmax.xlane.f32.xlu1 %v900_v31  ;;  %v269_v31 = vsub.f32 %v1598_v38, %v1638_v22  ;;  %v274_v38 = vld [vmem:[%s1977_s1 + $0x1] sm:$0x1] }
0x124e   :  { %262 = vadd.xlane.f32.xlu1 %v261_v33 }
0x1256   :  { %649 = vadd.xlane.f32.xlu1 %v648_v3  ;;  %v785_v3 = vsub.f32 %v1615_v9, %v773_v45 }
0x1286   :  { %v1005_v4 = vpop.permute.xlu1 %1004 }
0x1287   :  { %1129 = vmatmul.msk.f32.vlgmr.msrb.gmra.mxu2 %vm45_vm0, %v1005_v4 }
0x12b1   :  { %v386_v5 = vpop.xlane.xlu1 %385 }
0x12b2   :  { %v387_v56 = vsub.f32 %v383_v23, %v386_v5  ;;  %v398_v25 = vsub.f32 %v1636_v21, %v386_v5 }
0x12b4   :  { %v388_v48 = vmul.f32 1.442695, %v387_v56 }
0x12b9   :  { %v1665_v6 = vpop.xlane.xlu1 %901 }
0x12ba   :  { %v903_v34 = vsub.f32 %v899_v8, %v1665_v6 }
0x12bc   :  { %v904_v35 = vmul.f32 1.442695, %v903_v34 }
0x12be   :  { %1190 = vpow2.f32 %v904_v35 }
0x12bf   :  { %1192 = vlog2.f32 %v1672_v47 }
0x12c0   :  { %1194 = vpow2.f32 %v388_v48 }
0x12c1   :  { %1196 = vpow2.f32 %v775_v37  ;;  %v1708_v16 = vpop.xlane.xlu1 %262 }
0x12c4   :  { %v1668_v13 = vpop.eup %1190 }
0x12c5   :  { %v906_v43 = vsel %vm123_vm3, %v1668_v13, 0.0  ;;  %v1193_v36 = vpop.eup %1192 }
0x12c6   :  { %907 = vadd.xlane.f32.xlu0 %v906_v43  ;;  %v1682_v39 = vpop.eup %1194  ;;  %v140_v54 = vmul.f32 0.6931472, %v1193_v36 }
0x12c7   :  { %v1688_v59 = vpop.eup %1196 }
0x12c8   :  { %v141_v57 = vsub.f32 %v138_v55, %v140_v54  ;;  %v777_v62 = vsel %vm123_vm3, %v1688_v59, 0.0 }
0x12c9   :  { %v1742_v37 = vpop.xlane.xlu1 %649 }
0x12ca   :  { %v1692_v60 = vsel %vm36_vm2, %v141_v57, 0.0 }
0x12cb   :  { %v144_v42 = vadd.f32 %v143_v61, %v1692_v60 }
0x12cd   :  { %v145_v7 = vsel %vm36_vm2, %v144_v42, -1e+30 }
0x12ce   :  { %v146_v0 = vsel %vm123_vm3, %v145_v7, -inf }
0x130a   :  { %v1025_v49 = vpop.f32.mrf.mxu2 }
0x130b   :  { %v1676_v50 = vadd.f32 %v1025_v49, %v1562_v40  ;;  %v390_v40 = vsel %vm123_vm3, %v1682_v39, 0.0  ;;  %v1738_v49 = vpop.xlane.xlu0 %520 }
0x130d   :  { %v1028_v52 = vsel %vm36_vm2, %v1676_v50, -1e+30 }
0x130e   :  { %v1029_v53 = vsel %vm123_vm3, %v1028_v52, -inf }
0x130f   :  { %1030 = vmax.xlane.f32.xlu2 %v1029_v53 }
0x1317   :  { %391 = vadd.xlane.f32.xlu2 %v390_v40 }
0x131f   :  { %778 = vadd.xlane.f32.xlu2 %v777_v62 }
0x1327   :  { %147 = vmax.xlane.f32.xlu2 %v146_v0 }
0x1339   :  { %v1740_v51 = vpop.xlane.xlu0 %907 }
0x1382   :  { %v1703_v10 = vpop.xlane.xlu2 %1030 }
0x1383   :  { %v1032_v11 = vsub.f32 %v1028_v52, %v1703_v10 }
0x1385   :  { %v1033_v12 = vmul.f32 1.442695, %v1032_v11  ;;  %v403_v11 = vld [vmem:[%s1977_s1 + $0x2] sm:$0x1] }
0x1387   :  { %1198 = vpow2.f32 %v1033_v12 }
0x138a   :  { %v1706_v14 = vpop.xlane.xlu2 %391 }
0x138b   :  { %1200 = vlog2.f32 %v1706_v14 }
0x138c   :  { %1202 = vlog2.f32 %v1708_v16 }
0x138d   :  { %v1711_v18 = vpop.eup %1198 }
0x138e   :  { %v1035_v19 = vsel %vm123_vm3, %v1711_v18, 0.0 }
0x138f   :  { %1036 = vadd.xlane.f32.xlu1 %v1035_v19  ;;  %v656_v19 = vsub.f32 %v1584_v46, %v1648_v29  ;;  %v1043_v46 = vsub.f32 %v1676_v50, %v1703_v10 }
0x1391   :  { %v1201_v23 = vpop.eup %1200 }
0x1392   :  { %v1716_v24 = vpop.xlane.xlu2 %778  ;;  %v400_v26 = vmul.f32 0.6931472, %v1201_v23  ;;  %v1203_v28 = vpop.eup %1202 }
0x1393   :  { %1204 = vlog2.f32 %v1716_v24  ;;  %v271_v30 = vmul.f32 0.6931472, %v1203_v28 }
0x1394   :  { %v401_v8 = vsub.f32 %v398_v25, %v400_v26  ;;  %1206 = vlog2.f32 %v1742_v37 }
0x1395   :  { %v272_v34 = vsub.f32 %v269_v31, %v271_v30  ;;  %v661_v31 = vld [vmem:[%s1977_s1 + $0x4] sm:$0x1] }
0x1396   :  { %v1752_v0 = vsel %vm36_vm2, %v401_v8, 0.0 }
0x1397   :  { %v1729_v56 = vsel %vm36_vm2, %v272_v34, 0.0  ;;  %v404_v23 = vadd.f32 %v403_v11, %v1752_v0  ;;  %v1048_v34 = vld [vmem:[%s1977_s1 + $0x7] sm:$0x1]  ;;  %v790_v11 = vld [vmem:[%s1977_s1 + $0x5] sm:$0x1] }
0x1398   :  { %v275_v9 = vadd.f32 %v274_v38, %v1729_v56 }
0x1399   :  { %v1205_v32 = vpop.eup %1204  ;;  %v405_v28 = vsel %vm36_vm2, %v404_v23, -1e+30 }
0x139a   :  { %v148_v33 = vpop.xlane.xlu2 %147  ;;  %v787_v4 = vmul.f32 0.6931472, %v1205_v32  ;;  %v276_v45 = vsel %vm36_vm2, %v275_v9, -1e+30  ;;  %v1207_v57 = vpop.eup %1206  ;;  %v406_v29 = vsel %vm123_vm3, %v405_v28, -inf }
0x139b   :  { %vm149_vm4 = vcmp.ge.f32.partialorder %v145_v7, %v148_v33  ;;  %v277_v48 = vsel %vm123_vm3, %v276_v45, -inf  ;;  %v658_v7 = vmul.f32 0.6931472, %v1207_v57 }
0x139c   :  { %v150_v35 = vsel %vm149_vm4, %v1564_v41, 128  ;;  %v1725_v5 = vsub.f32 %v785_v3, %v787_v4 }
0x139d   :  { %v151_v21 = vsel %vm123_vm3, %v150_v35, 2147483647  ;;  %v659_v25 = vsub.f32 %v656_v19, %v658_v7 }
0x139e   :  { %v153_v43 = vshra.s32 %v151_v21, 16  ;;  %v152_v52 = vand.u32 65535, %v151_v21 }
0x139f   :  { %v1764_v8 = vsel %vm36_vm2, %v659_v25, 0.0 }
0x13a0   :  { %v155_v22 = vcvt.s32.f32 %v153_v43  ;;  %v154_v36 = vcvt.s32.f32 %v152_v52  ;;  %v662_v32 = vadd.f32 %v661_v31, %v1764_v8 }
0x13a2   :  { %156 = vmin.xlane.f32.xlu0 %v155_v22  ;;  %v1775_v3 = vsel %vm36_vm2, %v662_v32, -1e+30 }
0x13a3   :  { %v664_v50 = vsel %vm123_vm3, %v1775_v3, -inf }
0x13aa   :  { %278 = vmax.xlane.f32.xlu0 %v277_v48 }
0x1402   :  { %v1745_v40 = vpop.xlane.xlu1 %1036 }
0x1403   :  { %1208 = vlog2.f32 %v1745_v40 }
0x1404   :  { %1210 = vrcp.f32 %v1672_v47 }
0x1405   :  { %1212 = vlog2.f32 %v1738_v49 }
0x1406   :  { %1214 = vlog2.f32 %v1740_v51 }
0x1407   :  { %1216 = vrcp.f32 %v1708_v16 }
0x1408   :  { %1218 = vrcp.f32 %v1706_v14 }
0x1409   :  { %v1209_v26 = vpop.eup %1208  ;;  %1220 = vrcp.f32 %v1738_v49 }
0x140a   :  { %v1045_v30 = vmul.f32 0.6931472, %v1209_v26  ;;  %1222 = vrcp.f32 %v1742_v37 }
0x140b   :  { %1224 = vrcp.f32 %v1716_v24 }
0x140c   :  { %v1046_v33 = vsub.f32 %v1043_v46, %v1045_v30  ;;  %1226 = vrcp.f32 %v1745_v40 }
0x140d   :  { %1228 = vrcp.f32 %v1740_v51 }
0x140e   :  { %v1779_v4 = vsel %vm36_vm2, %v1046_v33, 0.0 }
0x140f   :  { %v1049_v10 = vadd.f32 %v1048_v34, %v1779_v4 }
0x1411   :  { %v1789_v35 = vsel %vm36_vm2, %v1049_v10, -1e+30 }
0x1412   :  { %v1051_v21 = vsel %vm123_vm3, %v1789_v35, -inf }
0x1415   :  { %v157_v53 = vpop.xlane.xlu0 %156 }
0x1416   :  { %vm158_vm5 = vcmp.eq.f32.partialorder %v155_v22, %v157_v53  ;;  %v163_v43 = vcvt.f32.s32 %v157_v53 }
0x1417   :  { %v159_v54 = vsel %vm158_vm5, %v154_v36, inf }
0x1418   :  { %160 = vmin.xlane.f32.xlu1 %v159_v54  ;;  %v164_v22 = vshll.u32 %v163_v43, 16  ;;  %v1258_v54 = vmov 0.0  }
0x1419   :  { %37 = vst [vmem:[%s1980_s4] sm:$0xff] %v1258_v54  ;;  %v532_v54 = vld [vmem:[%s1977_s1 + $0x3] sm:$0x1] }
0x141d   :  { %v279_v55 = vpop.xlane.xlu0 %278 }
0x141e   :  { %vm280_vm6 = vcmp.ge.f32.partialorder %v276_v45, %v279_v55 }
0x141f   :  { %v281_v61 = vsel %vm280_vm6, %v1564_v41, 128 }
0x1420   :  { %v282_v62 = vsel %vm123_vm3, %v281_v61, 2147483647 }
0x1421   :  { %v284_v42 = vshra.s32 %v282_v62, 16  ;;  %v283_v36 = vand.u32 65535, %v282_v62  ;;  %v1804_v62 = vsel %vm36_vm2, %v1725_v5, 0.0  ;;  %v1211_v5 = vpop.eup %1210 }
0x1422   :  { %v134_v26 = vmul.f32 %v1211_v5, %v1672_v47  ;;  %v1213_v33 = vpop.eup %1212 }
0x1423   :  { %v286_v12 = vcvt.s32.f32 %v284_v42  ;;  %v285_v57 = vcvt.s32.f32 %v283_v36  ;;  %v529_v10 = vmul.f32 0.6931472, %v1213_v33 }
0x1425   :  { %287 = vmin.xlane.f32.xlu1 %v286_v12 }
0x142d   :  { %407 = vmax.xlane.f32.xlu1 %v406_v29 }
0x1435   :  { %665 = vmax.xlane.f32.xlu1 %v664_v50 }
0x143d   :  { %1052 = vmax.xlane.f32.xlu1 %v1051_v21 }
0x148b   :  { %v161_v38 = vpop.xlane.xlu1 %160 }
0x148c   :  { %v162_v9 = vcvt.f32.s32 %v161_v38 }
0x148e   :  { %v165_v45 = vadd.s32 %v164_v22, %v162_v9 }
0x1490   :  { %vm166_vm7 = vcmp.eq.s32.totalorder %v1564_v41, %v165_v45  ;;  %v175_v31 = vcvt.s32.f32 %v165_v45  ;;  %v1215_v45 = vpop.eup %1214 }
0x1491   :  { %v167_v48 = vsel %vm166_vm7, %v1692_v60, 0.0 }
0x1492   :  { %v168_v52 = vsel %vm123_vm3, %v167_v48, 0.0  ;;  %v176_v47 = vsel %vm174_vm11, %v175_v31, 0.0 }
0x1493   :  { %169 = vadd.xlane.f32.xlu2 %v168_v52  ;;  %v916_v52 = vmul.f32 0.6931472, %v1215_v45 }
0x1498   :  { %v288_v55 = vpop.xlane.xlu1 %287 }
0x1499   :  { %vm289_vm8 = vcmp.eq.f32.partialorder %v286_v12, %v288_v55  ;;  %v791_v12 = vadd.f32 %v790_v11, %v1804_v62  ;;  %v294_v21 = vcvt.f32.s32 %v288_v55 }
0x149a   :  { %v290_v53 = vsel %vm289_vm8, %v285_v57, inf }
0x149b   :  { %291 = vmin.xlane.f32.xlu2 %v290_v53  ;;  %v1812_v23 = vsel %vm36_vm2, %v791_v12, -1e+30  ;;  %v295_v38 = vshll.u32 %v294_v21, 16 }
0x149c   :  { %v793_v25 = vsel %vm123_vm3, %v1812_v23, -inf }
0x14a0   :  { %v408_v61 = vpop.xlane.xlu1 %407 }
0x14a1   :  { %vm409_vm9 = vcmp.ge.f32.partialorder %v405_v28, %v408_v61  ;;  %v135_v28 = vsub.f32 2.0, %v134_v26  ;;  %v1217_v26 = vpop.eup %1216 }
0x14a2   :  { %v410_v42 = vsel %vm409_vm9, %v1564_v41, 128 }
0x14a3   :  { %v411_v60 = vsel %vm123_vm3, %v410_v42, 2147483647  ;;  %v136_v30 = vmul.f32 %v1211_v5, %v135_v28  ;;  %v265_v28 = vmul.f32 %v1217_v26, %v1708_v16 }
0x14a4   :  { %v413_v7 = vshra.s32 %v411_v60, 16  ;;  %v412_v53 = vand.u32 65535, %v411_v60 }
0x14a5   :  { %v137_v46 = vmul.f32 %v1622_v15, %v136_v30  ;;  %v527_v15 = vsub.f32 %v1577_v44, %v1612_v63  ;;  %v914_v44 = vsub.f32 %v1646_v27, %v1665_v6  ;;  %v919_v27 = vld [vmem:[%s1977_s1 + $0x6] sm:$0x1]  ;;  %v266_v30 = vsub.f32 2.0, %v265_v28 }
0x14a6   :  { %v415_v19 = vcvt.s32.f32 %v413_v7  ;;  %v414_v11 = vcvt.s32.f32 %v412_v53 }
0x14a7   :  { %v530_v9 = vsub.f32 %v527_v15, %v529_v10  ;;  %v917_v61 = vsub.f32 %v914_v44, %v916_v52 }
0x14a8   :  { %416 = vmin.xlane.f32.xlu2 %v415_v19  ;;  %v666_v21 = vpop.xlane.xlu1 %665 }
0x14a9   :  { %v1835_v36 = vsel %vm36_vm2, %v530_v9, 0.0  ;;  %v1849_v12 = vsel %vm36_vm2, %v917_v61, 0.0  ;;  %vm667_vm14 = vcmp.ge.f32.partialorder %v1775_v3, %v666_v21 }
0x14aa   :  { %v533_v57 = vadd.f32 %v532_v54, %v1835_v36  ;;  %v920_v60 = vadd.f32 %v919_v27, %v1849_v12  ;;  %v668_v45 = vsel %vm667_vm14, %v1564_v41, 128 }
0x14ac   :  { %v534_v42 = vsel %vm36_vm2, %v533_v57, -1e+30 }
0x14ad   :  { %v535_v6 = vsel %vm123_vm3, %v534_v42, -inf }
0x14b0   :  { %794 = vmax.xlane.f32.xlu2 %v793_v25  ;;  %v921_v25 = vsel %vm36_vm2, %v920_v60, -1e+30 }
0x14b1   :  { %v922_v5 = vsel %vm123_vm3, %v921_v25, -inf }
0x1506   :  { %v170_v29 = vpop.xlane.xlu2 %169 }
0x1507   :  { %v172_v32 = vsel %vm171_vm10, %v170_v29, 0.0 }
0x1508   :  { %v173_v34 = vadd.f32 %v172_v32, %v137_v46 }
0x150a   :  { %v177_v50 = vadd.f32 %v176_v47, %v173_v34 }
0x150c   :  { %178 = vst [vmem:[%s1980_s4] sm:$0x1] %v177_v50 }
0x150e   :  { %v292_v43 = vpop.xlane.xlu2 %291 }
0x150f   :  { %v293_v22 = vcvt.f32.s32 %v292_v43 }
0x1511   :  { %v296_v48 = vadd.s32 %v295_v38, %v293_v22 }
0x1513   :  { %vm297_vm12 = vcmp.eq.s32.totalorder %v1564_v41, %v296_v48  ;;  %v304_v31 = vcvt.s32.f32 %v296_v48 }
0x1514   :  { %v298_v55 = vsel %vm297_vm12, %v1729_v56, 0.0 }
0x1515   :  { %v299_v63 = vsel %vm123_vm3, %v298_v55, 0.0  ;;  %v305_v47 = vsel %vm174_vm11, %v304_v31, 0.0  ;;  %v669_v55 = vsel %vm123_vm3, %v668_v45, 2147483647 }
0x1516   :  { %300 = vadd.xlane.f32.xlu0 %v299_v63  ;;  %v671_v44 = vshra.s32 %v669_v55, 16 }
0x1518   :  { %v673_v53 = vcvt.s32.f32 %v671_v44 }
0x151b   :  { %v417_v7 = vpop.xlane.xlu2 %416 }
0x151c   :  { %vm418_vm13 = vcmp.eq.f32.partialorder %v415_v19, %v417_v7  ;;  %v267_v19 = vmul.f32 %v1217_v26, %v266_v30  ;;  %v423_v10 = vcvt.f32.s32 %v417_v7 }
0x151d   :  { %v419_v56 = vsel %vm418_vm13, %v414_v11, inf }
0x151e   :  { %536 = vmax.xlane.f32.xlu0 %v535_v6  ;;  %420 = vmin.xlane.f32.xlu2 %v419_v56  ;;  %v268_v29 = vmul.f32 %v1656_v1, %v267_v19  ;;  %v424_v1 = vshll.u32 %v423_v10, 16  ;;  %v1219_v6 = vpop.eup %1218 }
0x151f   :  { %v394_v56 = vmul.f32 %v1219_v6, %v1706_v14 }
0x1521   :  { %v395_v60 = vsub.f32 2.0, %v394_v56 }
0x1523   :  { %v795_v46 = vpop.xlane.xlu2 %794 }
0x1524   :  { %vm796_vm1 = vcmp.ge.f32.partialorder %v1812_v23, %v795_v46 }
0x1525   :  { %v797_v63 = vsel %vm796_vm1, %v1564_v41, 128 }
0x1526   :  { %923 = vmax.xlane.f32.xlu0 %v922_v5  ;;  %v798_v61 = vsel %vm123_vm3, %v797_v63, 2147483647  ;;  %v396_v5 = vmul.f32 %v1219_v6, %v395_v60 }
0x1527   :  { %v799_v21 = vand.u32 65535, %v798_v61 }
0x1528   :  { %v397_v30 = vmul.f32 %v1682_v39, %v396_v5 }
0x1589   :  { %v301_v32 = vpop.xlane.xlu0 %300 }
0x158a   :  { %v302_v33 = vsel %vm171_vm10, %v301_v32, 0.0 }
0x158b   :  { %v303_v34 = vadd.f32 %v302_v33, %v268_v29 }
0x158d   :  { %v306_v50 = vadd.f32 %v305_v47, %v303_v34  ;;  %v670_v47 = vand.u32 65535, %v669_v55 }
0x158f   :  { %307 = vst [vmem:[%s1980_s4 + $0x1] sm:$0x1] %v306_v50  ;;  %v672_v50 = vcvt.s32.f32 %v670_v47 }
0x1591   :  { %v537_v16 = vpop.xlane.xlu0 %536  ;;  %v421_v15 = vpop.xlane.xlu2 %420 }
0x1592   :  { %vm538_vm15 = vcmp.ge.f32.partialorder %v534_v42, %v537_v16  ;;  %v422_v43 = vcvt.f32.s32 %v421_v15  ;;  %v800_v42 = vshra.s32 %v798_v61, 16 }
0x1593   :  { %v539_v38 = vsel %vm538_vm15, %v1564_v41, 128 }
0x1594   :  { %v540_v22 = vsel %vm123_vm3, %v539_v38, 2147483647  ;;  %v425_v9 = vadd.s32 %v424_v1, %v422_v43  ;;  %v802_v7 = vcvt.s32.f32 %v800_v42  ;;  %v801_v1 = vcvt.s32.f32 %v799_v21 }
0x1595   :  { %v542_v48 = vshra.s32 %v540_v22, 16  ;;  %v541_v26 = vand.u32 65535, %v540_v22 }
0x1596   :  { %vm426_vm0 = vcmp.eq.s32.totalorder %v1564_v41, %v425_v9  ;;  %v433_v28 = vcvt.s32.f32 %v425_v9 }
0x1597   :  { %v544_v52 = vcvt.s32.f32 %v542_v48  ;;  %v427_v54 = vsel %vm426_vm0, %v1752_v0, 0.0  ;;  %v543_v46 = vcvt.s32.f32 %v541_v26 }
0x1598   :  { %v428_v3 = vsel %vm123_vm3, %v427_v54, 0.0  ;;  %v434_v34 = vsel %vm174_vm11, %v433_v28, 0.0 }
0x1599   :  { %545 = vmin.xlane.f32.xlu1 %v544_v52  ;;  %429 = vadd.xlane.f32.xlu0 %v428_v3  ;;  %v924_v57 = vpop.xlane.xlu0 %923 }
0x159a   :  { %vm925_vm2 = vcmp.ge.f32.partialorder %v921_v25, %v924_v57  ;;  %v1053_v25 = vpop.xlane.xlu1 %1052 }
0x159b   :  { %v926_v0 = vsel %vm925_vm2, %v1564_v41, 128  ;;  %vm1054_vm6 = vcmp.ge.f32.partialorder %v1789_v35, %v1053_v25 }
0x159c   :  { %v1882_v11 = vsel %vm123_vm3, %v926_v0, 2147483647  ;;  %v1055_v16 = vsel %vm1054_vm6, %v1564_v41, 128 }
0x159d   :  { %v929_v27 = vshra.s32 %v1882_v11, 16  ;;  %v1056_v43 = vsel %vm123_vm3, %v1055_v16, 2147483647 }
0x159e   :  { %v1058_v22 = vshra.s32 %v1056_v43, 16 }
0x159f   :  { %v1885_v23 = vcvt.s32.f32 %v929_v27 }
0x15a0   :  { %v1060_v9 = vcvt.s32.f32 %v1058_v22 }
0x15a1   :  { %674 = vmin.xlane.f32.xlu1 %v673_v53 }
0x15a9   :  { %803 = vmin.xlane.f32.xlu1 %v802_v7 }
0x15b1   :  { %932 = vmin.xlane.f32.xlu1 %v1885_v23 }
0x160c   :  { %v430_v19 = vpop.xlane.xlu0 %429  ;;  %v546_v31 = vpop.xlane.xlu1 %545 }
0x160d   :  { %v431_v29 = vsel %vm171_vm10, %v430_v19, 0.0  ;;  %vm547_vm4 = vcmp.eq.f32.partialorder %v544_v52, %v546_v31  ;;  %v552_v45 = vcvt.f32.s32 %v546_v31 }
0x160e   :  { %v432_v32 = vadd.f32 %v431_v29, %v397_v30  ;;  %v548_v33 = vsel %vm547_vm4, %v543_v46, inf  ;;  %v1221_v29 = vpop.eup %1220 }
0x160f   :  { %549 = vmin.xlane.f32.xlu2 %v548_v33  ;;  %v553_v52 = vshll.u32 %v552_v45, 16  ;;  %v1223_v33 = vpop.eup %1222 }
0x1610   :  { %v435_v14 = vadd.f32 %v434_v34, %v432_v32 }
0x1612   :  { %436 = vst [vmem:[%s1980_s4 + $0x2] sm:$0x1] %v435_v14 }
0x1614   :  { %v675_v39 = vpop.xlane.xlu1 %674 }
0x1615   :  { %vm676_vm5 = vcmp.eq.f32.partialorder %v673_v53, %v675_v39  ;;  %v681_v3 = vcvt.f32.s32 %v675_v39 }
0x1616   :  { %v677_v10 = vsel %vm676_vm5, %v672_v50, inf  ;;  %v1225_v50 = vpop.eup %1224 }
0x1617   :  { %678 = vmin.xlane.f32.xlu2 %v677_v10  ;;  %v682_v57 = vshll.u32 %v681_v3, 16  ;;  %v781_v16 = vmul.f32 %v1225_v50, %v1716_v24 }
0x161c   :  { %v804_v15 = vpop.xlane.xlu1 %803 }
0x161d   :  { %vm805_vm7 = vcmp.eq.f32.partialorder %v802_v7, %v804_v15  ;;  %v810_v42 = vcvt.f32.s32 %v804_v15 }
0x161e   :  { %v806_v38 = vsel %vm805_vm7, %v801_v1, inf }
0x161f   :  { %807 = vmin.xlane.f32.xlu2 %v806_v38  ;;  %v811_v6 = vshll.u32 %v810_v42, 16 }
0x1624   :  { %v933_v30 = vpop.xlane.xlu1 %932 }
0x1625   :  { %vm934_vm14 = vcmp.eq.f32.partialorder %v1885_v23, %v933_v30  ;;  %v939_v42 = vcvt.f32.s32 %v933_v30 }
0x1627   :  { %1061 = vmin.xlane.f32.xlu2 %v1060_v9 }
0x1682   :  { %v550_v48 = vpop.xlane.xlu2 %549 }
0x1683   :  { %v551_v54 = vcvt.f32.s32 %v550_v48 }
0x1685   :  { %v554_v55 = vadd.s32 %v553_v52, %v551_v54 }
0x1687   :  { %vm555_vm8 = vcmp.eq.s32.totalorder %v1564_v41, %v554_v55  ;;  %v562_v14 = vcvt.s32.f32 %v554_v55 }
0x1688   :  { %v556_v35 = vsel %vm555_vm8, %v1835_v36, 0.0  ;;  %v1057_v36 = vand.u32 65535, %v1056_v43  ;;  %v782_v43 = vsub.f32 2.0, %v781_v16 }
0x1689   :  { %v557_v44 = vsel %vm123_vm3, %v556_v35, 0.0 }
0x168a   :  { %558 = vadd.xlane.f32.xlu0 %v557_v44  ;;  %v679_v63 = vpop.xlane.xlu2 %678  ;;  %v1059_v28 = vcvt.s32.f32 %v1057_v36  ;;  %v783_v24 = vmul.f32 %v1225_v50, %v782_v43 }
0x168b   :  { %v680_v53 = vcvt.f32.s32 %v679_v63 }
0x168c   :  { %v784_v55 = vmul.f32 %v1688_v59, %v783_v24  ;;  %v940_v59 = vshll.u32 %v939_v42, 16 }
0x168d   :  { %v683_v61 = vadd.s32 %v682_v57, %v680_v53 }
0x168f   :  { %vm684_vm9 = vcmp.eq.s32.totalorder %v1564_v41, %v683_v61 }
0x1690   :  { %v685_v0 = vsel %vm684_vm9, %v1764_v8, 0.0  ;;  %v928_v8 = vand.u32 65535, %v1882_v11  ;;  %v652_v11 = vmul.f32 %v1223_v33, %v1742_v37  ;;  %v691_v37 = vcvt.s32.f32 %v683_v61 }
0x1691   :  { %v686_v7 = vsel %vm123_vm3, %v685_v0, 0.0 }
0x1692   :  { %687 = vadd.xlane.f32.xlu0 %v686_v7  ;;  %v808_v27 = vpop.xlane.xlu2 %807  ;;  %v930_v31 = vcvt.s32.f32 %v928_v8  ;;  %v653_v47 = vsub.f32 2.0, %v652_v11  ;;  %v692_v45 = vsel %vm174_vm11, %v691_v37, 0.0 }
0x1693   :  { %v809_v56 = vcvt.f32.s32 %v808_v27 }
0x1694   :  { %v935_v46 = vsel %vm934_vm14, %v930_v31, inf  ;;  %v654_v1 = vmul.f32 %v1223_v33, %v653_v47 }
0x1695   :  { %v812_v60 = vadd.s32 %v811_v6, %v809_v56 }
0x1697   :  { %vm813_vm12 = vcmp.eq.s32.totalorder %v1564_v41, %v812_v60  ;;  %v820_v52 = vcvt.s32.f32 %v812_v60 }
0x1698   :  { %v814_v25 = vsel %vm813_vm12, %v1804_v62, 0.0  ;;  %v523_v62 = vmul.f32 %v1221_v29, %v1738_v49  ;;  %v563_v49 = vsel %vm174_vm11, %v562_v14, 0.0 }
0x1699   :  { %v815_v5 = vsel %vm123_vm3, %v814_v25, 0.0  ;;  %v821_v44 = vsel %vm174_vm11, %v820_v52, 0.0 }
0x169a   :  { %816 = vadd.xlane.f32.xlu0 %v815_v5  ;;  %v1062_v26 = vpop.xlane.xlu2 %1061  ;;  %v524_v32 = vsub.f32 2.0, %v523_v62  ;;  %v1083_v5 = vrot.slane %v1604_v58, 7 }
0x169b   :  { %vm1063_vm13 = vcmp.eq.f32.partialorder %v1060_v9, %v1062_v26  ;;  %v1068_v54 = vcvt.f32.s32 %v1062_v26 }
0x169c   :  { %v1064_v19 = vsel %vm1063_vm13, %v1059_v28, inf  ;;  %v525_v34 = vmul.f32 %v1221_v29, %v524_v32 }
0x169d   :  { %1065 = vmin.xlane.f32.xlu2 %v1064_v19  ;;  %v1069_v57 = vshll.u32 %v1068_v54, 16 }
0x169e   :  { %v526_v23 = vmul.f32 %v1626_v17, %v525_v34  ;;  %v655_v17 = vmul.f32 %v1660_v2, %v654_v1 }
0x16a2   :  { %936 = vmin.xlane.f32.xlu0 %v935_v46 }
0x16fd   :  { %v559_v39 = vpop.xlane.xlu0 %558 }
0x16fe   :  { %v560_v10 = vsel %vm171_vm10, %v559_v39, 0.0 }
0x16ff   :  { %v561_v21 = vadd.f32 %v560_v10, %v526_v23 }
0x1701   :  { %v564_v15 = vadd.f32 %v563_v49, %v561_v21 }
0x1703   :  { %565 = vst [vmem:[%s1980_s4 + $0x3] sm:$0x1] %v564_v15 }
0x1705   :  { %v688_v38 = vpop.xlane.xlu0 %687 }
0x1706   :  { %v689_v22 = vsel %vm171_vm10, %v688_v38, 0.0 }
0x1707   :  { %v690_v9 = vadd.f32 %v689_v22, %v655_v17 }
0x1709   :  { %v693_v48 = vadd.f32 %v692_v45, %v690_v9 }
0x170b   :  { %694 = vst [vmem:[%s1980_s4 + $0x4] sm:$0x1] %v693_v48 }
0x170d   :  { %v817_v3 = vpop.xlane.xlu0 %816 }
0x170e   :  { %v818_v2 = vsel %vm171_vm10, %v817_v3, 0.0 }
0x170f   :  { %v819_v35 = vadd.f32 %v818_v2, %v784_v55 }
0x1710   :  { %v1066_v63 = vpop.xlane.xlu2 %1065 }
0x1711   :  { %v822_v53 = vadd.f32 %v821_v44, %v819_v35  ;;  %v1067_v61 = vcvt.f32.s32 %v1066_v63 }
0x1713   :  { %823 = vst [vmem:[%s1980_s4 + $0x5] sm:$0x1] %v822_v53  ;;  %v1070_v0 = vadd.s32 %v1069_v57, %v1067_v61 }
0x1715   :  { %v937_v7 = vpop.xlane.xlu0 %936  ;;  %vm1071_vm15 = vcmp.eq.s32.totalorder %v1564_v41, %v1070_v0  ;;  %v1078_v31 = vcvt.s32.f32 %v1070_v0 }
0x1716   :  { %v938_v27 = vcvt.f32.s32 %v937_v7  ;;  %v1072_v6 = vsel %vm1071_vm15, %v1779_v4, 0.0  ;;  %v1227_v4 = vpop.eup %1226 }
0x1717   :  { %v1073_v56 = vsel %vm123_vm3, %v1072_v6, 0.0  ;;  %v1039_v26 = vmul.f32 %v1227_v4, %v1745_v40  ;;  %v1229_v28 = vpop.eup %1228  ;;  %v1079_v33 = vsel %vm174_vm11, %v1078_v31, 0.0 }
0x1718   :  { %v941_v60 = vadd.s32 %v940_v59, %v938_v27  ;;  %1074 = vadd.xlane.f32.xlu0 %v1073_v56  ;;  %v910_v8 = vmul.f32 %v1229_v28, %v1740_v51 }
0x1719   :  { %v1040_v30 = vsub.f32 2.0, %v1039_v26 }
0x171a   :  { %vm942_vm0 = vcmp.eq.s32.totalorder %v1564_v41, %v941_v60  ;;  %v949_v11 = vcvt.s32.f32 %v941_v60 }
0x171b   :  { %v943_v36 = vsel %vm942_vm0, %v1849_v12, 0.0  ;;  %v1041_v19 = vmul.f32 %v1227_v4, %v1040_v30  ;;  %v911_v12 = vsub.f32 2.0, %v910_v8 }
0x171c   :  { %v944_v25 = vsel %vm123_vm3, %v943_v36, 0.0  ;;  %v950_v47 = vsel %vm174_vm11, %v949_v11, 0.0 }
0x171d   :  { %945 = vadd.xlane.f32.xlu1 %v944_v25  ;;  %v1042_v46 = vmul.f32 %v1711_v18, %v1041_v19  ;;  %v912_v62 = vmul.f32 %v1229_v28, %v911_v12 }
0x171f   :  { %v913_v34 = vmul.f32 %v1668_v13, %v912_v62 }
0x1736   :  { %1084 = vrot.lane.b32.xlu1 %v1083_v5, %s1257_s17 }
0x178b   :  { %v1075_v29 = vpop.xlane.xlu0 %1074 }
0x178c   :  { %v1076_v58 = vsel %vm171_vm10, %v1075_v29, 0.0 }
0x178d   :  { %v1077_v32 = vadd.f32 %v1076_v58, %v1042_v46 }
0x178f   :  { %v1080_v40 = vadd.f32 %v1079_v33, %v1077_v32 }
0x1790   :  { %v946_v14 = vpop.xlane.xlu1 %945 }
0x1791   :  { %1081 = vst [vmem:[%s1980_s4 + $0x7] sm:$0x1] %v1080_v40  ;;  %v947_v18 = vsel %vm171_vm10, %v946_v14, 0.0  ;;  %vm1092_vm10 = vcmask 254976  }
0x1792   :  { %v948_v51 = vadd.f32 %v947_v18, %v913_v34 }
0x1794   :  { %v951_v23 = vadd.f32 %v950_v47, %v948_v51 }
0x1796   :  { %952 = vst [vmem:[%s1980_s4 + $0x6] sm:$0x1] %v951_v23 }
0x17a8   :  { %v1085_v39 = vpop.permute.xlu1 %1084 }
0x17a9   :  { %v1087_v13 = vsel %vm123_vm3, %v1630_v20, %v1085_v39 }
0x17aa   :  { %1089 = vrot.lane.b32.xlu2 %v1087_v13, %s1256_s24 }
0x1804   :  { %v1090_v41 = vpop.permute.xlu2 %1089 }
0x1805   :  { %1093 = vst.msk [vmem:[#allocation2] sm:$0x3] %vm1092_vm10, %v1090_v41 }
0x1806   :  { %1106 = dma.vmem_to_hbm [thread:$0]  %s1102_s23, 32, %s1104_s27, [#allocation3]  }
0x1807   :  { %1254 = dma.done.wait [#allocation3], 32  }
0x1808   :  { %1255 = vsyncadd [#allocation3], 4294967264 }
0x1809   :  { %1113 = vsyncpa [#allocation3], 1 }

</bundles_post_ra>
